<compile_context>
chip_gen: v7x
topology: tpu7x:2x2x1
jax: 0.10.0
libtpu: 0.0.40
codegen_flags: <defaults>
</compile_context>

<pallas_src>
import functools
import math
import numpy as np

import jax
import jax.numpy as jnp
from jax.experimental import pallas as pl
from jax.experimental.pallas import tpu as pltpu


def _round_up(x, m):
    return (x + m - 1) // m * m


# ----------------------------------------------------------------------------
# Pallas matmul kernel: out = act(a @ b + bias).  bf16 in, f32 accumulate,
# bf16 out.  Grid is (M tiles, N tiles); K is carried as one full-extent
# block, so there is no K loop and no accumulator scratch.
# ----------------------------------------------------------------------------
def _mm_kernel(a_ref, b_ref, bias_ref, o_ref, *, act):
    r = jnp.dot(a_ref[...], b_ref[...], preferred_element_type=jnp.float32)
    r = r + bias_ref[...]
    if act == "silu":
        # exp and approx-reciprocal both land on the EUP slot
        r = r * pl.reciprocal(1.0 + jnp.exp(-r), approx=True)
    o_ref[...] = r.astype(o_ref.dtype)


@functools.lru_cache(maxsize=None)
def _get_matmul(Mp, K, Np, TM, TN, act):
    return pl.pallas_call(
        functools.partial(_mm_kernel, act=act),
        out_shape=jax.ShapeDtypeStruct((Mp, Np), jnp.bfloat16),
        grid_spec=pltpu.PrefetchScalarGridSpec(
            num_scalar_prefetch=0,
            grid=(Mp // TM, Np // TN),
            in_specs=[
                pl.BlockSpec((TM, K), lambda i, j: (i, 0)),    # full-K block
                pl.BlockSpec((K, TN), lambda i, j: (0, j)),
                pl.BlockSpec((1, TN), lambda i, j: (0, j)),
            ],
            out_specs=pl.BlockSpec((TM, TN), lambda i, j: (i, j)),
        ),
        compiler_params=pltpu.CompilerParams(
            dimension_semantics=("parallel", "parallel")),
    )


def prep_matmul(w_kn, b=None):
    """Prepare a (K, N) weight + (N,) bias ONCE at init: pad N to a lane
    multiple, cast weight to bf16, keep bias in f32."""
    K, N = w_kn.shape
    Np = _round_up(N, 128)
    w = jnp.pad(w_kn.astype(jnp.float32), ((0, 0), (0, Np - N)))
    w = w.astype(jnp.bfloat16)
    if b is None:
        bias = jnp.zeros((Np,), jnp.float32)
    else:
        bias = jnp.pad(b.astype(jnp.float32), (0, Np - N))
    return {"w": w, "b": bias.reshape(1, Np), "n": N}


def matmul_prepped(x2d, mm, act="none"):
    """x2d: (M, K) -> act(x2d @ w + b), sliced back to (M, N). bf16 output."""
    M, K = x2d.shape
    Kw, Np = mm["w"].shape
    assert K == Kw, (K, Kw)
    if M <= 256:
        Mp = _round_up(M, 8)          # sublane multiple only, no 128 padding
        TM = Mp
    else:
        TM = 256
        Mp = _round_up(M, TM)
    TN = 256 if Np % 256 == 0 else 128
    a = x2d.astype(jnp.bfloat16)
    if Mp != M:
        a = jnp.pad(a, ((0, Mp - M), (0, 0)))
    out = _get_matmul(Mp, K, Np, TM, TN, act)(a, mm["w"], mm["b"])
    if Mp != M or Np != mm["n"]:
        out = out[:M, :mm["n"]]
    return out


def linear_prepped(x2d, p, act="none"):
    return matmul_prepped(x2d, p["mm"], act)


# ----------------------------------------------------------------------------
# Conv as im2col + Pallas matmul (NHWC activations, weights prepped at init)
# ----------------------------------------------------------------------------
def _im2col(x, kh, kw, stride, pad):
    # TODO(synk): im2col patches are materialized (not fused into the matmul K
    # reduction); acceptable at these shapes since everything runs inside one jit.
    B, H, W, C = x.shape
    xp = jnp.pad(x, ((0, 0), (pad, pad), (pad, pad), (0, 0)))
    Ho = (H + 2 * pad - kh) // stride + 1
    Wo = (W + 2 * pad - kw) // stride + 1
    cols = []
    for i in range(kh):
        for j in range(kw):
            cols.append(xp[:, i:i + stride * Ho:stride,
                           j:j + stride * Wo:stride, :])
    patches = jnp.concatenate(cols, axis=-1)      # (B, Ho, Wo, kh*kw*C)
    return patches.reshape(B * Ho * Wo, kh * kw * C), (B, Ho, Wo)


def conv_prepped(x, p, stride=1, act="silu", pad=None):
    k = p["k"]
    if pad is None:
        pad = (k - 1) // 2
    B, H, W, C = x.shape
    if k == 1 and stride == 1 and pad == 0:       # 1x1 conv: just a matmul
        out = matmul_prepped(x.reshape(B * H * W, C), p["mm"], act)
        return out.reshape(B, H, W, -1)
    patches, (B2, Ho, Wo) = _im2col(x, k, k, stride, pad)
    out = matmul_prepped(patches, p["mm"], act)
    return out.reshape(B2, Ho, Wo, -1)


# ----------------------------------------------------------------------------
# Deterministic parameter init (weights prepped for the kernel at init time)
# ----------------------------------------------------------------------------
class PRNG:
    def __init__(self, seed):
        self.key = jax.random.PRNGKey(seed)

    def next(self):
        self.key, sub = jax.random.split(self.key)
        return sub


def _conv_wb(rng, cin, cout, k):
    # BaseConv = Conv2d(bias=False) + BN + SiLU; BN folded into (w, b).
    w = jax.random.normal(rng.next(), (cout, cin, k, k), jnp.float32)
    w = w * (1.0 / math.sqrt(cin * k * k))
    b = 0.01 * jax.random.normal(rng.next(), (cout,), jnp.float32)
    return w, b


def _prep_conv(w, b):
    cout, cin, kh, kw = w.shape
    w_kn = jnp.transpose(w, (2, 3, 1, 0)).reshape(kh * kw * cin, cout)
    return {"mm": prep_matmul(w_kn, b), "k": kh}


def init_conv(rng, cin, cout, k):
    return _prep_conv(*_conv_wb(rng, cin, cout, k))


def init_linear(rng, fin, fout, bias=True):
    w = jax.random.normal(rng.next(), (fout, fin), jnp.float32)
    w = w * (1.0 / math.sqrt(fin))
    b = (0.01 * jax.random.normal(rng.next(), (fout,), jnp.float32)
         if bias else None)
    return {"mm": prep_matmul(w.T, b)}


def init_ln(dim):
    return {"g": jnp.ones((dim,), jnp.float32),
            "b": jnp.zeros((dim,), jnp.float32)}


def layernorm(x, p, eps=1e-5):
    xf = x.astype(jnp.float32)
    mu = xf.mean(-1, keepdims=True)
    var = ((xf - mu) ** 2).mean(-1, keepdims=True)
    y = (xf - mu) * jax.lax.rsqrt(var + eps) * p["g"] + p["b"]
    return y.astype(x.dtype)


# ----------------------------------------------------------------------------
# CSPDarknet building blocks
# ----------------------------------------------------------------------------
def init_bottleneck(rng, cin, cout, shortcut=True, expansion=1.0):
    hidden = int(cout * expansion)
    return {"conv1": init_conv(rng, cin, hidden, 1),
            "conv2": init_conv(rng, hidden, cout, 3),
            "use_add": shortcut and cin == cout}


def bottleneck(p, x):
    y = conv_prepped(x, p["conv1"], 1, "silu")
    y = conv_prepped(y, p["conv2"], 1, "silu")
    return y + x if p["use_add"] else y


def init_csp(rng, cin, cout, n=1, shortcut=True, expansion=0.5):
    hidden = int(cout * expansion)
    w1, b1 = _conv_wb(rng, cin, hidden, 1)
    w2, b2 = _conv_wb(rng, cin, hidden, 1)
    # conv1 / conv2 read the same input: fuse along output channels so ONE
    # Pallas matmul computes both branches (fewer launches, wider N grid).
    conv12 = _prep_conv(jnp.concatenate([w1, w2], axis=0),
                        jnp.concatenate([b1, b2], axis=0))
    return {"conv12": conv12, "hidden": hidden,
            "conv3": init_conv(rng, 2 * hidden, cout, 1),
            "m": [init_bottleneck(rng, hidden, hidden, shortcut, 1.0)
                  for _ in range(n)]}


def csp_layer(p, x):
    h = p["hidden"]
    x12 = conv_prepped(x, p["conv12"], 1, "silu")
    x1, x2 = x12[..., :h], x12[..., h:]
    for bp in p["m"]:
        x1 = bottleneck(bp, x1)
    x = jnp.concatenate([x1, x2], axis=-1)
    return conv_prepped(x, p["conv3"], 1, "silu")


def init_focus(rng, cin, cout, k=3):
    return {"conv": init_conv(rng, cin * 4, cout, k)}


def focus(p, x):
    tl = x[:, ::2, ::2, :]
    bl = x[:, 1::2, ::2, :]
    tr = x[:, ::2, 1::2, :]
    br = x[:, 1::2, 1::2, :]
    x = jnp.concatenate([tl, bl, tr, br], axis=-1)
    return conv_prepped(x, p["conv"], 1, "silu")


def init_spp(rng, cin, cout, ks=(5, 9, 13)):
    hidden = cin // 2
    return {"conv1": init_conv(rng, cin, hidden, 1),
            "conv2": init_conv(rng, hidden * (len(ks) + 1), cout, 1),
            "ks": ks}


def _maxpool_same(x, k):
    # TODO(synk): max-pool uses lax.reduce_window glue, not a Pallas kernel.
    pad = k // 2
    init = jnp.array(-jnp.inf, dtype=x.dtype)
    return jax.lax.reduce_window(
        x, init, jax.lax.max,
        (1, k, k, 1), (1, 1, 1, 1),
        ((0, 0), (pad, pad), (pad, pad), (0, 0)))


def spp_bottleneck(p, x):
    x = conv_prepped(x, p["conv1"], 1, "silu")
    pools = [_maxpool_same(x, k) for k in p["ks"]]
    x = jnp.concatenate([x] + pools, axis=-1)
    return conv_prepped(x, p["conv2"], 1, "silu")


# ----------------------------------------------------------------------------
# Swin branch: PatchEmbed, SwinTransformerBlock, BasicLayer, PatchMerging
# ----------------------------------------------------------------------------
def init_patch_embed(rng, patch_size, in_c, embed_dim, norm=True):
    w = jax.random.normal(rng.next(), (embed_dim, in_c, patch_size, patch_size),
                          jnp.float32) * (1.0 / math.sqrt(in_c * patch_size ** 2))
    b = 0.01 * jax.random.normal(rng.next(), (embed_dim,), jnp.float32)
    return {"conv": _prep_conv(w, b), "ps": patch_size,
            "norm": init_ln(embed_dim) if norm else None}


def patch_embed(p, x):
    B, H, W, C = x.shape
    ps = p["ps"]
    pad_h = (ps - H % ps) % ps
    pad_w = (ps - W % ps) % ps
    if pad_h or pad_w:
        x = jnp.pad(x, ((0, 0), (0, pad_h), (0, pad_w), (0, 0)))
    y = conv_prepped(x, p["conv"], stride=ps, act="none", pad=0)
    Hn, Wn = y.shape[1], y.shape[2]
    y = y.reshape(B, Hn * Wn, -1)
    if p["norm"] is not None:
        y = layernorm(y, p["norm"])
    return y, Hn, Wn


def _relative_position_index(ws):
    coords = np.stack(np.meshgrid(np.arange(ws), np.arange(ws), indexing="ij"))
    coords_flat = coords.reshape(2, -1)
    rel = coords_flat[:, :, None] - coords_flat[:, None, :]
    rel = rel.transpose(1, 2, 0).astype(np.int64)
    rel[:, :, 0] += ws - 1
    rel[:, :, 1] += ws - 1
    rel[:, :, 0] *= 2 * ws - 1
    return rel.sum(-1)            # numpy (ws*ws, ws*ws)


def init_window_attention(rng, dim, ws, num_heads, qkv_bias=True):
    rpb = 0.02 * jax.random.normal(
        rng.next(), ((2 * ws - 1) ** 2, num_heads), jnp.float32)
    idx = _relative_position_index(ws)
    n = ws * ws
    # precompute the gathered relative-position-bias table once at init
    table = rpb[idx.reshape(-1)].reshape(n, n, num_heads)
    table = jnp.transpose(table, (2, 0, 1))       # (nh, N, N)
    return {"qkv": init_linear(rng, dim, 3 * dim, bias=qkv_bias),
            "proj": init_linear(rng, dim, dim, bias=True),
            "rpb_t": table, "nh": num_heads, "ws": ws}


def window_attention(p, x, mask=None):
    # TODO(synk): per-window attention matmuls + softmax stay in XLA glue.
    Bn, N, C = x.shape
    nh = p["nh"]
    hd = C // nh
    qkv = matmul_prepped(x.reshape(Bn * N, C), p["qkv"]["mm"])
    qkv = qkv.reshape(Bn, N, 3, nh, hd).transpose(2, 0, 3, 1, 4)
    q, k, v = qkv[0], qkv[1], qkv[2]
    q = q * (hd ** -0.5)
    attn = jnp.einsum("bhnd,bhmd->bhnm", q, k,
                      preferred_element_type=jnp.float32)
    attn = attn + p["rpb_t"][None]
    if mask is not None:
        nW = mask.shape[0]
        attn = attn.reshape(Bn // nW, nW, nh, N, N) + mask[None, :, None]
        attn = attn.reshape(Bn, nh, N, N)
    attn = jax.nn.softmax(attn, axis=-1)
    out = jnp.einsum("bhnm,bhmd->bhnd", attn.astype(v.dtype), v,
                     preferred_element_type=jnp.float32)
    out = out.transpose(0, 2, 1, 3).reshape(Bn * N, C).astype(jnp.bfloat16)
    out = matmul_prepped(out, p["proj"]["mm"])
    return out.reshape(Bn, N, C)


def _window_partition(x, ws):
    B, H, W, C = x.shape
    x = x.reshape(B, H // ws, ws, W // ws, ws, C)
    return x.transpose(0, 1, 3, 2, 4, 5).reshape(-1, ws, ws, C)


def _window_reverse(windows, ws, H, W):
    B = windows.shape[0] // (H * W // ws // ws)
    x = windows.reshape(B, H // ws, W // ws, ws, ws, -1)
    return x.transpose(0, 1, 3, 2, 4, 5).reshape(B, H, W, -1)


def init_swin_block(rng, dim, num_heads, ws, shift, mlp_ratio, qkv_bias):
    hidden = int(dim * mlp_ratio)
    return {"norm1": init_ln(dim),
            "attn": init_window_attention(rng, dim, ws, num_heads, qkv_bias),
            "norm2": init_ln(dim),
            "fc1": init_linear(rng, dim, hidden),
            "fc2": init_linear(rng, hidden, dim),
            "ws": ws, "shift": shift}


def swin_block(p, x, H, W, attn_mask):
    # TODO(synk): drop_path / dropout treated as inference-mode identities.
    B, L, C = x.shape
    ws, shift = p["ws"], p["shift"]
    shortcut = x
    xn = layernorm(x, p["norm1"]).reshape(B, H, W, C)
    pad_b = (ws - H % ws) % ws
    pad_r = (ws - W % ws) % ws
    if pad_b or pad_r:
        xn = jnp.pad(xn, ((0, 0), (0, pad_b), (0, pad_r), (0, 0)))
    Hp, Wp = H + pad_b, W + pad_r
    if shift > 0:
        xn = jnp.roll(xn, shift=(-shift, -shift), axis=(1, 2))
        mask = attn_mask
    else:
        mask = None
    xw = _window_partition(xn, ws).reshape(-1, ws * ws, C)
    aw = window_attention(p["attn"], xw, mask).reshape(-1, ws, ws, C)
    xn = _window_reverse(aw, ws, Hp, Wp)
    if shift > 0:
        xn = jnp.roll(xn, shift=(shift, shift), axis=(1, 2))
    xn = xn[:, :H, :W, :].reshape(B, H * W, C)
    x = shortcut + xn
    # MLP: fc1 -> GELU (exact erf, f32) -> fc2
    y = layernorm(x, p["norm2"])
    y = matmul_prepped(y.reshape(B * L, C), p["fc1"]["mm"])
    y = jax.nn.gelu(y.astype(jnp.float32), approximate=False)
    y = matmul_prepped(y, p["fc2"]["mm"])
    return x + y.reshape(B, L, C)


@functools.lru_cache(maxsize=None)
def _get_attn_mask(H, W, ws, shift):
    # precomputed (host numpy) shifted-window attention mask -> (nW, N, N)
    Hp = int(np.ceil(H / ws)) * ws
    Wp = int(np.ceil(W / ws)) * ws
    img_mask = np.zeros((1, Hp, Wp, 1), np.float32)
    slices = (slice(0, -ws), slice(-ws, -shift), slice(-shift, None))
    cnt = 0
    for h in slices:
        for w in slices:
            img_mask[:, h, w, :] = cnt
            cnt += 1
    m = img_mask.reshape(1, Hp // ws, ws, Wp // ws, ws, 1)
    m = m.transpose(0, 1, 3, 2, 4, 5).reshape(-1, ws * ws)
    am = m[:, None, :] - m[:, :, None]
    am = np.where(am != 0, -100.0, 0.0).astype(np.float32)
    return jnp.asarray(am)


def init_patch_merging(rng, dim):
    return {"norm": init_ln(4 * dim),
            "red": init_linear(rng, 4 * dim, 2 * dim, bias=False)}


def patch_merging(p, x, H, W):
    B, L, C = x.shape
    x = x.reshape(B, H, W, C)
    if (H % 2) or (W % 2):
        x = jnp.pad(x, ((0, 0), (0, H % 2), (0, W % 2), (0, 0)))
    x0 = x[:, 0::2, 0::2, :]
    x1 = x[:, 1::2, 0::2, :]
    x2 = x[:, 0::2, 1::2, :]
    x3 = x[:, 1::2, 1::2, :]
    x = jnp.concatenate([x0, x1, x2, x3], axis=-1)
    Hn, Wn = x.shape[1], x.shape[2]
    x = x.reshape(B, Hn * Wn, 4 * C)
    x = layernorm(x, p["norm"])
    x = linear_prepped(x.reshape(B * Hn * Wn, 4 * C), p["red"])
    return x.reshape(B, Hn * Wn, 2 * C)


def init_basic_layer(rng, dim, depth, num_heads, ws, mlp_ratio, qkv_bias,
                     downsample=True):
    blocks = [init_swin_block(rng, dim, num_heads, ws,
                              0 if i % 2 == 0 else ws // 2,
                              mlp_ratio, qkv_bias)
              for i in range(depth)]
    return {"blocks": blocks, "ws": ws,
            "downsample": init_patch_merging(rng, dim) if downsample else None}


def basic_layer(p, x, H, W):
    ws = p["ws"]
    attn_mask = _get_attn_mask(H, W, ws, ws // 2)
    for bp in p["blocks"]:
        x = swin_block(bp, x, H, W, attn_mask)
    if p["downsample"] is not None:
        x = patch_merging(p["downsample"], x, H, W)
        H, W = (H + 1) // 2, (W + 1) // 2
    return x, H, W


def merge_singe_csp(y, H, W):
    # torch: (B, L, C) -> transpose -> view (B, C, H, W).  In NHWC: (B,H,W,C).
    B, L, C = y.shape
    return y.reshape(B, H, W, C)


# ----------------------------------------------------------------------------
# CSPDarknet
# ----------------------------------------------------------------------------
def init_cspdarknet(rng, dep_mul, wid_mul, *, embed_dim=16, depths=(2,),
                    num_heads=(2,), window_size=4, patch_size=4, in_chans=3,
                    mlp_ratio=4.0, qkv_bias=True):
    bc = int(wid_mul * 64)
    bd = max(round(dep_mul * 3), 1)
    return {
        "stem": init_focus(rng, in_chans, bc, 3),
        "dark2": {"conv": init_conv(rng, bc, bc * 2, 3),
                  "csp": init_csp(rng, bc * 2, bc * 2, n=bd)},
        "cat_conv": init_conv(rng, bc * 2 + embed_dim, bc * 2, 1),
        "cat_csp": init_csp(rng, (bc * 2 + embed_dim) * 2, bc * 4, n=bd),
        "dark3": {"conv": init_conv(rng, bc * 2, bc * 4, 3),
                  "csp": init_csp(rng, bc * 4, bc * 4, n=bd * 3)},
        "dark4": {"conv": init_conv(rng, bc * 4, bc * 8, 3),
                  "csp": init_csp(rng, bc * 8, bc * 8, n=bd * 3)},
        "dark5": {"conv": init_conv(rng, bc * 8, bc * 16, 3),
                  "spp": init_spp(rng, bc * 16, bc * 16),
                  "csp": init_csp(rng, bc * 16, bc * 16, n=bd, shortcut=False)},
        "patch_embed": init_patch_embed(rng, patch_size, in_chans, embed_dim),
        "layers": init_basic_layer(rng, embed_dim, depths[0], num_heads[0],
                                   window_size, mlp_ratio, qkv_bias,
                                   downsample=True),
    }


def cspdarknet_forward(params, x_nchw,
                       out_features=("dark2", "dark3", "dark4", "dark5")):
    x = jnp.transpose(x_nchw, (0, 2, 3, 1)).astype(jnp.bfloat16)  # NHWC bf16

    y, H, W = patch_embed(params["patch_embed"], x)
    conv_y = merge_singe_csp(y, H, W)

    outputs = {}
    s = focus(params["stem"], x)
    outputs["stem"] = s

    d2 = conv_prepped(s, params["dark2"]["conv"], 2, "silu")
    d2 = csp_layer(params["dark2"]["csp"], d2)
    outputs["dark2"] = d2

    xc = jnp.concatenate([d2, conv_y.astype(d2.dtype)], axis=-1)
    xc = conv_prepped(xc, params["cat_conv"], 1, "silu")

    y, H, W = basic_layer(params["layers"], y, H, W)
    conv_y = merge_singe_csp(y, H, W)

    d3 = conv_prepped(xc, params["dark3"]["conv"], 2, "silu")
    d3 = csp_layer(params["dark3"]["csp"], d3)
    outputs["dark3"] = d3

    xc = jnp.concatenate([d3, conv_y.astype(d3.dtype)], axis=-1)
    xc = csp_layer(params["cat_csp"], xc)

    d4 = conv_prepped(xc, params["dark4"]["conv"], 2, "silu")
    d4 = csp_layer(params["dark4"]["csp"], d4)
    outputs["dark4"] = d4

    d5 = conv_prepped(d4, params["dark5"]["conv"], 2, "silu")
    d5 = spp_bottleneck(params["dark5"]["spp"], d5)
    d5 = csp_layer(params["dark5"]["csp"], d5)
    outputs["dark5"] = d5

    # return NCHW f32 like the PyTorch module
    return {k: jnp.transpose(v, (0, 3, 1, 2)).astype(jnp.float32)
            for k, v in outputs.items() if k in out_features}


if __name__ == "__main__":
    key = jax.random.PRNGKey(0)
    x_key, _ = jax.random.split(key)
    # small config: wid_mul=0.25 -> base_channels=16, dep_mul=1/3 -> base_depth=1
    # embed_dim=16, depths=(2,), heads=(2,), window=4, patch=4 ; input 2x3x32x32
    x = jax.random.normal(x_key, (2, 3, 32, 32), jnp.float32)

    rng = PRNG(0)
    params = init_cspdarknet(rng, dep_mul=1.0 / 3.0, wid_mul=0.25,
                             embed_dim=16, depths=(2,), num_heads=(2,),
                             window_size=4, patch_size=4, in_chans=3)

    # one jit over the whole forward; params are closed over as constants
    fwd = jax.jit(lambda inp: cspdarknet_forward(params, inp))
    outs = jax.block_until_ready(fwd(x))

    expected = {
        "dark2": (2, 32, 8, 8),
        "dark3": (2, 64, 4, 4),
        "dark4": (2, 128, 2, 2),
        "dark5": (2, 256, 1, 1),
    }
    for k, shp in expected.items():
        assert outs[k].shape == shp, (k, outs[k].shape, shp)
        assert bool(jnp.all(jnp.isfinite(outs[k])))
    print("KERNEL_OK")
</pallas_src>

<mosaic_0001>
module attributes {stable_mosaic.version = 11 : i64} {
  func.func @_mm_kernel(%arg0: i32, %arg1: i32, %arg2: memref<128x48xbf16, #tpu.memory_space<vmem>>, %arg3: memref<48x128xbf16, #tpu.memory_space<vmem>>, %arg4: memref<1x128xf32, #tpu.memory_space<vmem>>, %arg5: memref<128x128xbf16, #tpu.memory_space<vmem>>) attributes {dimension_semantics = [#tpu.dimension_semantics<parallel>, #tpu.dimension_semantics<parallel>], iteration_bounds = array<i64: 1, 1>, scalar_prefetch = 0 : i64, scratch_operands = 0 : i64, tpu.core_type = #tpu.core_type<tc>, window_params = [{transform_indices = @transform_0, window_bounds = array<i64: 128, 48>}, {transform_indices = @transform_1, window_bounds = array<i64: 48, 128>}, {transform_indices = @transform_2, window_bounds = array<i64: 1, 128>}, {transform_indices = @transform_3, window_bounds = array<i64: 128, 128>}]} {
    %c0 = arith.constant 0 : index
    %c0_0 = arith.constant 0 : index
    %0 = vector.load %arg2[%c0, %c0_0] : memref<128x48xbf16, #tpu.memory_space<vmem>>, vector<128x48xbf16>
    %c0_1 = arith.constant 0 : index
    %c0_2 = arith.constant 0 : index
    %1 = vector.load %arg3[%c0_1, %c0_2] : memref<48x128xbf16, #tpu.memory_space<vmem>>, vector<48x128xbf16>
    %cst = arith.constant dense<0.000000e+00> : vector<128x128xf32>
    %2 = tpu.matmul %0, %1, %cst {dimension_numbers = #tpu.dot_dimension_numbers<[1], [0], [0], [1], [0, 0, 1, 1], [], []>} : vector<128x48xbf16>, vector<48x128xbf16>, vector<128x128xf32> -> vector<128x128xf32>
    %c0_3 = arith.constant 0 : index
    %c0_4 = arith.constant 0 : index
    %3 = vector.load %arg4[%c0_3, %c0_4] : memref<1x128xf32, #tpu.memory_space<vmem>>, vector<1x128xf32>
    %4 = vector.broadcast %3 : vector<1x128xf32> to vector<128x128xf32>
    %5 = arith.addf %2, %4 : vector<128x128xf32>
    %6 = arith.truncf %5 : vector<128x128xf32> to vector<128x128xbf16>
    %c0_5 = arith.constant 0 : index
    %c0_6 = arith.constant 0 : index
    %7 = vector.load %arg5[%c0_5, %c0_6] : memref<128x128xbf16, #tpu.memory_space<vmem>>, vector<128x128xbf16>
    tpu.vector_store %arg5[%c0_5, %c0_6], %6 {strides = array<i32>} : memref<128x128xbf16, #tpu.memory_space<vmem>>, vector<128x128xbf16>,
    return
  }
  func.func @transform_0(%arg0: i32, %arg1: i32) -> (i32, i32) {
    %c0_i32 = arith.constant 0 : i32
    %c0_i32_0 = arith.constant 0 : i32
    return %arg0, %c0_i32 : i32, i32
  }
  func.func @transform_1(%arg0: i32, %arg1: i32) -> (i32, i32) {
    %c0_i32 = arith.constant 0 : i32
    %c0_i32_0 = arith.constant 0 : i32
    return %c0_i32, %arg1 : i32, i32
  }
  func.func @transform_2(%arg0: i32, %arg1: i32) -> (i32, i32) {
    %c0_i32 = arith.constant 0 : i32
    %c0_i32_0 = arith.constant 0 : i32
    return %c0_i32, %arg1 : i32, i32
  }
  func.func @transform_3(%arg0: i32, %arg1: i32) -> (i32, i32) {
    %c0_i32 = arith.constant 0 : i32
    return %arg0, %arg1 : i32, i32
  }
}

module attributes {stable_mosaic.version = 11 : i64} {
  func.func @_mm_kernel(%arg0: i32, %arg1: i32, %arg2: memref<128x16xbf16, #tpu.memory_space<vmem>>, %arg3: memref<16x128xbf16, #tpu.memory_space<vmem>>, %arg4: memref<1x128xf32, #tpu.memory_space<vmem>>, %arg5: memref<128x128xbf16, #tpu.memory_space<vmem>>) attributes {dimension_semantics = [#tpu.dimension_semantics<parallel>, #tpu.dimension_semantics<parallel>], iteration_bounds = array<i64: 1, 1>, scalar_prefetch = 0 : i64, scratch_operands = 0 : i64, tpu.core_type = #tpu.core_type<tc>, window_params = [{transform_indices = @transform_0, window_bounds = array<i64: 128, 16>}, {transform_indices = @transform_1, window_bounds = array<i64: 16, 128>}, {transform_indices = @transform_2, window_bounds = array<i64: 1, 128>}, {transform_indices = @transform_3, window_bounds = array<i64: 128, 128>}]} {
    %c0 = arith.constant 0 : index
    %c0_0 = arith.constant 0 : index
    %0 = vector.load %arg2[%c0, %c0_0] : memref<128x16xbf16, #tpu.memory_space<vmem>>, vector<128x16xbf16>
    %c0_1 = arith.constant 0 : index
    %c0_2 = arith.constant 0 : index
    %1 = vector.load %arg3[%c0_1, %c0_2] : memref<16x128xbf16, #tpu.memory_space<vmem>>, vector<16x128xbf16>
    %cst = arith.constant dense<0.000000e+00> : vector<128x128xf32>
    %2 = tpu.matmul %0, %1, %cst {dimension_numbers = #tpu.dot_dimension_numbers<[1], [0], [0], [1], [0, 0, 1, 1], [], []>} : vector<128x16xbf16>, vector<16x128xbf16>, vector<128x128xf32> -> vector<128x128xf32>
    %c0_3 = arith.constant 0 : index
    %c0_4 = arith.constant 0 : index
    %3 = vector.load %arg4[%c0_3, %c0_4] : memref<1x128xf32, #tpu.memory_space<vmem>>, vector<1x128xf32>
    %4 = vector.broadcast %3 : vector<1x128xf32> to vector<128x128xf32>
    %5 = arith.addf %2, %4 : vector<128x128xf32>
    %6 = arith.truncf %5 : vector<128x128xf32> to vector<128x128xbf16>
    %c0_5 = arith.constant 0 : index
    %c0_6 = arith.constant 0 : index
    %7 = vector.load %arg5[%c0_5, %c0_6] : memref<128x128xbf16, #tpu.memory_space<vmem>>, vector<128x128xbf16>
    tpu.vector_store %arg5[%c0_5, %c0_6], %6 {strides = array<i32>} : memref<128x128xbf16, #tpu.memory_space<vmem>>, vector<128x128xbf16>,
    return
  }
  func.func @transform_0(%arg0: i32, %arg1: i32) -> (i32, i32) {
    %c0_i32 = arith.constant 0 : i32
    %c0_i32_0 = arith.constant 0 : i32
    return %arg0, %c0_i32 : i32, i32
  }
  func.func @transform_1(%arg0: i32, %arg1: i32) -> (i32, i32) {
    %c0_i32 = arith.constant 0 : i32
    %c0_i32_0 = arith.constant 0 : i32
    return %c0_i32, %arg1 : i32, i32
  }
  func.func @transform_2(%arg0: i32, %arg1: i32) -> (i32, i32) {
    %c0_i32 = arith.constant 0 : i32
    %c0_i32_0 = arith.constant 0 : i32
    return %c0_i32, %arg1 : i32, i32
  }
  func.func @transform_3(%arg0: i32, %arg1: i32) -> (i32, i32) {
    %c0_i32 = arith.constant 0 : i32
    return %arg0, %arg1 : i32, i32
  }
}

module attributes {stable_mosaic.version = 11 : i64} {
  func.func @_mm_kernel(%arg0: i32, %arg1: i32, %arg2: memref<128x64xbf16, #tpu.memory_space<vmem>>, %arg3: memref<64x128xbf16, #tpu.memory_space<vmem>>, %arg4: memref<1x128xf32, #tpu.memory_space<vmem>>, %arg5: memref<128x128xbf16, #tpu.memory_space<vmem>>) attributes {dimension_semantics = [#tpu.dimension_semantics<parallel>, #tpu.dimension_semantics<parallel>], iteration_bounds = array<i64: 1, 1>, scalar_prefetch = 0 : i64, scratch_operands = 0 : i64, tpu.core_type = #tpu.core_type<tc>, window_params = [{transform_indices = @transform_0, window_bounds = array<i64: 128, 64>}, {transform_indices = @transform_1, window_bounds = array<i64: 64, 128>}, {transform_indices = @transform_2, window_bounds = array<i64: 1, 128>}, {transform_indices = @transform_3, window_bounds = array<i64: 128, 128>}]} {
    %c0 = arith.constant 0 : index
    %c0_0 = arith.constant 0 : index
    %0 = vector.load %arg2[%c0, %c0_0] : memref<128x64xbf16, #tpu.memory_space<vmem>>, vector<128x64xbf16>
    %c0_1 = arith.constant 0 : index
    %c0_2 = arith.constant 0 : index
    %1 = vector.load %arg3[%c0_1, %c0_2] : memref<64x128xbf16, #tpu.memory_space<vmem>>, vector<64x128xbf16>
    %cst = arith.constant dense<0.000000e+00> : vector<128x128xf32>
    %2 = tpu.matmul %0, %1, %cst {dimension_numbers = #tpu.dot_dimension_numbers<[1], [0], [0], [1], [0, 0, 1, 1], [], []>} : vector<128x64xbf16>, vector<64x128xbf16>, vector<128x128xf32> -> vector<128x128xf32>
    %c0_3 = arith.constant 0 : index
    %c0_4 = arith.constant 0 : index
    %3 = vector.load %arg4[%c0_3, %c0_4] : memref<1x128xf32, #tpu.memory_space<vmem>>, vector<1x128xf32>
    %4 = vector.broadcast %3 : vector<1x128xf32> to vector<128x128xf32>
    %5 = arith.addf %2, %4 : vector<128x128xf32>
    %6 = arith.truncf %5 : vector<128x128xf32> to vector<128x128xbf16>
    %c0_5 = arith.constant 0 : index
    %c0_6 = arith.constant 0 : index
    %7 = vector.load %arg5[%c0_5, %c0_6] : memref<128x128xbf16, #tpu.memory_space<vmem>>, vector<128x128xbf16>
    tpu.vector_store %arg5[%c0_5, %c0_6], %6 {strides = array<i32>} : memref<128x128xbf16, #tpu.memory_space<vmem>>, vector<128x128xbf16>,
    return
  }
  func.func @transform_0(%arg0: i32, %arg1: i32) -> (i32, i32) {
    %c0_i32 = arith.constant 0 : i32
    %c0_i32_0 = arith.constant 0 : i32
    return %arg0, %c0_i32 : i32, i32
  }
  func.func @transform_1(%arg0: i32, %arg1: i32) -> (i32, i32) {
    %c0_i32 = arith.constant 0 : i32
    %c0_i32_0 = arith.constant 0 : i32
    return %c0_i32, %arg1 : i32, i32
  }
  func.func @transform_2(%arg0: i32, %arg1: i32) -> (i32, i32) {
    %c0_i32 = arith.constant 0 : i32
    %c0_i32_0 = arith.constant 0 : i32
    return %c0_i32, %arg1 : i32, i32
  }
  func.func @transform_3(%arg0: i32, %arg1: i32) -> (i32, i32) {
    %c0_i32 = arith.constant 0 : i32
    return %arg0, %arg1 : i32, i32
  }
}

module attributes {stable_mosaic.version = 11 : i64} {
  func.func @_mm_kernel(%arg0: i32, %arg1: i32, %arg2: memref<32x64xbf16, #tpu.memory_space<vmem>>, %arg3: memref<64x128xbf16, #tpu.memory_space<vmem>>, %arg4: memref<1x128xf32, #tpu.memory_space<vmem>>, %arg5: memref<32x128xbf16, #tpu.memory_space<vmem>>) attributes {dimension_semantics = [#tpu.dimension_semantics<parallel>, #tpu.dimension_semantics<parallel>], iteration_bounds = array<i64: 1, 1>, scalar_prefetch = 0 : i64, scratch_operands = 0 : i64, tpu.core_type = #tpu.core_type<tc>, window_params = [{transform_indices = @transform_0, window_bounds = array<i64: 32, 64>}, {transform_indices = @transform_1, window_bounds = array<i64: 64, 128>}, {transform_indices = @transform_2, window_bounds = array<i64: 1, 128>}, {transform_indices = @transform_3, window_bounds = array<i64: 32, 128>}]} {
    %c0 = arith.constant 0 : index
    %c0_0 = arith.constant 0 : index
    %0 = vector.load %arg2[%c0, %c0_0] : memref<32x64xbf16, #tpu.memory_space<vmem>>, vector<32x64xbf16>
    %c0_1 = arith.constant 0 : index
    %c0_2 = arith.constant 0 : index
    %1 = vector.load %arg3[%c0_1, %c0_2] : memref<64x128xbf16, #tpu.memory_space<vmem>>, vector<64x128xbf16>
    %cst = arith.constant dense<0.000000e+00> : vector<32x128xf32>
    %2 = tpu.matmul %0, %1, %cst {dimension_numbers = #tpu.dot_dimension_numbers<[1], [0], [0], [1], [0, 0, 1, 1], [], []>} : vector<32x64xbf16>, vector<64x128xbf16>, vector<32x128xf32> -> vector<32x128xf32>
    %c0_3 = arith.constant 0 : index
    %c0_4 = arith.constant 0 : index
    %3 = vector.load %arg4[%c0_3, %c0_4] : memref<1x128xf32, #tpu.memory_space<vmem>>, vector<1x128xf32>
    %4 = vector.broadcast %3 : vector<1x128xf32> to vector<32x128xf32>
    %5 = arith.addf %2, %4 : vector<32x128xf32>
    %6 = arith.truncf %5 : vector<32x128xf32> to vector<32x128xbf16>
    %c0_5 = arith.constant 0 : index
    %c0_6 = arith.constant 0 : index
    %7 = vector.load %arg5[%c0_5, %c0_6] : memref<32x128xbf16, #tpu.memory_space<vmem>>, vector<32x128xbf16>
    tpu.vector_store %arg5[%c0_5, %c0_6], %6 {strides = array<i32>} : memref<32x128xbf16, #tpu.memory_space<vmem>>, vector<32x128xbf16>,
    return
  }
  func.func @transform_0(%arg0: i32, %arg1: i32) -> (i32, i32) {
    %c0_i32 = arith.constant 0 : i32
    %c0_i32_0 = arith.constant 0 : i32
    return %arg0, %c0_i32 : i32, i32
  }
  func.func @transform_1(%arg0: i32, %arg1: i32) -> (i32, i32) {
    %c0_i32 = arith.constant 0 : i32
    %c0_i32_0 = arith.constant 0 : i32
    return %c0_i32, %arg1 : i32, i32
  }
  func.func @transform_2(%arg0: i32, %arg1: i32) -> (i32, i32) {
    %c0_i32 = arith.constant 0 : i32
    %c0_i32_0 = arith.constant 0 : i32
    return %c0_i32, %arg1 : i32, i32
  }
  func.func @transform_3(%arg0: i32, %arg1: i32) -> (i32, i32) {
    %c0_i32 = arith.constant 0 : i32
    return %arg0, %arg1 : i32, i32
  }
}

module attributes {stable_mosaic.version = 11 : i64} {
  func.func @_mm_kernel(%arg0: i32, %arg1: i32, %arg2: memref<256x108xbf16, #tpu.memory_space<vmem>>, %arg3: memref<108x128xbf16, #tpu.memory_space<vmem>>, %arg4: memref<1x128xf32, #tpu.memory_space<vmem>>, %arg5: memref<256x128xbf16, #tpu.memory_space<vmem>>) attributes {dimension_semantics = [#tpu.dimension_semantics<parallel>, #tpu.dimension_semantics<parallel>], iteration_bounds = array<i64: 2, 1>, scalar_prefetch = 0 : i64, scratch_operands = 0 : i64, tpu.core_type = #tpu.core_type<tc>, window_params = [{transform_indices = @transform_0, window_bounds = array<i64: 256, 108>}, {transform_indices = @transform_1, window_bounds = array<i64: 108, 128>}, {transform_indices = @transform_2, window_bounds = array<i64: 1, 128>}, {transform_indices = @transform_3, window_bounds = array<i64: 256, 128>}]} {
    %c0 = arith.constant 0 : index
    %c0_0 = arith.constant 0 : index
    %0 = vector.load %arg2[%c0, %c0_0] : memref<256x108xbf16, #tpu.memory_space<vmem>>, vector<256x108xbf16>
    %c0_1 = arith.constant 0 : index
    %c0_2 = arith.constant 0 : index
    %1 = vector.load %arg3[%c0_1, %c0_2] : memref<108x128xbf16, #tpu.memory_space<vmem>>, vector<108x128xbf16>
    %cst = arith.constant dense<0.000000e+00> : vector<256x128xf32>
    %2 = tpu.matmul %0, %1, %cst {dimension_numbers = #tpu.dot_dimension_numbers<[1], [0], [0], [1], [0, 0, 1, 1], [], []>} : vector<256x108xbf16>, vector<108x128xbf16>, vector<256x128xf32> -> vector<256x128xf32>
    %c0_3 = arith.constant 0 : index
    %c0_4 = arith.constant 0 : index
    %3 = vector.load %arg4[%c0_3, %c0_4] : memref<1x128xf32, #tpu.memory_space<vmem>>, vector<1x128xf32>
    %4 = vector.broadcast %3 : vector<1x128xf32> to vector<256x128xf32>
    %5 = arith.addf %2, %4 : vector<256x128xf32>
    %cst_5 = arith.constant 0.000000e+00 : f32
    %6 = vector.broadcast %cst_5 : f32 to vector<256x128xf32>
    %7 = arith.subf %6, %5 : vector<256x128xf32>
    %8 = math.exp %7 : vector<256x128xf32>
    %cst_6 = arith.constant 1.000000e+00 : f32
    %9 = vector.broadcast %cst_6 : f32 to vector<256x128xf32>
    %10 = arith.addf %9, %8 : vector<256x128xf32>
    %11 = tpu.reciprocal %10 {approx = true} : vector<256x128xf32> -> vector<256x128xf32>
    %12 = arith.mulf %5, %11 : vector<256x128xf32>
    %13 = arith.truncf %12 : vector<256x128xf32> to vector<256x128xbf16>
    %c0_7 = arith.constant 0 : index
    %c0_8 = arith.constant 0 : index
    %14 = vector.load %arg5[%c0_7, %c0_8] : memref<256x128xbf16, #tpu.memory_space<vmem>>, vector<256x128xbf16>
    tpu.vector_store %arg5[%c0_7, %c0_8], %13 {strides = array<i32>} : memref<256x128xbf16, #tpu.memory_space<vmem>>, vector<256x128xbf16>,
    return
  }
  func.func @transform_0(%arg0: i32, %arg1: i32) -> (i32, i32) {
    %c0_i32 = arith.constant 0 : i32
    %c0_i32_0 = arith.constant 0 : i32
    return %arg0, %c0_i32 : i32, i32
  }
  func.func @transform_1(%arg0: i32, %arg1: i32) -> (i32, i32) {
    %c0_i32 = arith.constant 0 : i32
    %c0_i32_0 = arith.constant 0 : i32
    return %c0_i32, %arg1 : i32, i32
  }
  func.func @transform_2(%arg0: i32, %arg1: i32) -> (i32, i32) {
    %c0_i32 = arith.constant 0 : i32
    %c0_i32_0 = arith.constant 0 : i32
    return %c0_i32, %arg1 : i32, i32
  }
  func.func @transform_3(%arg0: i32, %arg1: i32) -> (i32, i32) {
    %c0_i32 = arith.constant 0 : i32
    return %arg0, %arg1 : i32, i32
  }
}

module attributes {stable_mosaic.version = 11 : i64} {
  func.func @_mm_kernel(%arg0: i32, %arg1: i32, %arg2: memref<128x144xbf16, #tpu.memory_space<vmem>>, %arg3: memref<144x128xbf16, #tpu.memory_space<vmem>>, %arg4: memref<1x128xf32, #tpu.memory_space<vmem>>, %arg5: memref<128x128xbf16, #tpu.memory_space<vmem>>) attributes {dimension_semantics = [#tpu.dimension_semantics<parallel>, #tpu.dimension_semantics<parallel>], iteration_bounds = array<i64: 1, 1>, scalar_prefetch = 0 : i64, scratch_operands = 0 : i64, tpu.core_type = #tpu.core_type<tc>, window_params = [{transform_indices = @transform_0, window_bounds = array<i64: 128, 144>}, {transform_indices = @transform_1, window_bounds = array<i64: 144, 128>}, {transform_indices = @transform_2, window_bounds = array<i64: 1, 128>}, {transform_indices = @transform_3, window_bounds = array<i64: 128, 128>}]} {
    %c0 = arith.constant 0 : index
    %c0_0 = arith.constant 0 : index
    %0 = vector.load %arg2[%c0, %c0_0] : memref<128x144xbf16, #tpu.memory_space<vmem>>, vector<128x144xbf16>
    %c0_1 = arith.constant 0 : index
    %c0_2 = arith.constant 0 : index
    %1 = vector.load %arg3[%c0_1, %c0_2] : memref<144x128xbf16, #tpu.memory_space<vmem>>, vector<144x128xbf16>
    %cst = arith.constant dense<0.000000e+00> : vector<128x128xf32>
    %2 = tpu.matmul %0, %1, %cst {dimension_numbers = #tpu.dot_dimension_numbers<[1], [0], [0], [1], [0, 0, 1, 1], [], []>} : vector<128x144xbf16>, vector<144x128xbf16>, vector<128x128xf32> -> vector<128x128xf32>
    %c0_3 = arith.constant 0 : index
    %c0_4 = arith.constant 0 : index
    %3 = vector.load %arg4[%c0_3, %c0_4] : memref<1x128xf32, #tpu.memory_space<vmem>>, vector<1x128xf32>
    %4 = vector.broadcast %3 : vector<1x128xf32> to vector<128x128xf32>
    %5 = arith.addf %2, %4 : vector<128x128xf32>
    %cst_5 = arith.constant 0.000000e+00 : f32
    %6 = vector.broadcast %cst_5 : f32 to vector<128x128xf32>
    %7 = arith.subf %6, %5 : vector<128x128xf32>
    %8 = math.exp %7 : vector<128x128xf32>
    %cst_6 = arith.constant 1.000000e+00 : f32
    %9 = vector.broadcast %cst_6 : f32 to vector<128x128xf32>
    %10 = arith.addf %9, %8 : vector<128x128xf32>
    %11 = tpu.reciprocal %10 {approx = true} : vector<128x128xf32> -> vector<128x128xf32>
    %12 = arith.mulf %5, %11 : vector<128x128xf32>
    %13 = arith.truncf %12 : vector<128x128xf32> to vector<128x128xbf16>
    %c0_7 = arith.constant 0 : index
    %c0_8 = arith.constant 0 : index
    %14 = vector.load %arg5[%c0_7, %c0_8] : memref<128x128xbf16, #tpu.memory_space<vmem>>, vector<128x128xbf16>
    tpu.vector_store %arg5[%c0_7, %c0_8], %13 {strides = array<i32>} : memref<128x128xbf16, #tpu.memory_space<vmem>>, vector<128x128xbf16>,
    return
  }
  func.func @transform_0(%arg0: i32, %arg1: i32) -> (i32, i32) {
    %c0_i32 = arith.constant 0 : i32
    %c0_i32_0 = arith.constant 0 : i32
    return %arg0, %c0_i32 : i32, i32
  }
  func.func @transform_1(%arg0: i32, %arg1: i32) -> (i32, i32) {
    %c0_i32 = arith.constant 0 : i32
    %c0_i32_0 = arith.constant 0 : i32
    return %c0_i32, %arg1 : i32, i32
  }
  func.func @transform_2(%arg0: i32, %arg1: i32) -> (i32, i32) {
    %c0_i32 = arith.constant 0 : i32
    %c0_i32_0 = arith.constant 0 : i32
    return %c0_i32, %arg1 : i32, i32
  }
  func.func @transform_3(%arg0: i32, %arg1: i32) -> (i32, i32) {
    %c0_i32 = arith.constant 0 : i32
    return %arg0, %arg1 : i32, i32
  }
}

module attributes {stable_mosaic.version = 11 : i64} {
  func.func @_mm_kernel(%arg0: i32, %arg1: i32, %arg2: memref<128x32xbf16, #tpu.memory_space<vmem>>, %arg3: memref<32x128xbf16, #tpu.memory_space<vmem>>, %arg4: memref<1x128xf32, #tpu.memory_space<vmem>>, %arg5: memref<128x128xbf16, #tpu.memory_space<vmem>>) attributes {dimension_semantics = [#tpu.dimension_semantics<parallel>, #tpu.dimension_semantics<parallel>], iteration_bounds = array<i64: 1, 1>, scalar_prefetch = 0 : i64, scratch_operands = 0 : i64, tpu.core_type = #tpu.core_type<tc>, window_params = [{transform_indices = @transform_0, window_bounds = array<i64: 128, 32>}, {transform_indices = @transform_1, window_bounds = array<i64: 32, 128>}, {transform_indices = @transform_2, window_bounds = array<i64: 1, 128>}, {transform_indices = @transform_3, window_bounds = array<i64: 128, 128>}]} {
    %c0 = arith.constant 0 : index
    %c0_0 = arith.constant 0 : index
    %0 = vector.load %arg2[%c0, %c0_0] : memref<128x32xbf16, #tpu.memory_space<vmem>>, vector<128x32xbf16>
    %c0_1 = arith.constant 0 : index
    %c0_2 = arith.constant 0 : index
    %1 = vector.load %arg3[%c0_1, %c0_2] : memref<32x128xbf16, #tpu.memory_space<vmem>>, vector<32x128xbf16>
    %cst = arith.constant dense<0.000000e+00> : vector<128x128xf32>
    %2 = tpu.matmul %0, %1, %cst {dimension_numbers = #tpu.dot_dimension_numbers<[1], [0], [0], [1], [0, 0, 1, 1], [], []>} : vector<128x32xbf16>, vector<32x128xbf16>, vector<128x128xf32> -> vector<128x128xf32>
    %c0_3 = arith.constant 0 : index
    %c0_4 = arith.constant 0 : index
    %3 = vector.load %arg4[%c0_3, %c0_4] : memref<1x128xf32, #tpu.memory_space<vmem>>, vector<1x128xf32>
    %4 = vector.broadcast %3 : vector<1x128xf32> to vector<128x128xf32>
    %5 = arith.addf %2, %4 : vector<128x128xf32>
    %cst_5 = arith.constant 0.000000e+00 : f32
    %6 = vector.broadcast %cst_5 : f32 to vector<128x128xf32>
    %7 = arith.subf %6, %5 : vector<128x128xf32>
    %8 = math.exp %7 : vector<128x128xf32>
    %cst_6 = arith.constant 1.000000e+00 : f32
    %9 = vector.broadcast %cst_6 : f32 to vector<128x128xf32>
    %10 = arith.addf %9, %8 : vector<128x128xf32>
    %11 = tpu.reciprocal %10 {approx = true} : vector<128x128xf32> -> vector<128x128xf32>
    %12 = arith.mulf %5, %11 : vector<128x128xf32>
    %13 = arith.truncf %12 : vector<128x128xf32> to vector<128x128xbf16>
    %c0_7 = arith.constant 0 : index
    %c0_8 = arith.constant 0 : index
    %14 = vector.load %arg5[%c0_7, %c0_8] : memref<128x128xbf16, #tpu.memory_space<vmem>>, vector<128x128xbf16>
    tpu.vector_store %arg5[%c0_7, %c0_8], %13 {strides = array<i32>} : memref<128x128xbf16, #tpu.memory_space<vmem>>, vector<128x128xbf16>,
    return
  }
  func.func @transform_0(%arg0: i32, %arg1: i32) -> (i32, i32) {
    %c0_i32 = arith.constant 0 : i32
    %c0_i32_0 = arith.constant 0 : i32
    return %arg0, %c0_i32 : i32, i32
  }
  func.func @transform_1(%arg0: i32, %arg1: i32) -> (i32, i32) {
    %c0_i32 = arith.constant 0 : i32
    %c0_i32_0 = arith.constant 0 : i32
    return %c0_i32, %arg1 : i32, i32
  }
  func.func @transform_2(%arg0: i32, %arg1: i32) -> (i32, i32) {
    %c0_i32 = arith.constant 0 : i32
    %c0_i32_0 = arith.constant 0 : i32
    return %c0_i32, %arg1 : i32, i32
  }
  func.func @transform_3(%arg0: i32, %arg1: i32) -> (i32, i32) {
    %c0_i32 = arith.constant 0 : i32
    return %arg0, %arg1 : i32, i32
  }
}

module attributes {stable_mosaic.version = 11 : i64} {
  func.func @_mm_kernel(%arg0: i32, %arg1: i32, %arg2: memref<128x16xbf16, #tpu.memory_space<vmem>>, %arg3: memref<16x128xbf16, #tpu.memory_space<vmem>>, %arg4: memref<1x128xf32, #tpu.memory_space<vmem>>, %arg5: memref<128x128xbf16, #tpu.memory_space<vmem>>) attributes {dimension_semantics = [#tpu.dimension_semantics<parallel>, #tpu.dimension_semantics<parallel>], iteration_bounds = array<i64: 1, 1>, scalar_prefetch = 0 : i64, scratch_operands = 0 : i64, tpu.core_type = #tpu.core_type<tc>, window_params = [{transform_indices = @transform_0, window_bounds = array<i64: 128, 16>}, {transform_indices = @transform_1, window_bounds = array<i64: 16, 128>}, {transform_indices = @transform_2, window_bounds = array<i64: 1, 128>}, {transform_indices = @transform_3, window_bounds = array<i64: 128, 128>}]} {
    %c0 = arith.constant 0 : index
    %c0_0 = arith.constant 0 : index
    %0 = vector.load %arg2[%c0, %c0_0] : memref<128x16xbf16, #tpu.memory_space<vmem>>, vector<128x16xbf16>
    %c0_1 = arith.constant 0 : index
    %c0_2 = arith.constant 0 : index
    %1 = vector.load %arg3[%c0_1, %c0_2] : memref<16x128xbf16, #tpu.memory_space<vmem>>, vector<16x128xbf16>
    %cst = arith.constant dense<0.000000e+00> : vector<128x128xf32>
    %2 = tpu.matmul %0, %1, %cst {dimension_numbers = #tpu.dot_dimension_numbers<[1], [0], [0], [1], [0, 0, 1, 1], [], []>} : vector<128x16xbf16>, vector<16x128xbf16>, vector<128x128xf32> -> vector<128x128xf32>
    %c0_3 = arith.constant 0 : index
    %c0_4 = arith.constant 0 : index
    %3 = vector.load %arg4[%c0_3, %c0_4] : memref<1x128xf32, #tpu.memory_space<vmem>>, vector<1x128xf32>
    %4 = vector.broadcast %3 : vector<1x128xf32> to vector<128x128xf32>
    %5 = arith.addf %2, %4 : vector<128x128xf32>
    %cst_5 = arith.constant 0.000000e+00 : f32
    %6 = vector.broadcast %cst_5 : f32 to vector<128x128xf32>
    %7 = arith.subf %6, %5 : vector<128x128xf32>
    %8 = math.exp %7 : vector<128x128xf32>
    %cst_6 = arith.constant 1.000000e+00 : f32
    %9 = vector.broadcast %cst_6 : f32 to vector<128x128xf32>
    %10 = arith.addf %9, %8 : vector<128x128xf32>
    %11 = tpu.reciprocal %10 {approx = true} : vector<128x128xf32> -> vector<128x128xf32>
    %12 = arith.mulf %5, %11 : vector<128x128xf32>
    %13 = arith.truncf %12 : vector<128x128xf32> to vector<128x128xbf16>
    %c0_7 = arith.constant 0 : index
    %c0_8 = arith.constant 0 : index
    %14 = vector.load %arg5[%c0_7, %c0_8] : memref<128x128xbf16, #tpu.memory_space<vmem>>, vector<128x128xbf16>
    tpu.vector_store %arg5[%c0_7, %c0_8], %13 {strides = array<i32>} : memref<128x128xbf16, #tpu.memory_space<vmem>>, vector<128x128xbf16>,
    return
  }
  func.func @transform_0(%arg0: i32, %arg1: i32) -> (i32, i32) {
    %c0_i32 = arith.constant 0 : i32
    %c0_i32_0 = arith.constant 0 : i32
    return %arg0, %c0_i32 : i32, i32
  }
  func.func @transform_1(%arg0: i32, %arg1: i32) -> (i32, i32) {
    %c0_i32 = arith.constant 0 : i32
    %c0_i32_0 = arith.constant 0 : i32
    return %c0_i32, %arg1 : i32, i32
  }
  func.func @transform_2(%arg0: i32, %arg1: i32) -> (i32, i32) {
    %c0_i32 = arith.constant 0 : i32
    %c0_i32_0 = arith.constant 0 : i32
    return %c0_i32, %arg1 : i32, i32
  }
  func.func @transform_3(%arg0: i32, %arg1: i32) -> (i32, i32) {
    %c0_i32 = arith.constant 0 : i32
    return %arg0, %arg1 : i32, i32
  }
}

module attributes {stable_mosaic.version = 11 : i64} {
  func.func @_mm_kernel(%arg0: i32, %arg1: i32, %arg2: memref<128x48xbf16, #tpu.memory_space<vmem>>, %arg3: memref<48x128xbf16, #tpu.memory_space<vmem>>, %arg4: memref<1x128xf32, #tpu.memory_space<vmem>>, %arg5: memref<128x128xbf16, #tpu.memory_space<vmem>>) attributes {dimension_semantics = [#tpu.dimension_semantics<parallel>, #tpu.dimension_semantics<parallel>], iteration_bounds = array<i64: 1, 1>, scalar_prefetch = 0 : i64, scratch_operands = 0 : i64, tpu.core_type = #tpu.core_type<tc>, window_params = [{transform_indices = @transform_0, window_bounds = array<i64: 128, 48>}, {transform_indices = @transform_1, window_bounds = array<i64: 48, 128>}, {transform_indices = @transform_2, window_bounds = array<i64: 1, 128>}, {transform_indices = @transform_3, window_bounds = array<i64: 128, 128>}]} {
    %c0 = arith.constant 0 : index
    %c0_0 = arith.constant 0 : index
    %0 = vector.load %arg2[%c0, %c0_0] : memref<128x48xbf16, #tpu.memory_space<vmem>>, vector<128x48xbf16>
    %c0_1 = arith.constant 0 : index
    %c0_2 = arith.constant 0 : index
    %1 = vector.load %arg3[%c0_1, %c0_2] : memref<48x128xbf16, #tpu.memory_space<vmem>>, vector<48x128xbf16>
    %cst = arith.constant dense<0.000000e+00> : vector<128x128xf32>
    %2 = tpu.matmul %0, %1, %cst {dimension_numbers = #tpu.dot_dimension_numbers<[1], [0], [0], [1], [0, 0, 1, 1], [], []>} : vector<128x48xbf16>, vector<48x128xbf16>, vector<128x128xf32> -> vector<128x128xf32>
    %c0_3 = arith.constant 0 : index
    %c0_4 = arith.constant 0 : index
    %3 = vector.load %arg4[%c0_3, %c0_4] : memref<1x128xf32, #tpu.memory_space<vmem>>, vector<1x128xf32>
    %4 = vector.broadcast %3 : vector<1x128xf32> to vector<128x128xf32>
    %5 = arith.addf %2, %4 : vector<128x128xf32>
    %cst_5 = arith.constant 0.000000e+00 : f32
    %6 = vector.broadcast %cst_5 : f32 to vector<128x128xf32>
    %7 = arith.subf %6, %5 : vector<128x128xf32>
    %8 = math.exp %7 : vector<128x128xf32>
    %cst_6 = arith.constant 1.000000e+00 : f32
    %9 = vector.broadcast %cst_6 : f32 to vector<128x128xf32>
    %10 = arith.addf %9, %8 : vector<128x128xf32>
    %11 = tpu.reciprocal %10 {approx = true} : vector<128x128xf32> -> vector<128x128xf32>
    %12 = arith.mulf %5, %11 : vector<128x128xf32>
    %13 = arith.truncf %12 : vector<128x128xf32> to vector<128x128xbf16>
    %c0_7 = arith.constant 0 : index
    %c0_8 = arith.constant 0 : index
    %14 = vector.load %arg5[%c0_7, %c0_8] : memref<128x128xbf16, #tpu.memory_space<vmem>>, vector<128x128xbf16>
    tpu.vector_store %arg5[%c0_7, %c0_8], %13 {strides = array<i32>} : memref<128x128xbf16, #tpu.memory_space<vmem>>, vector<128x128xbf16>,
    return
  }
  func.func @transform_0(%arg0: i32, %arg1: i32) -> (i32, i32) {
    %c0_i32 = arith.constant 0 : i32
    %c0_i32_0 = arith.constant 0 : i32
    return %arg0, %c0_i32 : i32, i32
  }
  func.func @transform_1(%arg0: i32, %arg1: i32) -> (i32, i32) {
    %c0_i32 = arith.constant 0 : i32
    %c0_i32_0 = arith.constant 0 : i32
    return %c0_i32, %arg1 : i32, i32
  }
  func.func @transform_2(%arg0: i32, %arg1: i32) -> (i32, i32) {
    %c0_i32 = arith.constant 0 : i32
    %c0_i32_0 = arith.constant 0 : i32
    return %c0_i32, %arg1 : i32, i32
  }
  func.func @transform_3(%arg0: i32, %arg1: i32) -> (i32, i32) {
    %c0_i32 = arith.constant 0 : i32
    return %arg0, %arg1 : i32, i32
  }
}

module attributes {stable_mosaic.version = 11 : i64} {
  func.func @_mm_kernel(%arg0: i32, %arg1: i32, %arg2: memref<32x288xbf16, #tpu.memory_space<vmem>>, %arg3: memref<288x128xbf16, #tpu.memory_space<vmem>>, %arg4: memref<1x128xf32, #tpu.memory_space<vmem>>, %arg5: memref<32x128xbf16, #tpu.memory_space<vmem>>) attributes {dimension_semantics = [#tpu.dimension_semantics<parallel>, #tpu.dimension_semantics<parallel>], iteration_bounds = array<i64: 1, 1>, scalar_prefetch = 0 : i64, scratch_operands = 0 : i64, tpu.core_type = #tpu.core_type<tc>, window_params = [{transform_indices = @transform_0, window_bounds = array<i64: 32, 288>}, {transform_indices = @transform_1, window_bounds = array<i64: 288, 128>}, {transform_indices = @transform_2, window_bounds = array<i64: 1, 128>}, {transform_indices = @transform_3, window_bounds = array<i64: 32, 128>}]} {
    %c0 = arith.constant 0 : index
    %c0_0 = arith.constant 0 : index
    %0 = vector.load %arg2[%c0, %c0_0] : memref<32x288xbf16, #tpu.memory_space<vmem>>, vector<32x288xbf16>
    %c0_1 = arith.constant 0 : index
    %c0_2 = arith.constant 0 : index
    %1 = vector.load %arg3[%c0_1, %c0_2] : memref<288x128xbf16, #tpu.memory_space<vmem>>, vector<288x128xbf16>
    %cst = arith.constant dense<0.000000e+00> : vector<32x128xf32>
    %2 = tpu.matmul %0, %1, %cst {dimension_numbers = #tpu.dot_dimension_numbers<[1], [0], [0], [1], [0, 0, 1, 1], [], []>} : vector<32x288xbf16>, vector<288x128xbf16>, vector<32x128xf32> -> vector<32x128xf32>
    %c0_3 = arith.constant 0 : index
    %c0_4 = arith.constant 0 : index
    %3 = vector.load %arg4[%c0_3, %c0_4] : memref<1x128xf32, #tpu.memory_space<vmem>>, vector<1x128xf32>
    %4 = vector.broadcast %3 : vector<1x128xf32> to vector<32x128xf32>
    %5 = arith.addf %2, %4 : vector<32x128xf32>
    %cst_5 = arith.constant 0.000000e+00 : f32
    %6 = vector.broadcast %cst_5 : f32 to vector<32x128xf32>
    %7 = arith.subf %6, %5 : vector<32x128xf32>
    %8 = math.exp %7 : vector<32x128xf32>
    %cst_6 = arith.constant 1.000000e+00 : f32
    %9 = vector.broadcast %cst_6 : f32 to vector<32x128xf32>
    %10 = arith.addf %9, %8 : vector<32x128xf32>
    %11 = tpu.reciprocal %10 {approx = true} : vector<32x128xf32> -> vector<32x128xf32>
    %12 = arith.mulf %5, %11 : vector<32x128xf32>
    %13 = arith.truncf %12 : vector<32x128xf32> to vector<32x128xbf16>
    %c0_7 = arith.constant 0 : index
    %c0_8 = arith.constant 0 : index
    %14 = vector.load %arg5[%c0_7, %c0_8] : memref<32x128xbf16, #tpu.memory_space<vmem>>, vector<32x128xbf16>
    tpu.vector_store %arg5[%c0_7, %c0_8], %13 {strides = array<i32>} : memref<32x128xbf16, #tpu.memory_space<vmem>>, vector<32x128xbf16>,
    return
  }
  func.func @transform_0(%arg0: i32, %arg1: i32) -> (i32, i32) {
    %c0_i32 = arith.constant 0 : i32
    %c0_i32_0 = arith.constant 0 : i32
    return %arg0, %c0_i32 : i32, i32
  }
  func.func @transform_1(%arg0: i32, %arg1: i32) -> (i32, i32) {
    %c0_i32 = arith.constant 0 : i32
    %c0_i32_0 = arith.constant 0 : i32
    return %c0_i32, %arg1 : i32, i32
  }
  func.func @transform_2(%arg0: i32, %arg1: i32) -> (i32, i32) {
    %c0_i32 = arith.constant 0 : i32
    %c0_i32_0 = arith.constant 0 : i32
    return %c0_i32, %arg1 : i32, i32
  }
  func.func @transform_3(%arg0: i32, %arg1: i32) -> (i32, i32) {
    %c0_i32 = arith.constant 0 : i32
    return %arg0, %arg1 : i32, i32
  }
}

module attributes {stable_mosaic.version = 11 : i64} {
  func.func @_mm_kernel(%arg0: i32, %arg1: i32, %arg2: memref<32x64xbf16, #tpu.memory_space<vmem>>, %arg3: memref<64x128xbf16, #tpu.memory_space<vmem>>, %arg4: memref<1x128xf32, #tpu.memory_space<vmem>>, %arg5: memref<32x128xbf16, #tpu.memory_space<vmem>>) attributes {dimension_semantics = [#tpu.dimension_semantics<parallel>, #tpu.dimension_semantics<parallel>], iteration_bounds = array<i64: 1, 1>, scalar_prefetch = 0 : i64, scratch_operands = 0 : i64, tpu.core_type = #tpu.core_type<tc>, window_params = [{transform_indices = @transform_0, window_bounds = array<i64: 32, 64>}, {transform_indices = @transform_1, window_bounds = array<i64: 64, 128>}, {transform_indices = @transform_2, window_bounds = array<i64: 1, 128>}, {transform_indices = @transform_3, window_bounds = array<i64: 32, 128>}]} {
    %c0 = arith.constant 0 : index
    %c0_0 = arith.constant 0 : index
    %0 = vector.load %arg2[%c0, %c0_0] : memref<32x64xbf16, #tpu.memory_space<vmem>>, vector<32x64xbf16>
    %c0_1 = arith.constant 0 : index
    %c0_2 = arith.constant 0 : index
    %1 = vector.load %arg3[%c0_1, %c0_2] : memref<64x128xbf16, #tpu.memory_space<vmem>>, vector<64x128xbf16>
    %cst = arith.constant dense<0.000000e+00> : vector<32x128xf32>
    %2 = tpu.matmul %0, %1, %cst {dimension_numbers = #tpu.dot_dimension_numbers<[1], [0], [0], [1], [0, 0, 1, 1], [], []>} : vector<32x64xbf16>, vector<64x128xbf16>, vector<32x128xf32> -> vector<32x128xf32>
    %c0_3 = arith.constant 0 : index
    %c0_4 = arith.constant 0 : index
    %3 = vector.load %arg4[%c0_3, %c0_4] : memref<1x128xf32, #tpu.memory_space<vmem>>, vector<1x128xf32>
    %4 = vector.broadcast %3 : vector<1x128xf32> to vector<32x128xf32>
    %5 = arith.addf %2, %4 : vector<32x128xf32>
    %cst_5 = arith.constant 0.000000e+00 : f32
    %6 = vector.broadcast %cst_5 : f32 to vector<32x128xf32>
    %7 = arith.subf %6, %5 : vector<32x128xf32>
    %8 = math.exp %7 : vector<32x128xf32>
    %cst_6 = arith.constant 1.000000e+00 : f32
    %9 = vector.broadcast %cst_6 : f32 to vector<32x128xf32>
    %10 = arith.addf %9, %8 : vector<32x128xf32>
    %11 = tpu.reciprocal %10 {approx = true} : vector<32x128xf32> -> vector<32x128xf32>
    %12 = arith.mulf %5, %11 : vector<32x128xf32>
    %13 = arith.truncf %12 : vector<32x128xf32> to vector<32x128xbf16>
    %c0_7 = arith.constant 0 : index
    %c0_8 = arith.constant 0 : index
    %14 = vector.load %arg5[%c0_7, %c0_8] : memref<32x128xbf16, #tpu.memory_space<vmem>>, vector<32x128xbf16>
    tpu.vector_store %arg5[%c0_7, %c0_8], %13 {strides = array<i32>} : memref<32x128xbf16, #tpu.memory_space<vmem>>, vector<32x128xbf16>,
    return
  }
  func.func @transform_0(%arg0: i32, %arg1: i32) -> (i32, i32) {
    %c0_i32 = arith.constant 0 : i32
    %c0_i32_0 = arith.constant 0 : i32
    return %arg0, %c0_i32 : i32, i32
  }
  func.func @transform_1(%arg0: i32, %arg1: i32) -> (i32, i32) {
    %c0_i32 = arith.constant 0 : i32
    %c0_i32_0 = arith.constant 0 : i32
    return %c0_i32, %arg1 : i32, i32
  }
  func.func @transform_2(%arg0: i32, %arg1: i32) -> (i32, i32) {
    %c0_i32 = arith.constant 0 : i32
    %c0_i32_0 = arith.constant 0 : i32
    return %c0_i32, %arg1 : i32, i32
  }
  func.func @transform_3(%arg0: i32, %arg1: i32) -> (i32, i32) {
    %c0_i32 = arith.constant 0 : i32
    return %arg0, %arg1 : i32, i32
  }
}

module attributes {stable_mosaic.version = 11 : i64} {
  func.func @_mm_kernel(%arg0: i32, %arg1: i32, %arg2: memref<32x32xbf16, #tpu.memory_space<vmem>>, %arg3: memref<32x128xbf16, #tpu.memory_space<vmem>>, %arg4: memref<1x128xf32, #tpu.memory_space<vmem>>, %arg5: memref<32x128xbf16, #tpu.memory_space<vmem>>) attributes {dimension_semantics = [#tpu.dimension_semantics<parallel>, #tpu.dimension_semantics<parallel>], iteration_bounds = array<i64: 1, 1>, scalar_prefetch = 0 : i64, scratch_operands = 0 : i64, tpu.core_type = #tpu.core_type<tc>, window_params = [{transform_indices = @transform_0, window_bounds = array<i64: 32, 32>}, {transform_indices = @transform_1, window_bounds = array<i64: 32, 128>}, {transform_indices = @transform_2, window_bounds = array<i64: 1, 128>}, {transform_indices = @transform_3, window_bounds = array<i64: 32, 128>}]} {
    %c0 = arith.constant 0 : index
    %c0_0 = arith.constant 0 : index
    %0 = vector.load %arg2[%c0, %c0_0] : memref<32x32xbf16, #tpu.memory_space<vmem>>, vector<32x32xbf16>
    %c0_1 = arith.constant 0 : index
    %c0_2 = arith.constant 0 : index
    %1 = vector.load %arg3[%c0_1, %c0_2] : memref<32x128xbf16, #tpu.memory_space<vmem>>, vector<32x128xbf16>
    %cst = arith.constant dense<0.000000e+00> : vector<32x128xf32>
    %2 = tpu.matmul %0, %1, %cst {dimension_numbers = #tpu.dot_dimension_numbers<[1], [0], [0], [1], [0, 0, 1, 1], [], []>} : vector<32x32xbf16>, vector<32x128xbf16>, vector<32x128xf32> -> vector<32x128xf32>
    %c0_3 = arith.constant 0 : index
    %c0_4 = arith.constant 0 : index
    %3 = vector.load %arg4[%c0_3, %c0_4] : memref<1x128xf32, #tpu.memory_space<vmem>>, vector<1x128xf32>
    %4 = vector.broadcast %3 : vector<1x128xf32> to vector<32x128xf32>
    %5 = arith.addf %2, %4 : vector<32x128xf32>
    %cst_5 = arith.constant 0.000000e+00 : f32
    %6 = vector.broadcast %cst_5 : f32 to vector<32x128xf32>
    %7 = arith.subf %6, %5 : vector<32x128xf32>
    %8 = math.exp %7 : vector<32x128xf32>
    %cst_6 = arith.constant 1.000000e+00 : f32
    %9 = vector.broadcast %cst_6 : f32 to vector<32x128xf32>
    %10 = arith.addf %9, %8 : vector<32x128xf32>
    %11 = tpu.reciprocal %10 {approx = true} : vector<32x128xf32> -> vector<32x128xf32>
    %12 = arith.mulf %5, %11 : vector<32x128xf32>
    %13 = arith.truncf %12 : vector<32x128xf32> to vector<32x128xbf16>
    %c0_7 = arith.constant 0 : index
    %c0_8 = arith.constant 0 : index
    %14 = vector.load %arg5[%c0_7, %c0_8] : memref<32x128xbf16, #tpu.memory_space<vmem>>, vector<32x128xbf16>
    tpu.vector_store %arg5[%c0_7, %c0_8], %13 {strides = array<i32>} : memref<32x128xbf16, #tpu.memory_space<vmem>>, vector<32x128xbf16>,
    return
  }
  func.func @transform_0(%arg0: i32, %arg1: i32) -> (i32, i32) {
    %c0_i32 = arith.constant 0 : i32
    %c0_i32_0 = arith.constant 0 : i32
    return %arg0, %c0_i32 : i32, i32
  }
  func.func @transform_1(%arg0: i32, %arg1: i32) -> (i32, i32) {
    %c0_i32 = arith.constant 0 : i32
    %c0_i32_0 = arith.constant 0 : i32
    return %c0_i32, %arg1 : i32, i32
  }
  func.func @transform_2(%arg0: i32, %arg1: i32) -> (i32, i32) {
    %c0_i32 = arith.constant 0 : i32
    %c0_i32_0 = arith.constant 0 : i32
    return %c0_i32, %arg1 : i32, i32
  }
  func.func @transform_3(%arg0: i32, %arg1: i32) -> (i32, i32) {
    %c0_i32 = arith.constant 0 : i32
    return %arg0, %arg1 : i32, i32
  }
}

module attributes {stable_mosaic.version = 11 : i64} {
  func.func @_mm_kernel(%arg0: i32, %arg1: i32, %arg2: memref<32x96xbf16, #tpu.memory_space<vmem>>, %arg3: memref<96x128xbf16, #tpu.memory_space<vmem>>, %arg4: memref<1x128xf32, #tpu.memory_space<vmem>>, %arg5: memref<32x128xbf16, #tpu.memory_space<vmem>>) attributes {dimension_semantics = [#tpu.dimension_semantics<parallel>, #tpu.dimension_semantics<parallel>], iteration_bounds = array<i64: 1, 1>, scalar_prefetch = 0 : i64, scratch_operands = 0 : i64, tpu.core_type = #tpu.core_type<tc>, window_params = [{transform_indices = @transform_0, window_bounds = array<i64: 32, 96>}, {transform_indices = @transform_1, window_bounds = array<i64: 96, 128>}, {transform_indices = @transform_2, window_bounds = array<i64: 1, 128>}, {transform_indices = @transform_3, window_bounds = array<i64: 32, 128>}]} {
    %c0 = arith.constant 0 : index
    %c0_0 = arith.constant 0 : index
    %0 = vector.load %arg2[%c0, %c0_0] : memref<32x96xbf16, #tpu.memory_space<vmem>>, vector<32x96xbf16>
    %c0_1 = arith.constant 0 : index
    %c0_2 = arith.constant 0 : index
    %1 = vector.load %arg3[%c0_1, %c0_2] : memref<96x128xbf16, #tpu.memory_space<vmem>>, vector<96x128xbf16>
    %cst = arith.constant dense<0.000000e+00> : vector<32x128xf32>
    %2 = tpu.matmul %0, %1, %cst {dimension_numbers = #tpu.dot_dimension_numbers<[1], [0], [0], [1], [0, 0, 1, 1], [], []>} : vector<32x96xbf16>, vector<96x128xbf16>, vector<32x128xf32> -> vector<32x128xf32>
    %c0_3 = arith.constant 0 : index
    %c0_4 = arith.constant 0 : index
    %3 = vector.load %arg4[%c0_3, %c0_4] : memref<1x128xf32, #tpu.memory_space<vmem>>, vector<1x128xf32>
    %4 = vector.broadcast %3 : vector<1x128xf32> to vector<32x128xf32>
    %5 = arith.addf %2, %4 : vector<32x128xf32>
    %cst_5 = arith.constant 0.000000e+00 : f32
    %6 = vector.broadcast %cst_5 : f32 to vector<32x128xf32>
    %7 = arith.subf %6, %5 : vector<32x128xf32>
    %8 = math.exp %7 : vector<32x128xf32>
    %cst_6 = arith.constant 1.000000e+00 : f32
    %9 = vector.broadcast %cst_6 : f32 to vector<32x128xf32>
    %10 = arith.addf %9, %8 : vector<32x128xf32>
    %11 = tpu.reciprocal %10 {approx = true} : vector<32x128xf32> -> vector<32x128xf32>
    %12 = arith.mulf %5, %11 : vector<32x128xf32>
    %13 = arith.truncf %12 : vector<32x128xf32> to vector<32x128xbf16>
    %c0_7 = arith.constant 0 : index
    %c0_8 = arith.constant 0 : index
    %14 = vector.load %arg5[%c0_7, %c0_8] : memref<32x128xbf16, #tpu.memory_space<vmem>>, vector<32x128xbf16>
    tpu.vector_store %arg5[%c0_7, %c0_8], %13 {strides = array<i32>} : memref<32x128xbf16, #tpu.memory_space<vmem>>, vector<32x128xbf16>,
    return
  }
  func.func @transform_0(%arg0: i32, %arg1: i32) -> (i32, i32) {
    %c0_i32 = arith.constant 0 : i32
    %c0_i32_0 = arith.constant 0 : i32
    return %arg0, %c0_i32 : i32, i32
  }
  func.func @transform_1(%arg0: i32, %arg1: i32) -> (i32, i32) {
    %c0_i32 = arith.constant 0 : i32
    %c0_i32_0 = arith.constant 0 : i32
    return %c0_i32, %arg1 : i32, i32
  }
  func.func @transform_2(%arg0: i32, %arg1: i32) -> (i32, i32) {
    %c0_i32 = arith.constant 0 : i32
    %c0_i32_0 = arith.constant 0 : i32
    return %c0_i32, %arg1 : i32, i32
  }
  func.func @transform_3(%arg0: i32, %arg1: i32) -> (i32, i32) {
    %c0_i32 = arith.constant 0 : i32
    return %arg0, %arg1 : i32, i32
  }
}

module attributes {stable_mosaic.version = 11 : i64} {
  func.func @_mm_kernel(%arg0: i32, %arg1: i32, %arg2: memref<8x128xbf16, #tpu.memory_space<vmem>>, %arg3: memref<128x128xbf16, #tpu.memory_space<vmem>>, %arg4: memref<1x128xf32, #tpu.memory_space<vmem>>, %arg5: memref<8x128xbf16, #tpu.memory_space<vmem>>) attributes {dimension_semantics = [#tpu.dimension_semantics<parallel>, #tpu.dimension_semantics<parallel>], iteration_bounds = array<i64: 1, 1>, scalar_prefetch = 0 : i64, scratch_operands = 0 : i64, tpu.core_type = #tpu.core_type<tc>, window_params = [{transform_indices = @transform_0, window_bounds = array<i64: 8, 128>}, {transform_indices = @transform_1, window_bounds = array<i64: 128, 128>}, {transform_indices = @transform_2, window_bounds = array<i64: 1, 128>}, {transform_indices = @transform_3, window_bounds = array<i64: 8, 128>}]} {
    %c0 = arith.constant 0 : index
    %c0_0 = arith.constant 0 : index
    %0 = vector.load %arg2[%c0, %c0_0] : memref<8x128xbf16, #tpu.memory_space<vmem>>, vector<8x128xbf16>
    %c0_1 = arith.constant 0 : index
    %c0_2 = arith.constant 0 : index
    %1 = vector.load %arg3[%c0_1, %c0_2] : memref<128x128xbf16, #tpu.memory_space<vmem>>, vector<128x128xbf16>
    %cst = arith.constant dense<0.000000e+00> : vector<8x128xf32>
    %2 = tpu.matmul %0, %1, %cst {dimension_numbers = #tpu.dot_dimension_numbers<[1], [0], [0], [1], [0, 0, 1, 1], [], []>} : vector<8x128xbf16>, vector<128x128xbf16>, vector<8x128xf32> -> vector<8x128xf32>
    %c0_3 = arith.constant 0 : index
    %c0_4 = arith.constant 0 : index
    %3 = vector.load %arg4[%c0_3, %c0_4] : memref<1x128xf32, #tpu.memory_space<vmem>>, vector<1x128xf32>
    %4 = vector.broadcast %3 : vector<1x128xf32> to vector<8x128xf32>
    %5 = arith.addf %2, %4 : vector<8x128xf32>
    %cst_5 = arith.constant 0.000000e+00 : f32
    %6 = vector.broadcast %cst_5 : f32 to vector<8x128xf32>
    %7 = arith.subf %6, %5 : vector<8x128xf32>
    %8 = math.exp %7 : vector<8x128xf32>
    %cst_6 = arith.constant 1.000000e+00 : f32
    %9 = vector.broadcast %cst_6 : f32 to vector<8x128xf32>
    %10 = arith.addf %9, %8 : vector<8x128xf32>
    %11 = tpu.reciprocal %10 {approx = true} : vector<8x128xf32> -> vector<8x128xf32>
    %12 = arith.mulf %5, %11 : vector<8x128xf32>
    %13 = arith.truncf %12 : vector<8x128xf32> to vector<8x128xbf16>
    %c0_7 = arith.constant 0 : index
    %c0_8 = arith.constant 0 : index
    %14 = vector.load %arg5[%c0_7, %c0_8] : memref<8x128xbf16, #tpu.memory_space<vmem>>, vector<8x128xbf16>
    tpu.vector_store %arg5[%c0_7, %c0_8], %13 {strides = array<i32>} : memref<8x128xbf16, #tpu.memory_space<vmem>>, vector<8x128xbf16>,
    return
  }
  func.func @transform_0(%arg0: i32, %arg1: i32) -> (i32, i32) {
    %c0_i32 = arith.constant 0 : i32
    %c0_i32_0 = arith.constant 0 : i32
    return %arg0, %c0_i32 : i32, i32
  }
  func.func @transform_1(%arg0: i32, %arg1: i32) -> (i32, i32) {
    %c0_i32 = arith.constant 0 : i32
    %c0_i32_0 = arith.constant 0 : i32
    return %c0_i32, %arg1 : i32, i32
  }
  func.func @transform_2(%arg0: i32, %arg1: i32) -> (i32, i32) {
    %c0_i32 = arith.constant 0 : i32
    %c0_i32_0 = arith.constant 0 : i32
    return %c0_i32, %arg1 : i32, i32
  }
  func.func @transform_3(%arg0: i32, %arg1: i32) -> (i32, i32) {
    %c0_i32 = arith.constant 0 : i32
    return %arg0, %arg1 : i32, i32
  }
}

module attributes {stable_mosaic.version = 11 : i64} {
  func.func @_mm_kernel(%arg0: i32, %arg1: i32, %arg2: memref<8x576xbf16, #tpu.memory_space<vmem>>, %arg3: memref<576x128xbf16, #tpu.memory_space<vmem>>, %arg4: memref<1x128xf32, #tpu.memory_space<vmem>>, %arg5: memref<8x128xbf16, #tpu.memory_space<vmem>>) attributes {dimension_semantics = [#tpu.dimension_semantics<parallel>, #tpu.dimension_semantics<parallel>], iteration_bounds = array<i64: 1, 1>, scalar_prefetch = 0 : i64, scratch_operands = 0 : i64, tpu.core_type = #tpu.core_type<tc>, window_params = [{transform_indices = @transform_0, window_bounds = array<i64: 8, 576>}, {transform_indices = @transform_1, window_bounds = array<i64: 576, 128>}, {transform_indices = @transform_2, window_bounds = array<i64: 1, 128>}, {transform_indices = @transform_3, window_bounds = array<i64: 8, 128>}]} {
    %c0 = arith.constant 0 : index
    %c0_0 = arith.constant 0 : index
    %0 = vector.load %arg2[%c0, %c0_0] : memref<8x576xbf16, #tpu.memory_space<vmem>>, vector<8x576xbf16>
    %c0_1 = arith.constant 0 : index
    %c0_2 = arith.constant 0 : index
    %1 = vector.load %arg3[%c0_1, %c0_2] : memref<576x128xbf16, #tpu.memory_space<vmem>>, vector<576x128xbf16>
    %cst = arith.constant dense<0.000000e+00> : vector<8x128xf32>
    %2 = tpu.matmul %0, %1, %cst {dimension_numbers = #tpu.dot_dimension_numbers<[1], [0], [0], [1], [0, 0, 1, 1], [], []>} : vector<8x576xbf16>, vector<576x128xbf16>, vector<8x128xf32> -> vector<8x128xf32>
    %c0_3 = arith.constant 0 : index
    %c0_4 = arith.constant 0 : index
    %3 = vector.load %arg4[%c0_3, %c0_4] : memref<1x128xf32, #tpu.memory_space<vmem>>, vector<1x128xf32>
    %4 = vector.broadcast %3 : vector<1x128xf32> to vector<8x128xf32>
    %5 = arith.addf %2, %4 : vector<8x128xf32>
    %cst_5 = arith.constant 0.000000e+00 : f32
    %6 = vector.broadcast %cst_5 : f32 to vector<8x128xf32>
    %7 = arith.subf %6, %5 : vector<8x128xf32>
    %8 = math.exp %7 : vector<8x128xf32>
    %cst_6 = arith.constant 1.000000e+00 : f32
    %9 = vector.broadcast %cst_6 : f32 to vector<8x128xf32>
    %10 = arith.addf %9, %8 : vector<8x128xf32>
    %11 = tpu.reciprocal %10 {approx = true} : vector<8x128xf32> -> vector<8x128xf32>
    %12 = arith.mulf %5, %11 : vector<8x128xf32>
    %13 = arith.truncf %12 : vector<8x128xf32> to vector<8x128xbf16>
    %c0_7 = arith.constant 0 : index
    %c0_8 = arith.constant 0 : index
    %14 = vector.load %arg5[%c0_7, %c0_8] : memref<8x128xbf16, #tpu.memory_space<vmem>>, vector<8x128xbf16>
    tpu.vector_store %arg5[%c0_7, %c0_8], %13 {strides = array<i32>} : memref<8x128xbf16, #tpu.memory_space<vmem>>, vector<8x128xbf16>,
    return
  }
  func.func @transform_0(%arg0: i32, %arg1: i32) -> (i32, i32) {
    %c0_i32 = arith.constant 0 : i32
    %c0_i32_0 = arith.constant 0 : i32
    return %arg0, %c0_i32 : i32, i32
  }
  func.func @transform_1(%arg0: i32, %arg1: i32) -> (i32, i32) {
    %c0_i32 = arith.constant 0 : i32
    %c0_i32_0 = arith.constant 0 : i32
    return %c0_i32, %arg1 : i32, i32
  }
  func.func @transform_2(%arg0: i32, %arg1: i32) -> (i32, i32) {
    %c0_i32 = arith.constant 0 : i32
    %c0_i32_0 = arith.constant 0 : i32
    return %c0_i32, %arg1 : i32, i32
  }
  func.func @transform_3(%arg0: i32, %arg1: i32) -> (i32, i32) {
    %c0_i32 = arith.constant 0 : i32
    return %arg0, %arg1 : i32, i32
  }
}

module attributes {stable_mosaic.version = 11 : i64} {
  func.func @_mm_kernel(%arg0: i32, %arg1: i32, %arg2: memref<8x64xbf16, #tpu.memory_space<vmem>>, %arg3: memref<64x128xbf16, #tpu.memory_space<vmem>>, %arg4: memref<1x128xf32, #tpu.memory_space<vmem>>, %arg5: memref<8x128xbf16, #tpu.memory_space<vmem>>) attributes {dimension_semantics = [#tpu.dimension_semantics<parallel>, #tpu.dimension_semantics<parallel>], iteration_bounds = array<i64: 1, 1>, scalar_prefetch = 0 : i64, scratch_operands = 0 : i64, tpu.core_type = #tpu.core_type<tc>, window_params = [{transform_indices = @transform_0, window_bounds = array<i64: 8, 64>}, {transform_indices = @transform_1, window_bounds = array<i64: 64, 128>}, {transform_indices = @transform_2, window_bounds = array<i64: 1, 128>}, {transform_indices = @transform_3, window_bounds = array<i64: 8, 128>}]} {
    %c0 = arith.constant 0 : index
    %c0_0 = arith.constant 0 : index
    %0 = vector.load %arg2[%c0, %c0_0] : memref<8x64xbf16, #tpu.memory_space<vmem>>, vector<8x64xbf16>
    %c0_1 = arith.constant 0 : index
    %c0_2 = arith.constant 0 : index
    %1 = vector.load %arg3[%c0_1, %c0_2] : memref<64x128xbf16, #tpu.memory_space<vmem>>, vector<64x128xbf16>
    %cst = arith.constant dense<0.000000e+00> : vector<8x128xf32>
    %2 = tpu.matmul %0, %1, %cst {dimension_numbers = #tpu.dot_dimension_numbers<[1], [0], [0], [1], [0, 0, 1, 1], [], []>} : vector<8x64xbf16>, vector<64x128xbf16>, vector<8x128xf32> -> vector<8x128xf32>
    %c0_3 = arith.constant 0 : index
    %c0_4 = arith.constant 0 : index
    %3 = vector.load %arg4[%c0_3, %c0_4] : memref<1x128xf32, #tpu.memory_space<vmem>>, vector<1x128xf32>
    %4 = vector.broadcast %3 : vector<1x128xf32> to vector<8x128xf32>
    %5 = arith.addf %2, %4 : vector<8x128xf32>
    %cst_5 = arith.constant 0.000000e+00 : f32
    %6 = vector.broadcast %cst_5 : f32 to vector<8x128xf32>
    %7 = arith.subf %6, %5 : vector<8x128xf32>
    %8 = math.exp %7 : vector<8x128xf32>
    %cst_6 = arith.constant 1.000000e+00 : f32
    %9 = vector.broadcast %cst_6 : f32 to vector<8x128xf32>
    %10 = arith.addf %9, %8 : vector<8x128xf32>
    %11 = tpu.reciprocal %10 {approx = true} : vector<8x128xf32> -> vector<8x128xf32>
    %12 = arith.mulf %5, %11 : vector<8x128xf32>
    %13 = arith.truncf %12 : vector<8x128xf32> to vector<8x128xbf16>
    %c0_7 = arith.constant 0 : index
    %c0_8 = arith.constant 0 : index
    %14 = vector.load %arg5[%c0_7, %c0_8] : memref<8x128xbf16, #tpu.memory_space<vmem>>, vector<8x128xbf16>
    tpu.vector_store %arg5[%c0_7, %c0_8], %13 {strides = array<i32>} : memref<8x128xbf16, #tpu.memory_space<vmem>>, vector<8x128xbf16>,
    return
  }
  func.func @transform_0(%arg0: i32, %arg1: i32) -> (i32, i32) {
    %c0_i32 = arith.constant 0 : i32
    %c0_i32_0 = arith.constant 0 : i32
    return %arg0, %c0_i32 : i32, i32
  }
  func.func @transform_1(%arg0: i32, %arg1: i32) -> (i32, i32) {
    %c0_i32 = arith.constant 0 : i32
    %c0_i32_0 = arith.constant 0 : i32
    return %c0_i32, %arg1 : i32, i32
  }
  func.func @transform_2(%arg0: i32, %arg1: i32) -> (i32, i32) {
    %c0_i32 = arith.constant 0 : i32
    %c0_i32_0 = arith.constant 0 : i32
    return %c0_i32, %arg1 : i32, i32
  }
  func.func @transform_3(%arg0: i32, %arg1: i32) -> (i32, i32) {
    %c0_i32 = arith.constant 0 : i32
    return %arg0, %arg1 : i32, i32
  }
}

module attributes {stable_mosaic.version = 11 : i64} {
  func.func @_mm_kernel(%arg0: i32, %arg1: i32, %arg2: memref<8x256xbf16, #tpu.memory_space<vmem>>, %arg3: memref<256x128xbf16, #tpu.memory_space<vmem>>, %arg4: memref<1x128xf32, #tpu.memory_space<vmem>>, %arg5: memref<8x128xbf16, #tpu.memory_space<vmem>>) attributes {dimension_semantics = [#tpu.dimension_semantics<parallel>, #tpu.dimension_semantics<parallel>], iteration_bounds = array<i64: 1, 1>, scalar_prefetch = 0 : i64, scratch_operands = 0 : i64, tpu.core_type = #tpu.core_type<tc>, window_params = [{transform_indices = @transform_0, window_bounds = array<i64: 8, 256>}, {transform_indices = @transform_1, window_bounds = array<i64: 256, 128>}, {transform_indices = @transform_2, window_bounds = array<i64: 1, 128>}, {transform_indices = @transform_3, window_bounds = array<i64: 8, 128>}]} {
    %c0 = arith.constant 0 : index
    %c0_0 = arith.constant 0 : index
    %0 = vector.load %arg2[%c0, %c0_0] : memref<8x256xbf16, #tpu.memory_space<vmem>>, vector<8x256xbf16>
    %c0_1 = arith.constant 0 : index
    %c0_2 = arith.constant 0 : index
    %1 = vector.load %arg3[%c0_1, %c0_2] : memref<256x128xbf16, #tpu.memory_space<vmem>>, vector<256x128xbf16>
    %cst = arith.constant dense<0.000000e+00> : vector<8x128xf32>
    %2 = tpu.matmul %0, %1, %cst {dimension_numbers = #tpu.dot_dimension_numbers<[1], [0], [0], [1], [0, 0, 1, 1], [], []>} : vector<8x256xbf16>, vector<256x128xbf16>, vector<8x128xf32> -> vector<8x128xf32>
    %c0_3 = arith.constant 0 : index
    %c0_4 = arith.constant 0 : index
    %3 = vector.load %arg4[%c0_3, %c0_4] : memref<1x128xf32, #tpu.memory_space<vmem>>, vector<1x128xf32>
    %4 = vector.broadcast %3 : vector<1x128xf32> to vector<8x128xf32>
    %5 = arith.addf %2, %4 : vector<8x128xf32>
    %cst_5 = arith.constant 0.000000e+00 : f32
    %6 = vector.broadcast %cst_5 : f32 to vector<8x128xf32>
    %7 = arith.subf %6, %5 : vector<8x128xf32>
    %8 = math.exp %7 : vector<8x128xf32>
    %cst_6 = arith.constant 1.000000e+00 : f32
    %9 = vector.broadcast %cst_6 : f32 to vector<8x128xf32>
    %10 = arith.addf %9, %8 : vector<8x128xf32>
    %11 = tpu.reciprocal %10 {approx = true} : vector<8x128xf32> -> vector<8x128xf32>
    %12 = arith.mulf %5, %11 : vector<8x128xf32>
    %13 = arith.truncf %12 : vector<8x128xf32> to vector<8x128xbf16>
    %c0_7 = arith.constant 0 : index
    %c0_8 = arith.constant 0 : index
    %14 = vector.load %arg5[%c0_7, %c0_8] : memref<8x128xbf16, #tpu.memory_space<vmem>>, vector<8x128xbf16>
    tpu.vector_store %arg5[%c0_7, %c0_8], %13 {strides = array<i32>} : memref<8x128xbf16, #tpu.memory_space<vmem>>, vector<8x128xbf16>,
    return
  }
  func.func @transform_0(%arg0: i32, %arg1: i32) -> (i32, i32) {
    %c0_i32 = arith.constant 0 : i32
    %c0_i32_0 = arith.constant 0 : i32
    return %arg0, %c0_i32 : i32, i32
  }
  func.func @transform_1(%arg0: i32, %arg1: i32) -> (i32, i32) {
    %c0_i32 = arith.constant 0 : i32
    %c0_i32_0 = arith.constant 0 : i32
    return %c0_i32, %arg1 : i32, i32
  }
  func.func @transform_2(%arg0: i32, %arg1: i32) -> (i32, i32) {
    %c0_i32 = arith.constant 0 : i32
    %c0_i32_0 = arith.constant 0 : i32
    return %c0_i32, %arg1 : i32, i32
  }
  func.func @transform_3(%arg0: i32, %arg1: i32) -> (i32, i32) {
    %c0_i32 = arith.constant 0 : i32
    return %arg0, %arg1 : i32, i32
  }
}

module attributes {stable_mosaic.version = 11 : i64} {
  func.func @_mm_kernel(%arg0: i32, %arg1: i32, %arg2: memref<8x1152xbf16, #tpu.memory_space<vmem>>, %arg3: memref<1152x256xbf16, #tpu.memory_space<vmem>>, %arg4: memref<1x256xf32, #tpu.memory_space<vmem>>, %arg5: memref<8x256xbf16, #tpu.memory_space<vmem>>) attributes {dimension_semantics = [#tpu.dimension_semantics<parallel>, #tpu.dimension_semantics<parallel>], iteration_bounds = array<i64: 1, 1>, scalar_prefetch = 0 : i64, scratch_operands = 0 : i64, tpu.core_type = #tpu.core_type<tc>, window_params = [{transform_indices = @transform_0, window_bounds = array<i64: 8, 1152>}, {transform_indices = @transform_1, window_bounds = array<i64: 1152, 256>}, {transform_indices = @transform_2, window_bounds = array<i64: 1, 256>}, {transform_indices = @transform_3, window_bounds = array<i64: 8, 256>}]} {
    %c0 = arith.constant 0 : index
    %c0_0 = arith.constant 0 : index
    %0 = vector.load %arg2[%c0, %c0_0] : memref<8x1152xbf16, #tpu.memory_space<vmem>>, vector<8x1152xbf16>
    %c0_1 = arith.constant 0 : index
    %c0_2 = arith.constant 0 : index
    %1 = vector.load %arg3[%c0_1, %c0_2] : memref<1152x256xbf16, #tpu.memory_space<vmem>>, vector<1152x256xbf16>
    %cst = arith.constant dense<0.000000e+00> : vector<8x256xf32>
    %2 = tpu.matmul %0, %1, %cst {dimension_numbers = #tpu.dot_dimension_numbers<[1], [0], [0], [1], [0, 0, 1, 1], [], []>} : vector<8x1152xbf16>, vector<1152x256xbf16>, vector<8x256xf32> -> vector<8x256xf32>
    %c0_3 = arith.constant 0 : index
    %c0_4 = arith.constant 0 : index
    %3 = vector.load %arg4[%c0_3, %c0_4] : memref<1x256xf32, #tpu.memory_space<vmem>>, vector<1x256xf32>
    %4 = vector.broadcast %3 : vector<1x256xf32> to vector<8x256xf32>
    %5 = arith.addf %2, %4 : vector<8x256xf32>
    %cst_5 = arith.constant 0.000000e+00 : f32
    %6 = vector.broadcast %cst_5 : f32 to vector<8x256xf32>
    %7 = arith.subf %6, %5 : vector<8x256xf32>
    %8 = math.exp %7 : vector<8x256xf32>
    %cst_6 = arith.constant 1.000000e+00 : f32
    %9 = vector.broadcast %cst_6 : f32 to vector<8x256xf32>
    %10 = arith.addf %9, %8 : vector<8x256xf32>
    %11 = tpu.reciprocal %10 {approx = true} : vector<8x256xf32> -> vector<8x256xf32>
    %12 = arith.mulf %5, %11 : vector<8x256xf32>
    %13 = arith.truncf %12 : vector<8x256xf32> to vector<8x256xbf16>
    %c0_7 = arith.constant 0 : index
    %c0_8 = arith.constant 0 : index
    %14 = vector.load %arg5[%c0_7, %c0_8] : memref<8x256xbf16, #tpu.memory_space<vmem>>, vector<8x256xbf16>
    tpu.vector_store %arg5[%c0_7, %c0_8], %13 {strides = array<i32>} : memref<8x256xbf16, #tpu.memory_space<vmem>>, vector<8x256xbf16>,
    return
  }
  func.func @transform_0(%arg0: i32, %arg1: i32) -> (i32, i32) {
    %c0_i32 = arith.constant 0 : i32
    %c0_i32_0 = arith.constant 0 : i32
    return %arg0, %c0_i32 : i32, i32
  }
  func.func @transform_1(%arg0: i32, %arg1: i32) -> (i32, i32) {
    %c0_i32 = arith.constant 0 : i32
    %c0_i32_0 = arith.constant 0 : i32
    return %c0_i32, %arg1 : i32, i32
  }
  func.func @transform_2(%arg0: i32, %arg1: i32) -> (i32, i32) {
    %c0_i32 = arith.constant 0 : i32
    %c0_i32_0 = arith.constant 0 : i32
    return %c0_i32, %arg1 : i32, i32
  }
  func.func @transform_3(%arg0: i32, %arg1: i32) -> (i32, i32) {
    %c0_i32 = arith.constant 0 : i32
    return %arg0, %arg1 : i32, i32
  }
}

module attributes {stable_mosaic.version = 11 : i64} {
  func.func @_mm_kernel(%arg0: i32, %arg1: i32, %arg2: memref<8x512xbf16, #tpu.memory_space<vmem>>, %arg3: memref<512x256xbf16, #tpu.memory_space<vmem>>, %arg4: memref<1x256xf32, #tpu.memory_space<vmem>>, %arg5: memref<8x256xbf16, #tpu.memory_space<vmem>>) attributes {dimension_semantics = [#tpu.dimension_semantics<parallel>, #tpu.dimension_semantics<parallel>], iteration_bounds = array<i64: 1, 1>, scalar_prefetch = 0 : i64, scratch_operands = 0 : i64, tpu.core_type = #tpu.core_type<tc>, window_params = [{transform_indices = @transform_0, window_bounds = array<i64: 8, 512>}, {transform_indices = @transform_1, window_bounds = array<i64: 512, 256>}, {transform_indices = @transform_2, window_bounds = array<i64: 1, 256>}, {transform_indices = @transform_3, window_bounds = array<i64: 8, 256>}]} {
    %c0 = arith.constant 0 : index
    %c0_0 = arith.constant 0 : index
    %0 = vector.load %arg2[%c0, %c0_0] : memref<8x512xbf16, #tpu.memory_space<vmem>>, vector<8x512xbf16>
    %c0_1 = arith.constant 0 : index
    %c0_2 = arith.constant 0 : index
    %1 = vector.load %arg3[%c0_1, %c0_2] : memref<512x256xbf16, #tpu.memory_space<vmem>>, vector<512x256xbf16>
    %cst = arith.constant dense<0.000000e+00> : vector<8x256xf32>
    %2 = tpu.matmul %0, %1, %cst {dimension_numbers = #tpu.dot_dimension_numbers<[1], [0], [0], [1], [0, 0, 1, 1], [], []>} : vector<8x512xbf16>, vector<512x256xbf16>, vector<8x256xf32> -> vector<8x256xf32>
    %c0_3 = arith.constant 0 : index
    %c0_4 = arith.constant 0 : index
    %3 = vector.load %arg4[%c0_3, %c0_4] : memref<1x256xf32, #tpu.memory_space<vmem>>, vector<1x256xf32>
    %4 = vector.broadcast %3 : vector<1x256xf32> to vector<8x256xf32>
    %5 = arith.addf %2, %4 : vector<8x256xf32>
    %cst_5 = arith.constant 0.000000e+00 : f32
    %6 = vector.broadcast %cst_5 : f32 to vector<8x256xf32>
    %7 = arith.subf %6, %5 : vector<8x256xf32>
    %8 = math.exp %7 : vector<8x256xf32>
    %cst_6 = arith.constant 1.000000e+00 : f32
    %9 = vector.broadcast %cst_6 : f32 to vector<8x256xf32>
    %10 = arith.addf %9, %8 : vector<8x256xf32>
    %11 = tpu.reciprocal %10 {approx = true} : vector<8x256xf32> -> vector<8x256xf32>
    %12 = arith.mulf %5, %11 : vector<8x256xf32>
    %13 = arith.truncf %12 : vector<8x256xf32> to vector<8x256xbf16>
    %c0_7 = arith.constant 0 : index
    %c0_8 = arith.constant 0 : index
    %14 = vector.load %arg5[%c0_7, %c0_8] : memref<8x256xbf16, #tpu.memory_space<vmem>>, vector<8x256xbf16>
    tpu.vector_store %arg5[%c0_7, %c0_8], %13 {strides = array<i32>} : memref<8x256xbf16, #tpu.memory_space<vmem>>, vector<8x256xbf16>,
    return
  }
  func.func @transform_0(%arg0: i32, %arg1: i32) -> (i32, i32) {
    %c0_i32 = arith.constant 0 : i32
    %c0_i32_0 = arith.constant 0 : i32
    return %arg0, %c0_i32 : i32, i32
  }
  func.func @transform_1(%arg0: i32, %arg1: i32) -> (i32, i32) {
    %c0_i32 = arith.constant 0 : i32
    %c0_i32_0 = arith.constant 0 : i32
    return %c0_i32, %arg1 : i32, i32
  }
  func.func @transform_2(%arg0: i32, %arg1: i32) -> (i32, i32) {
    %c0_i32 = arith.constant 0 : i32
    %c0_i32_0 = arith.constant 0 : i32
    return %c0_i32, %arg1 : i32, i32
  }
  func.func @transform_3(%arg0: i32, %arg1: i32) -> (i32, i32) {
    %c0_i32 = arith.constant 0 : i32
    return %arg0, %arg1 : i32, i32
  }
}

module attributes {stable_mosaic.version = 11 : i64} {
  func.func @_mm_kernel(%arg0: i32, %arg1: i32, %arg2: memref<8x256xbf16, #tpu.memory_space<vmem>>, %arg3: memref<256x256xbf16, #tpu.memory_space<vmem>>, %arg4: memref<1x256xf32, #tpu.memory_space<vmem>>, %arg5: memref<8x256xbf16, #tpu.memory_space<vmem>>) attributes {dimension_semantics = [#tpu.dimension_semantics<parallel>, #tpu.dimension_semantics<parallel>], iteration_bounds = array<i64: 1, 1>, scalar_prefetch = 0 : i64, scratch_operands = 0 : i64, tpu.core_type = #tpu.core_type<tc>, window_params = [{transform_indices = @transform_0, window_bounds = array<i64: 8, 256>}, {transform_indices = @transform_1, window_bounds = array<i64: 256, 256>}, {transform_indices = @transform_2, window_bounds = array<i64: 1, 256>}, {transform_indices = @transform_3, window_bounds = array<i64: 8, 256>}]} {
    %c0 = arith.constant 0 : index
    %c0_0 = arith.constant 0 : index
    %0 = vector.load %arg2[%c0, %c0_0] : memref<8x256xbf16, #tpu.memory_space<vmem>>, vector<8x256xbf16>
    %c0_1 = arith.constant 0 : index
    %c0_2 = arith.constant 0 : index
    %1 = vector.load %arg3[%c0_1, %c0_2] : memref<256x256xbf16, #tpu.memory_space<vmem>>, vector<256x256xbf16>
    %cst = arith.constant dense<0.000000e+00> : vector<8x256xf32>
    %2 = tpu.matmul %0, %1, %cst {dimension_numbers = #tpu.dot_dimension_numbers<[1], [0], [0], [1], [0, 0, 1, 1], [], []>} : vector<8x256xbf16>, vector<256x256xbf16>, vector<8x256xf32> -> vector<8x256xf32>
    %c0_3 = arith.constant 0 : index
    %c0_4 = arith.constant 0 : index
    %3 = vector.load %arg4[%c0_3, %c0_4] : memref<1x256xf32, #tpu.memory_space<vmem>>, vector<1x256xf32>
    %4 = vector.broadcast %3 : vector<1x256xf32> to vector<8x256xf32>
    %5 = arith.addf %2, %4 : vector<8x256xf32>
    %cst_5 = arith.constant 0.000000e+00 : f32
    %6 = vector.broadcast %cst_5 : f32 to vector<8x256xf32>
    %7 = arith.subf %6, %5 : vector<8x256xf32>
    %8 = math.exp %7 : vector<8x256xf32>
    %cst_6 = arith.constant 1.000000e+00 : f32
    %9 = vector.broadcast %cst_6 : f32 to vector<8x256xf32>
    %10 = arith.addf %9, %8 : vector<8x256xf32>
    %11 = tpu.reciprocal %10 {approx = true} : vector<8x256xf32> -> vector<8x256xf32>
    %12 = arith.mulf %5, %11 : vector<8x256xf32>
    %13 = arith.truncf %12 : vector<8x256xf32> to vector<8x256xbf16>
    %c0_7 = arith.constant 0 : index
    %c0_8 = arith.constant 0 : index
    %14 = vector.load %arg5[%c0_7, %c0_8] : memref<8x256xbf16, #tpu.memory_space<vmem>>, vector<8x256xbf16>
    tpu.vector_store %arg5[%c0_7, %c0_8], %13 {strides = array<i32>} : memref<8x256xbf16, #tpu.memory_space<vmem>>, vector<8x256xbf16>,
    return
  }
  func.func @transform_0(%arg0: i32, %arg1: i32) -> (i32, i32) {
    %c0_i32 = arith.constant 0 : i32
    %c0_i32_0 = arith.constant 0 : i32
    return %arg0, %c0_i32 : i32, i32
  }
  func.func @transform_1(%arg0: i32, %arg1: i32) -> (i32, i32) {
    %c0_i32 = arith.constant 0 : i32
    %c0_i32_0 = arith.constant 0 : i32
    return %c0_i32, %arg1 : i32, i32
  }
  func.func @transform_2(%arg0: i32, %arg1: i32) -> (i32, i32) {
    %c0_i32 = arith.constant 0 : i32
    %c0_i32_0 = arith.constant 0 : i32
    return %c0_i32, %arg1 : i32, i32
  }
  func.func @transform_3(%arg0: i32, %arg1: i32) -> (i32, i32) {
    %c0_i32 = arith.constant 0 : i32
    return %arg0, %arg1 : i32, i32
  }
}

module attributes {stable_mosaic.version = 11 : i64} {
  func.func @_mm_kernel(%arg0: i32, %arg1: i32, %arg2: memref<8x1152xbf16, #tpu.memory_space<vmem>>, %arg3: memref<1152x128xbf16, #tpu.memory_space<vmem>>, %arg4: memref<1x128xf32, #tpu.memory_space<vmem>>, %arg5: memref<8x128xbf16, #tpu.memory_space<vmem>>) attributes {dimension_semantics = [#tpu.dimension_semantics<parallel>, #tpu.dimension_semantics<parallel>], iteration_bounds = array<i64: 1, 1>, scalar_prefetch = 0 : i64, scratch_operands = 0 : i64, tpu.core_type = #tpu.core_type<tc>, window_params = [{transform_indices = @transform_0, window_bounds = array<i64: 8, 1152>}, {transform_indices = @transform_1, window_bounds = array<i64: 1152, 128>}, {transform_indices = @transform_2, window_bounds = array<i64: 1, 128>}, {transform_indices = @transform_3, window_bounds = array<i64: 8, 128>}]} {
    %c0 = arith.constant 0 : index
    %c0_0 = arith.constant 0 : index
    %0 = vector.load %arg2[%c0, %c0_0] : memref<8x1152xbf16, #tpu.memory_space<vmem>>, vector<8x1152xbf16>
    %c0_1 = arith.constant 0 : index
    %c0_2 = arith.constant 0 : index
    %1 = vector.load %arg3[%c0_1, %c0_2] : memref<1152x128xbf16, #tpu.memory_space<vmem>>, vector<1152x128xbf16>
    %cst = arith.constant dense<0.000000e+00> : vector<8x128xf32>
    %2 = tpu.matmul %0, %1, %cst {dimension_numbers = #tpu.dot_dimension_numbers<[1], [0], [0], [1], [0, 0, 1, 1], [], []>} : vector<8x1152xbf16>, vector<1152x128xbf16>, vector<8x128xf32> -> vector<8x128xf32>
    %c0_3 = arith.constant 0 : index
    %c0_4 = arith.constant 0 : index
    %3 = vector.load %arg4[%c0_3, %c0_4] : memref<1x128xf32, #tpu.memory_space<vmem>>, vector<1x128xf32>
    %4 = vector.broadcast %3 : vector<1x128xf32> to vector<8x128xf32>
    %5 = arith.addf %2, %4 : vector<8x128xf32>
    %cst_5 = arith.constant 0.000000e+00 : f32
    %6 = vector.broadcast %cst_5 : f32 to vector<8x128xf32>
    %7 = arith.subf %6, %5 : vector<8x128xf32>
    %8 = math.exp %7 : vector<8x128xf32>
    %cst_6 = arith.constant 1.000000e+00 : f32
    %9 = vector.broadcast %cst_6 : f32 to vector<8x128xf32>
    %10 = arith.addf %9, %8 : vector<8x128xf32>
    %11 = tpu.reciprocal %10 {approx = true} : vector<8x128xf32> -> vector<8x128xf32>
    %12 = arith.mulf %5, %11 : vector<8x128xf32>
    %13 = arith.truncf %12 : vector<8x128xf32> to vector<8x128xbf16>
    %c0_7 = arith.constant 0 : index
    %c0_8 = arith.constant 0 : index
    %14 = vector.load %arg5[%c0_7, %c0_8] : memref<8x128xbf16, #tpu.memory_space<vmem>>, vector<8x128xbf16>
    tpu.vector_store %arg5[%c0_7, %c0_8], %13 {strides = array<i32>} : memref<8x128xbf16, #tpu.memory_space<vmem>>, vector<8x128xbf16>,
    return
  }
  func.func @transform_0(%arg0: i32, %arg1: i32) -> (i32, i32) {
    %c0_i32 = arith.constant 0 : i32
    %c0_i32_0 = arith.constant 0 : i32
    return %arg0, %c0_i32 : i32, i32
  }
  func.func @transform_1(%arg0: i32, %arg1: i32) -> (i32, i32) {
    %c0_i32 = arith.constant 0 : i32
    %c0_i32_0 = arith.constant 0 : i32
    return %c0_i32, %arg1 : i32, i32
  }
  func.func @transform_2(%arg0: i32, %arg1: i32) -> (i32, i32) {
    %c0_i32 = arith.constant 0 : i32
    %c0_i32_0 = arith.constant 0 : i32
    return %c0_i32, %arg1 : i32, i32
  }
  func.func @transform_3(%arg0: i32, %arg1: i32) -> (i32, i32) {
    %c0_i32 = arith.constant 0 : i32
    return %arg0, %arg1 : i32, i32
  }
}

</mosaic_0001>

<bundles_post_ra>
// kernel: _lambda_.46
= control target key start
LH: loop header
LB: loop body
LE: loop exit
PB: predicated region body
PF: predicated region fallthrough
CT: control target
= control target key end

     0   :  { %vm102_vm0 = vcmask 392192   ;;  %s545_s1 = inlined_call_operand.vmem [shape: bf16[48,128], index: 1, kind: input, shape index: {}]   ;;  %s546_s0 = inlined_call_operand.vmem [shape: bf16[128,48], index: 0, kind: input, shape index: {}]   ;;  %s547_s2 = inlined_call_operand.vmem [shape: f32[1,128], index: 2, kind: input, shape index: {}]   ;;  %s548_s3 = inlined_call_operand.vmem [shape: bf16[128,128], index: 3, kind: output, shape index: {}]  }
   0x1   :  { %v446_v0 = vld [vmem:[%s545_s1] sm:$0xff]   ;;  %v447_v1 = vld [vmem:[%s545_s1 + $0x8] sm:$0xff]   ;;  %v448_v2 = vld [vmem:[%s545_s1 + $0x10] sm:$0xff]  }
   0x2   :  { %418 = vmatprep.subr.bf16.mxu0 %v446_v0  ;;  %440 = vmatprep.subr.bf16.mxu1 %v446_v0  ;;  %v449_v3 = vld [vmem:[%s546_s0] sm:$0xff]   ;;  %v451_v5 = vld [vmem:[%s546_s0 + $0x8] sm:$0xff]   ;;  %v453_v7 = vld [vmem:[%s546_s0 + $0x10] sm:$0xff]  }
   0x3   :  { %419 = vmatpush3.bf16.msra.mxu0 %v446_v0  ;;  %443 = vmatpush3.bf16.msra.mxu1 %v446_v0  ;;  %v450_v4 = vld [vmem:[%s546_s0 + $0x20] sm:$0xff]   ;;  %v452_v6 = vld [vmem:[%s546_s0 + $0x28] sm:$0xff]   ;;  %v454_v8 = vld [vmem:[%s546_s0 + $0x30] sm:$0xff]  }
   0x4   :  { %420 = vmatprep.subr.bf16.mxu0 %v447_v1  ;;  %441 = vmatprep.subr.bf16.mxu1 %v447_v1  ;;  %v455_v9 = vld [vmem:[%s546_s0 + $0x18] sm:$0xff]   ;;  %v308_v12 = vld [vmem:[%s547_s2] ss:$0 sm:$0xff] }
   0x5   :  { %424 = vmatprep.mubr.msk.bf16.mxu0 %vm102_vm0, %v449_v3  ;;  %432 = vmatprep.mubr.msk.bf16.mxu1 %vm102_vm0, %v450_v4  ;;  %v456_v10 = vld [vmem:[%s546_s0 + $0x38] sm:$0xff]  }
   0x7   :  { %421 = vmatpush3.bf16.msra.mxu0 %v447_v1  ;;  %444 = vmatpush3.bf16.msra.mxu1 %v447_v1 }
   0x8   :  { %422 = vmatprep.subr.bf16.mxu0 %v448_v2  ;;  %442 = vmatprep.subr.bf16.mxu1 %v448_v2 }
   0xb   :  { %423 = vmatpush3.bf16.msra.mxu0 %v448_v2  ;;  %445 = vmatpush3.bf16.msra.mxu1 %v448_v2 }
   0xe   :  { %425 = vmatmul.mubr.msk.bf16.vlgmr.msra.gmra.mrb[0].mxu0 %vm102_vm0, %v451_v5  ;;  %433 = vmatmul.mubr.msk.bf16.vlgmr.msra.gmra.mrb[0].mxu1 %vm102_vm0, %v452_v6 }
   0xf   :  { %428 = vmatprep.mubr.msk.bf16.mxu0 %vm102_vm0, %v453_v7  ;;  %436 = vmatprep.mubr.msk.bf16.mxu1 %vm102_vm0, %v454_v8 }
  0x16   :  { %429 = vmatmul.mubr.msk.bf16.gmra.mrb[4].mxu0 %vm102_vm0, %v455_v9  ;;  %437 = vmatmul.mubr.msk.bf16.gmra.mrb[4].mxu1 %vm102_vm0, %v456_v10 }
  0xe1   :  { %v426_v11 = vpop.f32.mrb[0].mxu0  ;;  %v434_v13 = vpop.f32.mrb[0].mxu1 }
  0xe2   :  { %v161_v14 = vpop.f32.mrb[1].mxu0  ;;  %v193_v15 = vpop.f32.mrb[1].mxu1  ;;  %v170_v18 = vadd.f32 %v426_v11, %v308_v12  ;;  %v202_v19 = vadd.f32 %v434_v13, %v308_v12 }
  0xe3   :  { %v427_v16 = vpop.f32.mrb[2].mxu0  ;;  %v435_v17 = vpop.f32.mrb[2].mxu1  ;;  %v162_v24 = vadd.f32 %v308_v12, %v161_v14  ;;  %v194_v25 = vadd.f32 %v308_v12, %v193_v15 }
  0xe4   :  { %v173_v20 = vadd.f32 %v427_v16, %v308_v12  ;;  %v205_v21 = vadd.f32 %v435_v17, %v308_v12  ;;  %v164_v22 = vpop.f32.mrb[3].mxu0  ;;  %v196_v23 = vpop.f32.mrb[3].mxu1 }
  0xe5   :  { %v165_v26 = vadd.f32 %v308_v12, %v164_v22  ;;  %v197_v27 = vadd.f32 %v308_v12, %v196_v23 }
  0xe6   :  { %v368_v28 = vpack.c.bf16 %v173_v20, %v170_v18  ;;  %v388_v29 = vpack.c.bf16 %v205_v21, %v202_v19 }
  0xe7   :  { %v363_v30 = vpack.c.bf16 %v165_v26, %v162_v24  ;;  %v383_v31 = vpack.c.bf16 %v197_v27, %v194_v25 }
  0xe8   :  { %400 = vst [vmem:[%s548_s3 + $0x8] sm:$0xff] %v368_v28   ;;  %404 = vst [vmem:[%s548_s3 + $0x28] sm:$0xff] %v388_v29  }
  0xe9   :  { %364 = vst [vmem:[%s548_s3] sm:$0xff] %v363_v30   ;;  %403 = vst [vmem:[%s548_s3 + $0x20] sm:$0xff] %v383_v31   ;;  %v430_v32 = vpop.f32.mrb[4].mxu0  ;;  %v438_v33 = vpop.f32.mrb[4].mxu1 }
  0xea   :  { %v177_v34 = vpop.f32.mrb[5].mxu0  ;;  %v209_v35 = vpop.f32.mrb[5].mxu1  ;;  %v186_v38 = vadd.f32 %v430_v32, %v308_v12  ;;  %v218_v39 = vadd.f32 %v438_v33, %v308_v12 }
  0xeb   :  { %v431_v36 = vpop.f32.mrb[6].mxu0  ;;  %v439_v37 = vpop.f32.mrb[6].mxu1  ;;  %v178_v44 = vadd.f32 %v308_v12, %v177_v34  ;;  %v210_v45 = vadd.f32 %v308_v12, %v209_v35 }
  0xec   :  { %v189_v40 = vadd.f32 %v431_v36, %v308_v12  ;;  %v221_v41 = vadd.f32 %v439_v37, %v308_v12  ;;  %v180_v42 = vpop.f32.mrb[7].mxu0  ;;  %v212_v43 = vpop.f32.mrb[7].mxu1 }
  0xed   :  { %v181_v46 = vadd.f32 %v308_v12, %v180_v42  ;;  %v213_v47 = vadd.f32 %v308_v12, %v212_v43 }
  0xee   :  { %v378_v48 = vpack.c.bf16 %v189_v40, %v186_v38  ;;  %v398_v49 = vpack.c.bf16 %v221_v41, %v218_v39 }
  0xef   :  { %v373_v50 = vpack.c.bf16 %v181_v46, %v178_v44  ;;  %v393_v51 = vpack.c.bf16 %v213_v47, %v210_v45 }
  0xf0   :  { %402 = vst [vmem:[%s548_s3 + $0x18] sm:$0xff] %v378_v48   ;;  %406 = vst [vmem:[%s548_s3 + $0x38] sm:$0xff] %v398_v49  }
  0xf1   :  { %401 = vst [vmem:[%s548_s3 + $0x10] sm:$0xff] %v373_v50   ;;  %405 = vst [vmem:[%s548_s3 + $0x30] sm:$0xff] %v393_v51  }

// kernel: _lambda_.54
= control target key start
LH: loop header
LB: loop body
LE: loop exit
PB: predicated region body
PF: predicated region fallthrough
CT: control target
= control target key end

     0   :  { %vm86_vm0 = vcmask 130048   ;;  %s509_s1 = inlined_call_operand.vmem [shape: bf16[16,128], index: 1, kind: input, shape index: {}]   ;;  %s510_s0 = inlined_call_operand.vmem [shape: bf16[128,16], index: 0, kind: input, shape index: {}]   ;;  %s511_s2 = inlined_call_operand.vmem [shape: f32[1,128], index: 2, kind: input, shape index: {}]   ;;  %s512_s3 = inlined_call_operand.vmem [shape: bf16[128,128], index: 3, kind: output, shape index: {}]  }
   0x1   :  { %v418_v0 = vld [vmem:[%s509_s1] sm:$0xff]   ;;  %v421_v3 = vld [vmem:[%s510_s0 + $0x8] sm:$0xff]   ;;  %v423_v5 = vld [vmem:[%s510_s0 + $0x10] sm:$0xff]  }
   0x2   :  { %v419_v1 = vld [vmem:[%s510_s0] sm:$0xff]   ;;  %398 = vmatprep.subr.bf16.mxu0 %v418_v0  ;;  %416 = vmatprep.subr.bf16.mxu1 %v418_v0  ;;  %v422_v4 = vld [vmem:[%s510_s0 + $0x28] sm:$0xff]   ;;  %v424_v6 = vld [vmem:[%s510_s0 + $0x30] sm:$0xff]  }
   0x3   :  { %v420_v2 = vld [vmem:[%s510_s0 + $0x20] sm:$0xff]   ;;  %399 = vmatpush3.bf16.msra.mxu0 %v418_v0  ;;  %417 = vmatpush3.bf16.msra.mxu1 %v418_v0  ;;  %v425_v7 = vld [vmem:[%s510_s0 + $0x18] sm:$0xff]  }
   0x4   :  { %400 = vmatprep.mubr.msk.bf16.mxu0 %vm86_vm0, %v419_v1  ;;  %408 = vmatprep.mubr.msk.bf16.mxu1 %vm86_vm0, %v420_v2  ;;  %v426_v8 = vld [vmem:[%s510_s0 + $0x38] sm:$0xff]   ;;  %v292_v10 = vld [vmem:[%s511_s2] ss:$0 sm:$0xff] }
   0x6   :  { %401 = vmatmul.mubr.msk.bf16.vlgmr.msra.gmra.mrb[0].mxu0 %vm86_vm0, %v421_v3  ;;  %409 = vmatmul.mubr.msk.bf16.vlgmr.msra.gmra.mrb[0].mxu1 %vm86_vm0, %v422_v4 }
   0x7   :  { %404 = vmatprep.mubr.msk.bf16.mxu0 %vm86_vm0, %v423_v5  ;;  %412 = vmatprep.mubr.msk.bf16.mxu1 %vm86_vm0, %v424_v6 }
   0xe   :  { %405 = vmatmul.mubr.msk.bf16.gmra.mrb[4].mxu0 %vm86_vm0, %v425_v7  ;;  %413 = vmatmul.mubr.msk.bf16.gmra.mrb[4].mxu1 %vm86_vm0, %v426_v8 }
  0xd9   :  { %v402_v9 = vpop.f32.mrb[0].mxu0  ;;  %v410_v11 = vpop.f32.mrb[0].mxu1 }
  0xda   :  { %v145_v12 = vpop.f32.mrb[1].mxu0  ;;  %v177_v13 = vpop.f32.mrb[1].mxu1  ;;  %v154_v16 = vadd.f32 %v402_v9, %v292_v10  ;;  %v186_v17 = vadd.f32 %v410_v11, %v292_v10 }
  0xdb   :  { %v403_v14 = vpop.f32.mrb[2].mxu0  ;;  %v411_v15 = vpop.f32.mrb[2].mxu1  ;;  %v146_v22 = vadd.f32 %v292_v10, %v145_v12  ;;  %v178_v23 = vadd.f32 %v292_v10, %v177_v13 }
  0xdc   :  { %v157_v18 = vadd.f32 %v403_v14, %v292_v10  ;;  %v189_v19 = vadd.f32 %v411_v15, %v292_v10  ;;  %v148_v20 = vpop.f32.mrb[3].mxu0  ;;  %v180_v21 = vpop.f32.mrb[3].mxu1 }
  0xdd   :  { %v149_v24 = vadd.f32 %v292_v10, %v148_v20  ;;  %v181_v25 = vadd.f32 %v292_v10, %v180_v21 }
  0xde   :  { %v350_v26 = vpack.c.bf16 %v157_v18, %v154_v16  ;;  %v370_v27 = vpack.c.bf16 %v189_v19, %v186_v17 }
  0xdf   :  { %v345_v28 = vpack.c.bf16 %v149_v24, %v146_v22  ;;  %v365_v29 = vpack.c.bf16 %v181_v25, %v178_v23 }
  0xe0   :  { %382 = vst [vmem:[%s512_s3 + $0x8] sm:$0xff] %v350_v26   ;;  %386 = vst [vmem:[%s512_s3 + $0x28] sm:$0xff] %v370_v27  }
  0xe1   :  { %346 = vst [vmem:[%s512_s3] sm:$0xff] %v345_v28   ;;  %385 = vst [vmem:[%s512_s3 + $0x20] sm:$0xff] %v365_v29   ;;  %v406_v30 = vpop.f32.mrb[4].mxu0  ;;  %v414_v31 = vpop.f32.mrb[4].mxu1 }
  0xe2   :  { %v161_v32 = vpop.f32.mrb[5].mxu0  ;;  %v193_v33 = vpop.f32.mrb[5].mxu1  ;;  %v170_v36 = vadd.f32 %v406_v30, %v292_v10  ;;  %v202_v37 = vadd.f32 %v414_v31, %v292_v10 }
  0xe3   :  { %v407_v34 = vpop.f32.mrb[6].mxu0  ;;  %v415_v35 = vpop.f32.mrb[6].mxu1  ;;  %v162_v42 = vadd.f32 %v292_v10, %v161_v32  ;;  %v194_v43 = vadd.f32 %v292_v10, %v193_v33 }
  0xe4   :  { %v173_v38 = vadd.f32 %v407_v34, %v292_v10  ;;  %v205_v39 = vadd.f32 %v415_v35, %v292_v10  ;;  %v164_v40 = vpop.f32.mrb[7].mxu0  ;;  %v196_v41 = vpop.f32.mrb[7].mxu1 }
  0xe5   :  { %v165_v44 = vadd.f32 %v292_v10, %v164_v40  ;;  %v197_v45 = vadd.f32 %v292_v10, %v196_v41 }
  0xe6   :  { %v360_v46 = vpack.c.bf16 %v173_v38, %v170_v36  ;;  %v380_v47 = vpack.c.bf16 %v205_v39, %v202_v37 }
  0xe7   :  { %v355_v48 = vpack.c.bf16 %v165_v44, %v162_v42  ;;  %v375_v49 = vpack.c.bf16 %v197_v45, %v194_v43 }
  0xe8   :  { %384 = vst [vmem:[%s512_s3 + $0x18] sm:$0xff] %v360_v46   ;;  %388 = vst [vmem:[%s512_s3 + $0x38] sm:$0xff] %v380_v47  }
  0xe9   :  { %383 = vst [vmem:[%s512_s3 + $0x10] sm:$0xff] %v355_v48   ;;  %387 = vst [vmem:[%s512_s3 + $0x30] sm:$0xff] %v375_v49  }

// kernel: _lambda_.57
= control target key start
LH: loop header
LB: loop body
LE: loop exit
PB: predicated region body
PF: predicated region fallthrough
CT: control target
= control target key end

     0   :  { %vm110_vm0 = vcmask 523264   ;;  %s563_s1 = inlined_call_operand.vmem [shape: bf16[64,128], index: 1, kind: input, shape index: {}]   ;;  %s564_s0 = inlined_call_operand.vmem [shape: bf16[128,64], index: 0, kind: input, shape index: {}]   ;;  %s565_s2 = inlined_call_operand.vmem [shape: f32[1,128], index: 2, kind: input, shape index: {}]   ;;  %s566_s3 = inlined_call_operand.vmem [shape: bf16[128,128], index: 3, kind: output, shape index: {}]  }
   0x1   :  { %v460_v0 = vld [vmem:[%s563_s1] sm:$0xff]   ;;  %v461_v1 = vld [vmem:[%s563_s1 + $0x8] sm:$0xff]   ;;  %v462_v2 = vld [vmem:[%s563_s1 + $0x10] sm:$0xff]  }
   0x2   :  { %428 = vmatprep.subr.bf16.mxu0 %v460_v0  ;;  %452 = vmatprep.subr.bf16.mxu1 %v460_v0  ;;  %v464_v3 = vld [vmem:[%s564_s0] sm:$0xff]   ;;  %v463_v5 = vld [vmem:[%s563_s1 + $0x18] sm:$0xff]   ;;  %v466_v6 = vld [vmem:[%s564_s0 + $0x8] sm:$0xff]  }
   0x3   :  { %429 = vmatpush3.bf16.msra.mxu0 %v460_v0  ;;  %456 = vmatpush3.bf16.msra.mxu1 %v460_v0  ;;  %v465_v4 = vld [vmem:[%s564_s0 + $0x20] sm:$0xff]   ;;  %v467_v7 = vld [vmem:[%s564_s0 + $0x28] sm:$0xff]   ;;  %v468_v8 = vld [vmem:[%s564_s0 + $0x10] sm:$0xff]  }
   0x4   :  { %430 = vmatprep.subr.bf16.mxu0 %v461_v1  ;;  %453 = vmatprep.subr.bf16.mxu1 %v461_v1  ;;  %v469_v9 = vld [vmem:[%s564_s0 + $0x30] sm:$0xff]   ;;  %v470_v10 = vld [vmem:[%s564_s0 + $0x18] sm:$0xff]   ;;  %v316_v13 = vld [vmem:[%s565_s2] ss:$0 sm:$0xff] }
   0x5   :  { %436 = vmatprep.mubr.msk.bf16.mxu0 %vm110_vm0, %v464_v3  ;;  %444 = vmatprep.mubr.msk.bf16.mxu1 %vm110_vm0, %v465_v4  ;;  %v471_v11 = vld [vmem:[%s564_s0 + $0x38] sm:$0xff]  }
   0x7   :  { %431 = vmatpush3.bf16.msra.mxu0 %v461_v1  ;;  %457 = vmatpush3.bf16.msra.mxu1 %v461_v1 }
   0x8   :  { %432 = vmatprep.subr.bf16.mxu0 %v462_v2  ;;  %454 = vmatprep.subr.bf16.mxu1 %v462_v2 }
   0xb   :  { %433 = vmatpush3.bf16.msra.mxu0 %v462_v2  ;;  %458 = vmatpush3.bf16.msra.mxu1 %v462_v2 }
   0xc   :  { %434 = vmatprep.subr.bf16.mxu0 %v463_v5  ;;  %455 = vmatprep.subr.bf16.mxu1 %v463_v5 }
   0xf   :  { %435 = vmatpush3.bf16.msra.mxu0 %v463_v5  ;;  %459 = vmatpush3.bf16.msra.mxu1 %v463_v5 }
  0x12   :  { %437 = vmatmul.mubr.msk.bf16.vlgmr.msra.gmra.mrb[0].mxu0 %vm110_vm0, %v466_v6  ;;  %445 = vmatmul.mubr.msk.bf16.vlgmr.msra.gmra.mrb[0].mxu1 %vm110_vm0, %v467_v7 }
  0x13   :  { %440 = vmatprep.mubr.msk.bf16.mxu0 %vm110_vm0, %v468_v8  ;;  %448 = vmatprep.mubr.msk.bf16.mxu1 %vm110_vm0, %v469_v9 }
  0x1a   :  { %441 = vmatmul.mubr.msk.bf16.gmra.mrb[4].mxu0 %vm110_vm0, %v470_v10  ;;  %449 = vmatmul.mubr.msk.bf16.gmra.mrb[4].mxu1 %vm110_vm0, %v471_v11 }
  0xe5   :  { %v438_v12 = vpop.f32.mrb[0].mxu0  ;;  %v446_v14 = vpop.f32.mrb[0].mxu1 }
  0xe6   :  { %v169_v15 = vpop.f32.mrb[1].mxu0  ;;  %v201_v16 = vpop.f32.mrb[1].mxu1  ;;  %v178_v19 = vadd.f32 %v438_v12, %v316_v13  ;;  %v210_v20 = vadd.f32 %v446_v14, %v316_v13 }
  0xe7   :  { %v439_v17 = vpop.f32.mrb[2].mxu0  ;;  %v447_v18 = vpop.f32.mrb[2].mxu1  ;;  %v170_v25 = vadd.f32 %v316_v13, %v169_v15  ;;  %v202_v26 = vadd.f32 %v316_v13, %v201_v16 }
  0xe8   :  { %v181_v21 = vadd.f32 %v439_v17, %v316_v13  ;;  %v213_v22 = vadd.f32 %v447_v18, %v316_v13  ;;  %v172_v23 = vpop.f32.mrb[3].mxu0  ;;  %v204_v24 = vpop.f32.mrb[3].mxu1 }
  0xe9   :  { %v173_v27 = vadd.f32 %v316_v13, %v172_v23  ;;  %v205_v28 = vadd.f32 %v316_v13, %v204_v24 }
  0xea   :  { %v377_v29 = vpack.c.bf16 %v181_v21, %v178_v19  ;;  %v397_v30 = vpack.c.bf16 %v213_v22, %v210_v20 }
  0xeb   :  { %v372_v31 = vpack.c.bf16 %v173_v27, %v170_v25  ;;  %v392_v32 = vpack.c.bf16 %v205_v28, %v202_v26 }
  0xec   :  { %409 = vst [vmem:[%s566_s3 + $0x8] sm:$0xff] %v377_v29   ;;  %413 = vst [vmem:[%s566_s3 + $0x28] sm:$0xff] %v397_v30  }
  0xed   :  { %373 = vst [vmem:[%s566_s3] sm:$0xff] %v372_v31   ;;  %412 = vst [vmem:[%s566_s3 + $0x20] sm:$0xff] %v392_v32   ;;  %v442_v33 = vpop.f32.mrb[4].mxu0  ;;  %v450_v34 = vpop.f32.mrb[4].mxu1 }
  0xee   :  { %v185_v35 = vpop.f32.mrb[5].mxu0  ;;  %v217_v36 = vpop.f32.mrb[5].mxu1  ;;  %v194_v39 = vadd.f32 %v442_v33, %v316_v13  ;;  %v226_v40 = vadd.f32 %v450_v34, %v316_v13 }
  0xef   :  { %v443_v37 = vpop.f32.mrb[6].mxu0  ;;  %v451_v38 = vpop.f32.mrb[6].mxu1  ;;  %v186_v45 = vadd.f32 %v316_v13, %v185_v35  ;;  %v218_v46 = vadd.f32 %v316_v13, %v217_v36 }
  0xf0   :  { %v197_v41 = vadd.f32 %v443_v37, %v316_v13  ;;  %v229_v42 = vadd.f32 %v451_v38, %v316_v13  ;;  %v188_v43 = vpop.f32.mrb[7].mxu0  ;;  %v220_v44 = vpop.f32.mrb[7].mxu1 }
  0xf1   :  { %v189_v47 = vadd.f32 %v316_v13, %v188_v43  ;;  %v221_v48 = vadd.f32 %v316_v13, %v220_v44 }
  0xf2   :  { %v387_v49 = vpack.c.bf16 %v197_v41, %v194_v39  ;;  %v407_v50 = vpack.c.bf16 %v229_v42, %v226_v40 }
  0xf3   :  { %v382_v51 = vpack.c.bf16 %v189_v47, %v186_v45  ;;  %v402_v52 = vpack.c.bf16 %v221_v48, %v218_v46 }
  0xf4   :  { %411 = vst [vmem:[%s566_s3 + $0x18] sm:$0xff] %v387_v49   ;;  %415 = vst [vmem:[%s566_s3 + $0x38] sm:$0xff] %v407_v50  }
  0xf5   :  { %410 = vst [vmem:[%s566_s3 + $0x10] sm:$0xff] %v382_v51   ;;  %414 = vst [vmem:[%s566_s3 + $0x30] sm:$0xff] %v402_v52  }

// kernel: _lambda_.62
= control target key start
LH: loop header
LB: loop body
LE: loop exit
PB: predicated region body
PF: predicated region fallthrough
CT: control target
= control target key end

     0   :  { %vm68_vm0 = vcmask 523264   ;;  %s247_s1 = inlined_call_operand.vmem [shape: bf16[64,128], index: 1, kind: input, shape index: {}]   ;;  %s248_s0 = inlined_call_operand.vmem [shape: bf16[32,64], index: 0, kind: input, shape index: {}]   ;;  %s249_s2 = inlined_call_operand.vmem [shape: f32[1,128], index: 2, kind: input, shape index: {}]   ;;  %s250_s3 = inlined_call_operand.vmem [shape: bf16[32,128], index: 3, kind: output, shape index: {}]  }
   0x1   :  { %v194_v0 = vld [vmem:[%s247_s1] sm:$0xff]   ;;  %v195_v1 = vld [vmem:[%s247_s1 + $0x8] sm:$0xff]   ;;  %v196_v2 = vld [vmem:[%s247_s1 + $0x10] sm:$0xff]  }
   0x2   :  { %182 = vmatprep.subr.bf16.mxu0 %v194_v0  ;;  %v198_v3 = vld [vmem:[%s248_s0] sm:$0xff]   ;;  %v197_v4 = vld [vmem:[%s247_s1 + $0x18] sm:$0xff]   ;;  %v199_v5 = vld [vmem:[%s248_s0 + $0x8] sm:$0xff]  }
   0x3   :  { %183 = vmatpush3.bf16.msra.mxu0 %v194_v0  ;;  %190 = vmatprep.mubr.msk.bf16.mxu0 %vm68_vm0, %v198_v3  ;;  %v148_v7 = vld [vmem:[%s249_s2] ss:$0 sm:$0xff] }
   0x4   :  { %184 = vmatprep.subr.bf16.mxu0 %v195_v1 }
   0x7   :  { %185 = vmatpush3.bf16.msra.mxu0 %v195_v1 }
   0x8   :  { %186 = vmatprep.subr.bf16.mxu0 %v196_v2 }
   0xb   :  { %187 = vmatpush3.bf16.msra.mxu0 %v196_v2 }
   0xc   :  { %188 = vmatprep.subr.bf16.mxu0 %v197_v4 }
   0xf   :  { %189 = vmatpush3.bf16.msra.mxu0 %v197_v4 }
  0x12   :  { %191 = vmatmul.mubr.msk.bf16.vlgmr.msra.gmra.mrb[0].mxu0 %vm68_vm0, %v199_v5 }
  0xe5   :  { %v192_v6 = vpop.f32.mrb[0].mxu0 }
  0xe6   :  { %v109_v8 = vpop.f32.mrb[1].mxu0  ;;  %v118_v10 = vadd.f32 %v192_v6, %v148_v7 }
  0xe7   :  { %v193_v9 = vpop.f32.mrb[2].mxu0  ;;  %v110_v13 = vadd.f32 %v148_v7, %v109_v8 }
  0xe8   :  { %v121_v11 = vadd.f32 %v193_v9, %v148_v7  ;;  %v112_v12 = vpop.f32.mrb[3].mxu0 }
  0xe9   :  { %v113_v14 = vadd.f32 %v148_v7, %v112_v12 }
  0xea   :  { %v173_v15 = vpack.c.bf16 %v121_v11, %v118_v10 }
  0xeb   :  { %v168_v16 = vpack.c.bf16 %v113_v14, %v110_v13 }
  0xec   :  { %175 = vst [vmem:[%s250_s3 + $0x8] sm:$0xff] %v173_v15  }
  0xed   :  { %169 = vst [vmem:[%s250_s3] sm:$0xff] %v168_v16  }

// kernel: _lambda_.47
= control target key start
LH: loop header
LB: loop body
LE: loop exit
PB: predicated region body
PF: predicated region fallthrough
CT: control target
= control target key end

     0   :  { %s1584_s12 = smov 0   ;;  %s1586_s13 = smov 0   ;;  %s1892_s0 = inlined_call_operand.vmem [shape: bf16[512,108], index: 0, kind: input, shape index: {}]   ;;  %s1893_s1 = inlined_call_operand.vmem [shape: bf16[108,128], index: 1, kind: input, shape index: {}]   ;;  %s1894_s2 = inlined_call_operand.vmem [shape: f32[1,128], index: 2, kind: input, shape index: {}]   ;;  %s1895_s3 = inlined_call_operand.vmem [shape: bf16[512,128], index: 3, kind: output, shape index: {}]  }
   0x1   :  { %s1588_s14 = smov 0  }
   0x2 LB: > { %s25_s15 = sadd.s32 1, %s1558_s13  ;;  %p1074_p0 = scmp.ge.s32.totalorder %s1562_s14, 1  ;;  %s1562_s14 = sphi %s1588_s14, %s13_s14   ;;  %s1558_s13 = sphi %s1586_s13, %s1897_s13   ;;  %s1554_s12 = sphi %s1584_s12, %s1896_s12  }
   0x3   : > { %p27_p1 = scmp.ge.s32.totalorder %s25_s15, 2  ;;  %p169_p2 = scmp.lt.s32.totalorder %s1562_s14, 3 }
   0x5   : > { %s1899_s15 = smov (%p27_p1, %s25_s15), 0  ;;  %p170_p3 = pnand %p1074_p0, %p169_p2 }
   0x6   : > { %v1389_v0 = vld [vmem:[%s1893_s1] sm:$0xff] (!%p170_p3)   ;;  %v1390_v1 = vld [vmem:[%s1893_s1 + $0x8] sm:$0xff] (!%p170_p3)   ;;  %s1075_s20 = sshll.u32 (!%p170_p3), %s1554_s12, 5  ;;  %v1391_v2 = vld [vmem:[%s1893_s1 + $0x10] sm:$0xff] (!%p170_p3)   ;;  %vm400_vm0 = vcmask (!%p170_p3), 883712   ;;  %vm449_vm1 = vcmask (!%p170_p3), 1045504  }
   0x7   : > { %173 = sbr.rel (%p170_p3) target bundleno = 339 (0x153), region = 32  ;;  %1303 = vmatprep.subr.bf16.mxu0 (!%p170_p3), %v1389_v0  ;;  %1349 = vmatprep.subr.bf16.mxu1 (!%p170_p3), %v1389_v0  ;;  %p204_p4 = scmp.lt.s32.totalorder (!%p170_p3), %s1075_s20, 63  ;;  %v1392_v3 = vld [vmem:[%s1893_s1 + $0x18] sm:$0xff] (!%p170_p3)   ;;  %v1393_v6 = vld [vmem:[%s1893_s1 + $0x20] sm:$0xff] (!%p170_p3)   ;;  %v1394_v7 = vld [vmem:[%s1893_s1 + $0x28] sm:$0xff] (!%p170_p3)  }
   0x8   : > { %1304 = vmatpush3.bf16.msra.mxu0 (!%p170_p3), %v1389_v0  ;;  %1356 = vmatpush3.bf16.msra.mxu1 (!%p170_p3), %v1389_v0  ;;  %v1395_v8 = vld [vmem:[%s1893_s1 + $0x30] sm:$0x3f] (!%p170_p3)   ;;  %v1668_v24 = vld [vmem:[%s1894_s2] ss:$0 sm:$0xff] (!%p170_p3) }
   0x9   : > { %1305 = vmatprep.subr.bf16.mxu0 (!%p170_p3), %v1390_v1  ;;  %1350 = vmatprep.subr.bf16.mxu1 (!%p170_p3), %v1390_v1  ;;  %v451_v9 = vsel (!%p170_p3), %vm449_vm1, %v1395_v8, 0 }
   0xc   : > { %1306 = vmatpush3.bf16.msra.mxu0 (!%p170_p3), %v1390_v1  ;;  %1357 = vmatpush3.bf16.msra.mxu1 (!%p170_p3), %v1390_v1 }
   0xd   : > { %1307 = vmatprep.subr.bf16.mxu0 (!%p170_p3), %v1391_v2  ;;  %1351 = vmatprep.subr.bf16.mxu1 (!%p170_p3), %v1391_v2 }
   0xe   : > { %s1901_s20 = smov (!%p204_p4, %s1075_s20), 63 }
   0xf   : > { %s1076_s23 = sshll.u32 %s1901_s20, 2 }
  0x10   : > { %s1622_s28 = scalar_lea.vmem %s1892_s0, %s1076_s23  ;;  %1308 = vmatpush3.bf16.msra.mxu0 %v1391_v2  ;;  %1358 = vmatpush3.bf16.msra.mxu1 %v1391_v2  ;;  %s1795_s12 = scalar_lea.vmem %s1895_s3, %s1076_s23 }
  0x11   : > { %v1396_v4 = vld [vmem:[%s1622_s28] sm:$0xff]   ;;  %1309 = vmatprep.subr.bf16.mxu0 %v1392_v3  ;;  %1352 = vmatprep.subr.bf16.mxu1 %v1392_v3  ;;  %v1398_v10 = vld [vmem:[%s1622_s28 + $0x8] sm:$0xff]   ;;  %v1400_v12 = vld [vmem:[%s1622_s28 + $0x10] sm:$0xff]  }
  0x12   : > { %v1397_v5 = vld [vmem:[%s1622_s28 + $0x40] sm:$0xff]   ;;  %1317 = vmatprep.mubr.msk.bf16.mxu0 %vm400_vm0, %v1396_v4  ;;  %v1399_v11 = vld [vmem:[%s1622_s28 + $0x48] sm:$0xff]   ;;  %v1401_v13 = vld [vmem:[%s1622_s28 + $0x50] sm:$0xff]  }
  0x13   : > { %1333 = vmatprep.mubr.msk.bf16.mxu1 %vm400_vm0, %v1397_v5  ;;  %v1402_v14 = vld [vmem:[%s1622_s28 + $0x18] sm:$0xff]   ;;  %v1404_v16 = vld [vmem:[%s1622_s28 + $0x20] sm:$0xff]   ;;  %v1406_v18 = vld [vmem:[%s1622_s28 + $0x28] sm:$0xff]  }
  0x14   : > { %1310 = vmatpush3.bf16.msra.mxu0 %v1392_v3  ;;  %1359 = vmatpush3.bf16.msra.mxu1 %v1392_v3  ;;  %v1403_v15 = vld [vmem:[%s1622_s28 + $0x58] sm:$0xff]   ;;  %v1405_v17 = vld [vmem:[%s1622_s28 + $0x60] sm:$0xff]   ;;  %v1407_v19 = vld [vmem:[%s1622_s28 + $0x68] sm:$0xff]  }
  0x15   : > { %1311 = vmatprep.subr.bf16.mxu0 %v1393_v6  ;;  %1353 = vmatprep.subr.bf16.mxu1 %v1393_v6  ;;  %v1408_v20 = vld [vmem:[%s1622_s28 + $0x30] sm:$0xff]   ;;  %v1410_v22 = vld [vmem:[%s1622_s28 + $0x38] sm:$0xff]  }
  0x16   : > { %v1409_v21 = vld [vmem:[%s1622_s28 + $0x70] sm:$0xff]   ;;  %v1411_v23 = vld [vmem:[%s1622_s28 + $0x78] sm:$0xff]  }
  0x18   : > { %1312 = vmatpush3.bf16.msra.mxu0 %v1393_v6  ;;  %1360 = vmatpush3.bf16.msra.mxu1 %v1393_v6 }
  0x19   : > { %1313 = vmatprep.subr.bf16.mxu0 %v1394_v7  ;;  %1354 = vmatprep.subr.bf16.mxu1 %v1394_v7 }
  0x1c   : > { %1314 = vmatpush3.bf16.msra.mxu0 %v1394_v7  ;;  %1361 = vmatpush3.bf16.msra.mxu1 %v1394_v7 }
  0x1d   : > { %1363 = vmatprep.subr.msk.bf16.mxu0 %vm449_vm1, %v1395_v8  ;;  %1364 = vmatprep.subr.msk.bf16.mxu1 %vm449_vm1, %v1395_v8 }
  0x20   : > { %1316 = vmatpush3.bf16.msra.mxu0 %v451_v9  ;;  %1362 = vmatpush3.bf16.msra.mxu1 %v451_v9 }
  0x23   : > { %1318 = vmatmul.mubr.msk.bf16.vlgmr.msra.gmra.mrb[0].mxu0 %vm400_vm0, %v1398_v10  ;;  %1334 = vmatmul.mubr.msk.bf16.vlgmr.msra.gmra.mrb[0].mxu1 %vm400_vm0, %v1399_v11 }
  0x24   : > { %1321 = vmatprep.mubr.msk.bf16.mxu0 %vm400_vm0, %v1400_v12  ;;  %1337 = vmatprep.mubr.msk.bf16.mxu1 %vm400_vm0, %v1401_v13 }
  0x2b   : > { %1322 = vmatmul.mubr.msk.bf16.gmra.mrb[4].mxu0 %vm400_vm0, %v1402_v14  ;;  %1338 = vmatmul.mubr.msk.bf16.gmra.mrb[4].mxu1 %vm400_vm0, %v1403_v15 }
  0x2c   : > { %1325 = vmatprep.mubr.msk.bf16.mxu0 %vm400_vm0, %v1404_v16  ;;  %1341 = vmatprep.mubr.msk.bf16.mxu1 %vm400_vm0, %v1405_v17 }
  0x33   : > { %1326 = vmatmul.mubr.msk.bf16.gmra.mrb[8].mxu0 %vm400_vm0, %v1406_v18  ;;  %1342 = vmatmul.mubr.msk.bf16.gmra.mrb[8].mxu1 %vm400_vm0, %v1407_v19 }
  0x34   : > { %1329 = vmatprep.mubr.msk.bf16.mxu0 %vm400_vm0, %v1408_v20  ;;  %1345 = vmatprep.mubr.msk.bf16.mxu1 %vm400_vm0, %v1409_v21 }
  0x3b   : > { %1330 = vmatmul.mubr.msk.bf16.gmra.mrb[12].mxu0 %vm400_vm0, %v1410_v22  ;;  %1346 = vmatmul.mubr.msk.bf16.gmra.mrb[12].mxu1 %vm400_vm0, %v1411_v23 }
  0xf6   : > { %v1319_v25 = vpop.f32.mrb[0].mxu0  ;;  %v1335_v26 = vpop.f32.mrb[0].mxu1 }
  0xf7   : > { %v1671_v27 = vadd.f32 %v1319_v25, %v1668_v24  ;;  %v1674_v28 = vadd.f32 %v1335_v26, %v1668_v24  ;;  %v487_v29 = vpop.f32.mrb[1].mxu0  ;;  %v551_v30 = vpop.f32.mrb[1].mxu1 }
  0xf8   : > { %v1677_v31 = vadd.f32 %v1668_v24, %v487_v29  ;;  %v1680_v32 = vadd.f32 %v1668_v24, %v551_v30  ;;  %v1320_v33 = vpop.f32.mrb[2].mxu0  ;;  %v1336_v34 = vpop.f32.mrb[2].mxu1 }
  0xf9   : > { %v616_v35 = vsub.f32 0.0, %v1671_v27  ;;  %v632_v36 = vsub.f32 0.0, %v1674_v28  ;;  %v1685_v37 = vadd.f32 %v1320_v33, %v1668_v24  ;;  %v1688_v38 = vadd.f32 %v1336_v34, %v1668_v24  ;;  %v490_v39 = vpop.f32.mrb[3].mxu0  ;;  %v554_v40 = vpop.f32.mrb[3].mxu1 }
  0xfa   : > { %v614_v41 = vsub.f32 0.0, %v1677_v31  ;;  %v630_v42 = vsub.f32 0.0, %v1680_v32  ;;  %v1693_v43 = vadd.f32 %v1668_v24, %v490_v39  ;;  %v1696_v44 = vadd.f32 %v1668_v24, %v554_v40 }
  0xfb   : > { %v650_v45 = vmul.f32 1.442695, %v616_v35  ;;  %v682_v46 = vmul.f32 1.442695, %v632_v36  ;;  %v617_v47 = vsub.f32 0.0, %v1685_v37  ;;  %v633_v48 = vsub.f32 0.0, %v1688_v38 }
  0xfc   : > { %v646_v49 = vmul.f32 1.442695, %v614_v41  ;;  %v678_v50 = vmul.f32 1.442695, %v630_v42  ;;  %v615_v51 = vsub.f32 0.0, %v1693_v43  ;;  %v631_v52 = vsub.f32 0.0, %v1696_v44 }
  0xfd   : > { %1412 = vpow2.f32 %v650_v45  ;;  %v652_v53 = vmul.f32 1.442695, %v617_v47  ;;  %v684_v54 = vmul.f32 1.442695, %v633_v48 }
  0xfe   : > { %1414 = vpow2.f32 %v682_v46  ;;  %v1323_v55 = vpop.f32.mrb[4].mxu0  ;;  %v1339_v56 = vpop.f32.mrb[4].mxu1  ;;  %v648_v57 = vmul.f32 1.442695, %v615_v51  ;;  %v680_v62 = vmul.f32 1.442695, %v631_v52 }
  0xff   : > { %1416 = vpow2.f32 %v646_v49  ;;  %v1703_v58 = vadd.f32 %v1323_v55, %v1668_v24  ;;  %v1706_v59 = vadd.f32 %v1339_v56, %v1668_v24  ;;  %v503_v60 = vpop.f32.mrb[5].mxu0  ;;  %v567_v61 = vpop.f32.mrb[5].mxu1 }
 0x100   : > { %1418 = vpow2.f32 %v678_v50  ;;  %v1709_v63 = vadd.f32 %v1668_v24, %v503_v60  ;;  %v1712_v0 = vadd.f32 %v1668_v24, %v567_v61  ;;  %v1324_v1 = vpop.f32.mrb[6].mxu0  ;;  %v1340_v2 = vpop.f32.mrb[6].mxu1 }
 0x101   : > { %1420 = vpow2.f32 %v652_v53  ;;  %v620_v3 = vsub.f32 0.0, %v1703_v58  ;;  %v636_v4 = vsub.f32 0.0, %v1706_v59  ;;  %v1717_v5 = vadd.f32 %v1324_v1, %v1668_v24  ;;  %v506_v6 = vpop.f32.mrb[7].mxu0  ;;  %v570_v7 = vpop.f32.mrb[7].mxu1 }
 0x102   : > { %1422 = vpow2.f32 %v684_v54  ;;  %v618_v8 = vsub.f32 0.0, %v1709_v63  ;;  %v634_v9 = vsub.f32 0.0, %v1712_v0  ;;  %v1722_v10 = vadd.f32 %v1340_v2, %v1668_v24 }
 0x103   : > { %1424 = vpow2.f32 %v648_v57  ;;  %v658_v11 = vmul.f32 1.442695, %v620_v3  ;;  %v690_v12 = vmul.f32 1.442695, %v636_v4  ;;  %v621_v13 = vsub.f32 0.0, %v1717_v5 }
 0x104   : > { %1426 = vpow2.f32 %v680_v62  ;;  %v654_v14 = vmul.f32 1.442695, %v618_v8  ;;  %v686_v15 = vmul.f32 1.442695, %v634_v9  ;;  %v637_v20 = vsub.f32 0.0, %v1722_v10 }
 0x105   : > { %1428 = vpow2.f32 %v658_v11  ;;  %v660_v16 = vmul.f32 1.442695, %v621_v13  ;;  %v1727_v26 = vadd.f32 %v1668_v24, %v506_v6  ;;  %v1730_v29 = vadd.f32 %v1668_v24, %v570_v7 }
 0x106   : > { %1430 = vpow2.f32 %v690_v12  ;;  %v1327_v17 = vpop.f32.mrb[8].mxu0  ;;  %v1343_v18 = vpop.f32.mrb[8].mxu1  ;;  %v1732_v46 = vmul.f32 1.442695, %v637_v20 }
 0x107   : > { %v1413_v19 = vpop.eup %1412  ;;  %1432 = vpow2.f32 %v654_v14  ;;  %v519_v21 = vpop.f32.mrb[9].mxu0  ;;  %v619_v49 = vsub.f32 0.0, %v1727_v26  ;;  %v635_v50 = vsub.f32 0.0, %v1730_v29  ;;  %v1737_v53 = vadd.f32 %v1327_v17, %v1668_v24 }
 0x108   : > { %v583_v22 = vpop.f32.mrb[9].mxu1  ;;  %v1415_v23 = vpop.eup %1414  ;;  %v712_v25 = vadd.f32 1.0, %v1413_v19  ;;  %1434 = vpow2.f32 %v686_v15  ;;  %v1740_v54 = vadd.f32 %v1343_v18, %v1668_v24  ;;  %v1743_v57 = vadd.f32 %v1668_v24, %v519_v21 }
 0x109   : > { %v1328_v30 = vpop.f32.mrb[10].mxu0  ;;  %v1344_v33 = vpop.f32.mrb[10].mxu1  ;;  %v728_v35 = vadd.f32 1.0, %v1415_v23  ;;  %1436 = vpow2.f32 %v660_v16  ;;  %v1746_v60 = vadd.f32 %v1668_v24, %v583_v22  ;;  %v656_v11 = vmul.f32 1.442695, %v619_v49 }
 0x10a   : > { %v1417_v34 = vpop.eup %1416  ;;  %v522_v36 = vpop.f32.mrb[11].mxu0  ;;  %1438 = vrcp.f32 %v712_v25  ;;  %v1749_v3 = vadd.f32 %v1328_v30, %v1668_v24  ;;  %v1752_v4 = vadd.f32 %v1344_v33, %v1668_v24  ;;  %v624_v17 = vsub.f32 0.0, %v1737_v53 }
 0x10b   : > { %v1419_v39 = vpop.eup %1418  ;;  %v710_v40 = vadd.f32 1.0, %v1417_v34  ;;  %v586_v41 = vpop.f32.mrb[11].mxu1  ;;  %1440 = vrcp.f32 %v728_v35  ;;  %v1759_v12 = vadd.f32 %v1668_v24, %v522_v36  ;;  %v640_v18 = vsub.f32 0.0, %v1740_v54 }
 0x10c   : > { %v1421_v42 = vpop.eup %1420  ;;  %v726_v45 = vadd.f32 1.0, %v1419_v39  ;;  %v622_v23 = vsub.f32 0.0, %v1743_v57  ;;  %v638_v25 = vsub.f32 0.0, %v1746_v60  ;;  %v625_v34 = vsub.f32 0.0, %v1749_v3 }
 0x10d   : > { %v1423_v47 = vpop.eup %1422  ;;  %1442 = vrcp.f32 %v710_v40  ;;  %v713_v48 = vadd.f32 1.0, %v1421_v42  ;;  %v641_v35 = vsub.f32 0.0, %v1752_v4  ;;  %v623_v40 = vsub.f32 0.0, %v1759_v12 }
 0x10e   : > { %v1425_v51 = vpop.eup %1424  ;;  %1444 = vrcp.f32 %v726_v45  ;;  %v729_v52 = vadd.f32 1.0, %v1423_v47  ;;  %v1331_v61 = vpop.f32.mrb[12].mxu0  ;;  %v1777_v42 = vadd.f32 %v1668_v24, %v586_v41  ;;  %v688_v47 = vmul.f32 1.442695, %v635_v50 }
 0x10f   : > { %v1427_v55 = vpop.eup %1426  ;;  %1446 = vrcp.f32 %v713_v48  ;;  %v711_v56 = vadd.f32 1.0, %v1425_v51  ;;  %v1347_v62 = vpop.f32.mrb[12].mxu1  ;;  %v666_v48 = vmul.f32 1.442695, %v624_v17  ;;  %v698_v51 = vmul.f32 1.442695, %v640_v18 }
 0x110   : > { %v1429_v1 = vpop.eup %1428  ;;  %1448 = vrcp.f32 %v729_v52  ;;  %v727_v2 = vadd.f32 1.0, %v1427_v55  ;;  %v1754_v6 = vpop.f32.mrb[13].mxu0  ;;  %v1780_v52 = vadd.f32 %v1331_v61, %v1668_v24  ;;  %v1783_v55 = vadd.f32 %v1347_v62, %v1668_v24 }
 0x111   : > { %v1756_v7 = vpop.f32.mrb[13].mxu1  ;;  %v1431_v8 = vpop.eup %1430  ;;  %1450 = vrcp.f32 %v711_v56  ;;  %v716_v9 = vadd.f32 1.0, %v1429_v1  ;;  %v662_v1 = vmul.f32 1.442695, %v622_v23  ;;  %v694_v41 = vmul.f32 1.442695, %v638_v25 }
 0x112   : > { %v1761_v13 = vpop.f32.mrb[14].mxu0  ;;  %v1763_v14 = vpop.f32.mrb[14].mxu1  ;;  %1452 = vrcp.f32 %v727_v2  ;;  %v732_v16 = vadd.f32 1.0, %v1431_v8  ;;  %v668_v2 = vmul.f32 1.442695, %v625_v34 }
 0x113   : > { %v1433_v15 = vpop.eup %1432  ;;  %v1767_v19 = vpop.f32.mrb[15].mxu0  ;;  %1454 = vrcp.f32 %v716_v9  ;;  %v700_v50 = vmul.f32 1.442695, %v641_v35  ;;  %v664_v9 = vmul.f32 1.442695, %v623_v40 }
 0x114   : > { %v1769_v20 = vpop.f32.mrb[15].mxu1  ;;  %v1435_v21 = vpop.eup %1434  ;;  %v714_v22 = vadd.f32 1.0, %v1433_v15  ;;  %1456 = vrcp.f32 %v732_v16  ;;  %v639_v15 = vsub.f32 0.0, %v1777_v42 }
 0x115   : > { %v1437_v30 = vpop.eup %1436  ;;  %v730_v33 = vadd.f32 1.0, %v1435_v21 }
 0x116   : > { %v1439_v36 = vpop.eup %1438  ;;  %1458 = vrcp.f32 %v714_v22  ;;  %v717_v39 = vadd.f32 1.0, %v1437_v30  ;;  %v696_v35 = vmul.f32 1.442695, %v639_v15  ;;  %v1823_v15 = vadd.f32 %v1668_v24, %v1756_v7 }
 0x117   : > { %v1441_v45 = vpop.eup %1440  ;;  %1460 = vrcp.f32 %v730_v33  ;;  %v776_v61 = vmul.f32 %v1439_v36, %v1671_v27  ;;  %v644_v27 = vsub.f32 0.0, %v1783_v55 }
 0x118   : > { %v1443_v49 = vpop.eup %1442  ;;  %1462 = vrcp.f32 %v717_v39  ;;  %v792_v17 = vmul.f32 %v1441_v45, %v1674_v28 }
 0x119   : > { %v1445_v56 = vpop.eup %1444  ;;  %1464 = vpow2.f32 %v1732_v46  ;;  %v774_v28 = vmul.f32 %v1443_v49, %v1677_v31 }
 0x11a   : > { %v1447_v8 = vpop.eup %1446  ;;  %1466 = vpow2.f32 %v656_v11  ;;  %v628_v11 = vsub.f32 0.0, %v1780_v52  ;;  %v790_v25 = vmul.f32 %v1445_v56, %v1680_v32  ;;  %v706_v32 = vmul.f32 1.442695, %v644_v27 }
 0x11b   : > { %v1449_v16 = vpop.eup %1448  ;;  %v777_v62 = vmul.f32 %v1447_v8, %v1685_v37  ;;  %1468 = vpow2.f32 %v688_v47  ;;  %v1836_v27 = vadd.f32 %v1668_v24, %v1767_v19 }
 0x11c   : > { %v1451_v18 = vpop.eup %1450  ;;  %v793_v46 = vmul.f32 %v1449_v16, %v1688_v38  ;;  %1470 = vpow2.f32 %v666_v48  ;;  %v674_v36 = vmul.f32 1.442695, %v628_v11 }
 0x11d   : > { %v1453_v21 = vpop.eup %1452  ;;  %v1193_v37 = vpack.c.bf16 %v777_v62, %v776_v61  ;;  %v775_v22 = vmul.f32 %v1451_v18, %v1693_v43  ;;  %1472 = vpow2.f32 %v698_v51 }
 0x11e   : > { %v1455_v23 = vpop.eup %1454  ;;  %v1233_v30 = vpack.c.bf16 %v793_v46, %v792_v17  ;;  %v791_v38 = vmul.f32 %v1453_v21, %v1696_v44  ;;  %1474 = vpow2.f32 %v662_v1  ;;  %v1827_v17 = vadd.f32 %v1761_v13, %v1668_v24 }
 0x11f   : > { %v1804_v33 = vpop.eup %1456  ;;  %1265 = vst [vmem:[%s1795_s12 + $0x8] sm:$0xff] %v1193_v37   ;;  %v1188_v34 = vpack.c.bf16 %v775_v22, %v774_v28  ;;  %1476 = vpow2.f32 %v694_v41  ;;  %v780_v45 = vmul.f32 %v1455_v23, %v1703_v58  ;;  %v1819_v58 = vadd.f32 %v1668_v24, %v1754_v6 }
 0x120   : > { %v1807_v31 = vpop.eup %1458  ;;  %1273 = vst [vmem:[%s1795_s12 + $0x48] sm:$0xff] %v1233_v30   ;;  %v1228_v43 = vpack.c.bf16 %v791_v38, %v790_v25  ;;  %1478 = vpow2.f32 %v668_v2  ;;  %v1831_v6 = vadd.f32 %v1763_v14, %v1668_v24  ;;  %v642_v28 = vsub.f32 0.0, %v1823_v15 }
 0x121   : > { %v1810_v39 = vpop.eup %1460  ;;  %1189 = vst [vmem:[%s1795_s12] sm:$0xff] %v1188_v34   ;;  %1480 = vpow2.f32 %v700_v50  ;;  %v626_v7 = vsub.f32 0.0, %v1819_v58  ;;  %v1841_v37 = vadd.f32 %v1668_v24, %v1769_v20  ;;  %v629_v23 = vsub.f32 0.0, %v1827_v17 }
 0x122   : > { %v1463_v44 = vpop.eup %1462  ;;  %1272 = vst [vmem:[%s1795_s12 + $0x40] sm:$0xff] %v1228_v43   ;;  %1482 = vpow2.f32 %v664_v9  ;;  %v645_v19 = vsub.f32 0.0, %v1831_v6 }
 0x123   : > { %v1465_v40 = vpop.eup %1464  ;;  %v781_v47 = vmul.f32 %v1463_v44, %v1717_v5  ;;  %1484 = vpow2.f32 %v696_v35  ;;  %v670_v34 = vmul.f32 1.442695, %v626_v7  ;;  %v627_v35 = vsub.f32 0.0, %v1836_v27 }
 0x124   : > { %v1467_v48 = vpop.eup %1466  ;;  %v733_v49 = vadd.f32 1.0, %v1465_v40  ;;  %1486 = vpow2.f32 %v674_v36  ;;  %v702_v36 = vmul.f32 1.442695, %v642_v28  ;;  %v643_v24 = vsub.f32 0.0, %v1841_v37 }
 0x125   : > { %v1469_v51 = vpop.eup %1468  ;;  %v1203_v56 = vpack.c.bf16 %v781_v47, %v780_v45  ;;  %v715_v1 = vadd.f32 1.0, %v1467_v48  ;;  %1488 = vpow2.f32 %v706_v32  ;;  %v796_v32 = vmul.f32 %v1804_v33, %v1706_v59 }
 0x126   : > { %v1471_v41 = vpop.eup %1470  ;;  %1490 = vrcp.f32 %v733_v49  ;;  %v731_v2 = vadd.f32 1.0, %v1469_v51  ;;  %v676_v40 = vmul.f32 1.442695, %v629_v23  ;;  %v778_v47 = vmul.f32 %v1807_v31, %v1709_v63 }
 0x127   : > { %v1473_v8 = vpop.eup %1472  ;;  %1267 = vst [vmem:[%s1795_s12 + $0x18] sm:$0xff] %v1203_v56   ;;  %1492 = vrcp.f32 %v715_v1  ;;  %v720_v50 = vadd.f32 1.0, %v1471_v41  ;;  %v794_v48 = vmul.f32 %v1810_v39, %v1712_v0  ;;  %v708_v51 = vmul.f32 1.442695, %v645_v19 }
 0x128   : > { %v1475_v5 = vpop.eup %1474  ;;  %1494 = vrcp.f32 %v731_v2  ;;  %v736_v9 = vadd.f32 1.0, %v1473_v8  ;;  %v704_v2 = vmul.f32 1.442695, %v643_v24 }
 0x129   : > { %v1477_v16 = vpop.eup %1476  ;;  %1496 = vrcp.f32 %v720_v50  ;;  %v718_v61 = vadd.f32 1.0, %v1475_v5 }
 0x12a   : > { %v1479_v62 = vpop.eup %1478  ;;  %1498 = vrcp.f32 %v736_v9  ;;  %v734_v18 = vadd.f32 1.0, %v1477_v16 }
 0x12b   : > { %v1481_v46 = vpop.eup %1480  ;;  %1500 = vrcp.f32 %v718_v61  ;;  %v721_v11 = vadd.f32 1.0, %v1479_v62 }
 0x12c   : > { %v1483_v21 = vpop.eup %1482  ;;  %1502 = vrcp.f32 %v734_v18  ;;  %v737_v13 = vadd.f32 1.0, %v1481_v46 }
 0x12d   : > { %v1485_v14 = vpop.eup %1484  ;;  %1504 = vrcp.f32 %v721_v11  ;;  %v719_v22 = vadd.f32 1.0, %v1483_v21 }
 0x12e   : > { %v1487_v25 = vpop.eup %1486  ;;  %1506 = vrcp.f32 %v737_v13  ;;  %v735_v30 = vadd.f32 1.0, %v1485_v14 }
 0x12f   : > { %v1489_v38 = vpop.eup %1488  ;;  %1508 = vrcp.f32 %v719_v22  ;;  %v724_v46 = vadd.f32 1.0, %v1487_v25 }
 0x130   : > { %v1491_v43 = vpop.eup %1490  ;;  %1510 = vrcp.f32 %v735_v30  ;;  %v740_v7 = vadd.f32 1.0, %v1489_v38 }
 0x131   : > { %v1493_v20 = vpop.eup %1492  ;;  %v797_v44 = vmul.f32 %v1491_v43, %v1722_v10  ;;  %1512 = vpow2.f32 %v670_v34  ;;  %v672_v10 = vmul.f32 1.442695, %v627_v35 }
 0x132   : > { %v1495_v45 = vpop.eup %1494  ;;  %v779_v49 = vmul.f32 %v1493_v20, %v1727_v26  ;;  %1514 = vpow2.f32 %v702_v36 }
 0x133   : > { %v1497_v56 = vpop.eup %1496  ;;  %v1243_v1 = vpack.c.bf16 %v797_v44, %v796_v32  ;;  %v795_v59 = vmul.f32 %v1495_v45, %v1730_v29  ;;  %1516 = vpow2.f32 %v676_v40 }
 0x134   : > { %v1499_v33 = vpop.eup %1498  ;;  %v1198_v41 = vpack.c.bf16 %v779_v49, %v778_v47  ;;  %1518 = vpow2.f32 %v708_v51  ;;  %v784_v29 = vmul.f32 %v1497_v56, %v1737_v53 }
 0x135   : > { %v1501_v8 = vpop.eup %1500  ;;  %1275 = vst [vmem:[%s1795_s12 + $0x58] sm:$0xff] %v1243_v1   ;;  %v1238_v63 = vpack.c.bf16 %v795_v59, %v794_v48  ;;  %1520 = vpow2.f32 %v672_v10  ;;  %v800_v5 = vmul.f32 %v1499_v33, %v1740_v54 }
 0x136   : > { %v1503_v0 = vpop.eup %1502  ;;  %1266 = vst [vmem:[%s1795_s12 + $0x10] sm:$0xff] %v1198_v41   ;;  %1522 = vpow2.f32 %v704_v2  ;;  %v782_v61 = vmul.f32 %v1501_v8, %v1743_v57 }
 0x137   : > { %v1505_v26 = vpop.eup %1504  ;;  %1274 = vst [vmem:[%s1795_s12 + $0x50] sm:$0xff] %v1238_v63   ;;  %v798_v53 = vmul.f32 %v1503_v0, %v1746_v60  ;;  %1524 = vrcp.f32 %v724_v46 }
 0x138   : > { %v1507_v31 = vpop.eup %1506  ;;  %v785_v39 = vmul.f32 %v1505_v26, %v1749_v3  ;;  %1526 = vrcp.f32 %v740_v7 }
 0x139   : > { %v1509_v50 = vpop.eup %1508  ;;  %v801_v9 = vmul.f32 %v1507_v31, %v1752_v4 }
 0x13a   : > { %v1511_v16 = vpop.eup %1510  ;;  %v1213_v62 = vpack.c.bf16 %v785_v39, %v784_v29  ;;  %v783_v18 = vmul.f32 %v1509_v50, %v1759_v12 }
 0x13b   : > { %v1253_v11 = vpack.c.bf16 %v801_v9, %v800_v5  ;;  %v799_v3 = vmul.f32 %v1511_v16, %v1777_v42  ;;  %v1513_v54 = vpop.eup %1512 }
 0x13c   : > { %1269 = vst [vmem:[%s1795_s12 + $0x28] sm:$0xff] %v1213_v62   ;;  %v1208_v21 = vpack.c.bf16 %v783_v18, %v782_v61  ;;  %v1515_v13 = vpop.eup %1514  ;;  %v722_v57 = vadd.f32 1.0, %v1513_v54 }
 0x13d   : > { %1277 = vst [vmem:[%s1795_s12 + $0x68] sm:$0xff] %v1253_v11   ;;  %v1248_v4 = vpack.c.bf16 %v799_v3, %v798_v53  ;;  %v1517_v28 = vpop.eup %1516  ;;  %v738_v12 = vadd.f32 1.0, %v1515_v13 }
 0x13e   : > { %1268 = vst [vmem:[%s1795_s12 + $0x20] sm:$0xff] %v1208_v21   ;;  %v1519_v14 = vpop.eup %1518  ;;  %1528 = vrcp.f32 %v722_v57  ;;  %v725_v60 = vadd.f32 1.0, %v1517_v28 }
 0x13f   : > { %1276 = vst [vmem:[%s1795_s12 + $0x60] sm:$0xff] %v1248_v4   ;;  %v1521_v22 = vpop.eup %1520  ;;  %1530 = vrcp.f32 %v738_v12  ;;  %v741_v42 = vadd.f32 1.0, %v1519_v14 }
 0x140   : > { %v1523_v23 = vpop.eup %1522  ;;  %1532 = vrcp.f32 %v725_v60  ;;  %v723_v25 = vadd.f32 1.0, %v1521_v22 }
 0x141   : > { %1534 = vrcp.f32 %v741_v42  ;;  %v739_v30 = vadd.f32 1.0, %v1523_v23  ;;  %v1525_v19 = vpop.eup %1524 }
 0x142   : > { %1536 = vrcp.f32 %v723_v25  ;;  %v1527_v38 = vpop.eup %1526  ;;  %v788_v24 = vmul.f32 %v1525_v19, %v1780_v52 }
 0x143   : > { %1538 = vrcp.f32 %v739_v30  ;;  %v804_v44 = vmul.f32 %v1527_v38, %v1783_v55 }
 0x148   : > { %v1529_v34 = vpop.eup %1528 }
 0x149   : > { %v1531_v35 = vpop.eup %1530  ;;  %v786_v47 = vmul.f32 %v1529_v34, %v1819_v58 }
 0x14a   : > { %v1533_v43 = vpop.eup %1532  ;;  %v802_v51 = vmul.f32 %v1531_v35, %v1823_v15 }
 0x14b   : > { %v1535_v36 = vpop.eup %1534  ;;  %v789_v20 = vmul.f32 %v1533_v43, %v1827_v17 }
 0x14c   : > { %v1537_v32 = vpop.eup %1536  ;;  %v805_v40 = vmul.f32 %v1535_v36, %v1831_v6 }
 0x14d   : > { %v1539_v45 = vpop.eup %1538  ;;  %v1223_v48 = vpack.c.bf16 %v789_v20, %v788_v24  ;;  %v787_v49 = vmul.f32 %v1537_v32, %v1836_v27 }
 0x14e   : > { %v1263_v56 = vpack.c.bf16 %v805_v40, %v804_v44  ;;  %v803_v52 = vmul.f32 %v1539_v45, %v1841_v37 }
 0x14f   : > { %1271 = vst [vmem:[%s1795_s12 + $0x38] sm:$0xff] %v1223_v48   ;;  %v1218_v1 = vpack.c.bf16 %v787_v49, %v786_v47 }
 0x150   : > { %1279 = vst [vmem:[%s1795_s12 + $0x78] sm:$0xff] %v1263_v56   ;;  %v1258_v17 = vpack.c.bf16 %v803_v52, %v802_v51 }
 0x151   : > { %1270 = vst [vmem:[%s1795_s12 + $0x30] sm:$0xff] %v1218_v1  }
 0x152   : > { %1278 = vst [vmem:[%s1795_s12 + $0x70] sm:$0xff] %v1258_v17  }
 0x153 PF: > { %s13_s14 = sadd.s32 1, %s1562_s14   ;;  %s1896_s12 = smov %s1558_s13 }
 0x154   : > { %p10_p5 = scmp.ge.s32.totalorder %s13_s14, 4   ;;  %s1897_s13 = smov %s1899_s15 }
 0x156   :  { %12 = sbr.rel (!%p10_p5) target bundleno = 2 (0x2), region = 68 }

// kernel: _lambda_.48
= control target key start
LH: loop header
LB: loop body
LE: loop exit
PB: predicated region body
PF: predicated region fallthrough
CT: control target
= control target key end

     0   :  { %v713_v0 = vmov 0   ;;  %vm182_vm0 = vcmask 130048   ;;  %s926_s1 = inlined_call_operand.vmem [shape: bf16[144,128], index: 1, kind: input, shape index: {}]   ;;  %s927_s0 = inlined_call_operand.vmem [shape: bf16[128,144], index: 0, kind: input, shape index: {}]   ;;  %s928_s2 = inlined_call_operand.vmem [shape: f32[1,128], index: 2, kind: input, shape index: {}]   ;;  %s929_s3 = inlined_call_operand.vmem [shape: bf16[128,128], index: 3, kind: output, shape index: {}]  }
   0x1   :  { %207 = vmatprep.subr.bf16.mxu0 %v713_v0  ;;  %597 = vmatprep.subr.bf16.mxu1 %v713_v0  ;;  %v616_v1 = vld [vmem:[%s926_s1] sm:$0xff]   ;;  %v617_v2 = vld [vmem:[%s926_s1 + $0x8] sm:$0xff]   ;;  %v618_v3 = vld [vmem:[%s926_s1 + $0x10] sm:$0xff]  }
   0x2   :  { %208 = vmatpush1.bf16.msra.mxu0 %v616_v1  ;;  %606 = vmatpush1.bf16.msra.mxu1 %v616_v1  ;;  %v619_v4 = vld [vmem:[%s926_s1 + $0x18] sm:$0xff]   ;;  %v627_v5 = vld [vmem:[%s927_s0 + $0x4] ss:$8 sps:$4 sm:$0xff]   ;;  %v622_v9 = vld [vmem:[%s926_s1 + $0x30] sm:$0xff]  }
   0x3   :  { %209 = vmatprep.subr.bf16.mxu0 %v713_v0  ;;  %598 = vmatprep.subr.bf16.mxu1 %v713_v0  ;;  %v630_v6 = vld [vmem:[%s927_s0 + $0x44] ss:$8 sps:$4 sm:$0xff]   ;;  %v623_v10 = vld [vmem:[%s926_s1 + $0x38] sm:$0xff]   ;;  %v625_v12 = vld [vmem:[%s927_s0] ss:$8 sps:$4 sm:$0xff]  }
   0x4   :  { %510 = vmatprep.mubr.msk.bf16.mxu0 %vm182_vm0, %v627_v5  ;;  %514 = vmatprep.mubr.msk.bf16.mxu1 %vm182_vm0, %v630_v6  ;;  %v620_v7 = vld [vmem:[%s926_s1 + $0x20] sm:$0xff]   ;;  %v621_v8 = vld [vmem:[%s926_s1 + $0x28] sm:$0xff]   ;;  %v631_v14 = vld [vmem:[%s927_s0 + $0x14] ss:$8 sps:$4 sm:$0xff]  }
   0x5   :  { %v624_v11 = vld [vmem:[%s926_s1 + $0x40] sm:$0xff]   ;;  %v633_v15 = vld [vmem:[%s927_s0 + $0x54] ss:$8 sps:$4 sm:$0xff]   ;;  %v635_v16 = vld [vmem:[%s927_s0 + $0x10] ss:$8 sps:$4 sm:$0xff]  }
   0x6   :  { %210 = vmatpush1.bf16.msra.mxu0 %v617_v2  ;;  %607 = vmatpush1.bf16.msra.mxu1 %v617_v2  ;;  %v628_v13 = vld [vmem:[%s927_s0 + $0x40] ss:$8 sps:$4 sm:$0xff]   ;;  %v636_v17 = vld [vmem:[%s927_s0 + $0x50] ss:$8 sps:$4 sm:$0xff]   ;;  %v637_v18 = vld [vmem:[%s927_s0 + $0x24] ss:$8 sps:$4 sm:$0xff]  }
   0x7   :  { %211 = vmatprep.subr.bf16.mxu0 %v713_v0  ;;  %599 = vmatprep.subr.bf16.mxu1 %v713_v0  ;;  %v639_v19 = vld [vmem:[%s927_s0 + $0x64] ss:$8 sps:$4 sm:$0xff]   ;;  %v641_v20 = vld [vmem:[%s927_s0 + $0x20] ss:$8 sps:$4 sm:$0xff]   ;;  %v643_v22 = vld [vmem:[%s927_s0 + $0x34] ss:$8 sps:$4 sm:$0xff]  }
   0x8   :  { %v642_v21 = vld [vmem:[%s927_s0 + $0x60] ss:$8 sps:$4 sm:$0xff]   ;;  %v645_v23 = vld [vmem:[%s927_s0 + $0x74] ss:$8 sps:$4 sm:$0xff]   ;;  %v647_v24 = vld [vmem:[%s927_s0 + $0x30] ss:$8 sps:$4 sm:$0xff]  }
   0x9   :  { %v648_v25 = vld [vmem:[%s927_s0 + $0x70] ss:$8 sps:$4 sm:$0xff]   ;;  %v820_v26 = vld [vmem:[%s928_s2] ss:$0 sm:$0xff] }
   0xa   :  { %212 = vmatpush1.bf16.msra.mxu0 %v618_v3  ;;  %608 = vmatpush1.bf16.msra.mxu1 %v618_v3 }
   0xb   :  { %213 = vmatprep.subr.bf16.mxu0 %v713_v0  ;;  %600 = vmatprep.subr.bf16.mxu1 %v713_v0 }
   0xe   :  { %214 = vmatpush1.bf16.msra.mxu0 %v619_v4  ;;  %609 = vmatpush1.bf16.msra.mxu1 %v619_v4 }
   0xf   :  { %215 = vmatprep.subr.bf16.mxu0 %v713_v0  ;;  %601 = vmatprep.subr.bf16.mxu1 %v713_v0 }
  0x12   :  { %216 = vmatpush1.bf16.msra.mxu0 %v620_v7  ;;  %610 = vmatpush1.bf16.msra.mxu1 %v620_v7 }
  0x13   :  { %217 = vmatprep.subr.bf16.mxu0 %v713_v0  ;;  %602 = vmatprep.subr.bf16.mxu1 %v713_v0 }
  0x16   :  { %218 = vmatpush1.bf16.msra.mxu0 %v621_v8  ;;  %611 = vmatpush1.bf16.msra.mxu1 %v621_v8 }
  0x17   :  { %219 = vmatprep.subr.bf16.mxu0 %v713_v0  ;;  %603 = vmatprep.subr.bf16.mxu1 %v713_v0 }
  0x1a   :  { %220 = vmatpush1.bf16.msra.mxu0 %v622_v9  ;;  %612 = vmatpush1.bf16.msra.mxu1 %v622_v9 }
  0x1b   :  { %221 = vmatprep.subr.bf16.mxu0 %v713_v0  ;;  %604 = vmatprep.subr.bf16.mxu1 %v713_v0 }
  0x1e   :  { %222 = vmatpush1.bf16.msra.mxu0 %v623_v10  ;;  %613 = vmatpush1.bf16.msra.mxu1 %v623_v10 }
  0x1f   :  { %223 = vmatprep.subr.bf16.mxu0 %v713_v0  ;;  %605 = vmatprep.subr.bf16.mxu1 %v713_v0 }
  0x22   :  { %224 = vmatpush1.bf16.msra.mxu0 %v624_v11  ;;  %614 = vmatpush1.bf16.msra.mxu1 %v624_v11 }
  0x25   :  { %240 = vmatmul.mubr.bf16.vlgmr.msra.gmra.mrb[0].mxu0 %v625_v12  ;;  %272 = vmatmul.mubr.bf16.vlgmr.msra.gmra.mrb[0].mxu1 %v628_v13 }
  0x26   :  { %511 = vmatprep.mubr.msk.bf16.mxu0 %vm182_vm0, %v631_v14  ;;  %515 = vmatprep.mubr.msk.bf16.mxu1 %vm182_vm0, %v633_v15 }
  0x2d   :  { %248 = vmatmul.mubr.bf16.gmra.mrb[4].mxu0 %v635_v16  ;;  %280 = vmatmul.mubr.bf16.gmra.mrb[4].mxu1 %v636_v17 }
  0x2e   :  { %512 = vmatprep.mubr.msk.bf16.mxu0 %vm182_vm0, %v637_v18  ;;  %516 = vmatprep.mubr.msk.bf16.mxu1 %vm182_vm0, %v639_v19 }
  0x35   :  { %256 = vmatmul.mubr.bf16.gmra.mrb[8].mxu0 %v641_v20  ;;  %288 = vmatmul.mubr.bf16.gmra.mrb[8].mxu1 %v642_v21 }
  0x36   :  { %513 = vmatprep.mubr.msk.bf16.mxu0 %vm182_vm0, %v643_v22  ;;  %517 = vmatprep.mubr.msk.bf16.mxu1 %vm182_vm0, %v645_v23 }
  0x3d   :  { %264 = vmatmul.mubr.bf16.gmra.mrb[12].mxu0 %v647_v24  ;;  %296 = vmatmul.mubr.bf16.gmra.mrb[12].mxu1 %v648_v25 }
  0xf8   :  { %v241_v27 = vpop.f32.mrb[0].mxu0  ;;  %v273_v28 = vpop.f32.mrb[0].mxu1 }
  0xf9   :  { %v823_v29 = vadd.f32 %v820_v26, %v241_v27  ;;  %v826_v30 = vadd.f32 %v820_v26, %v273_v28  ;;  %v243_v31 = vpop.f32.mrb[1].mxu0  ;;  %v275_v32 = vpop.f32.mrb[1].mxu1 }
  0xfa   :  { %v244_v33 = vpop.f32.mrb[2].mxu0  ;;  %v276_v34 = vpop.f32.mrb[2].mxu1 }
  0xfb   :  { %v304_v35 = vsub.f32 0.0, %v823_v29  ;;  %v312_v36 = vsub.f32 0.0, %v826_v30  ;;  %v831_v37 = vadd.f32 %v820_v26, %v244_v33  ;;  %v834_v38 = vadd.f32 %v820_v26, %v276_v34  ;;  %v246_v39 = vpop.f32.mrb[3].mxu0  ;;  %v278_v40 = vpop.f32.mrb[3].mxu1 }
  0xfd   :  { %v320_v41 = vmul.f32 1.442695, %v304_v35  ;;  %v336_v42 = vmul.f32 1.442695, %v312_v36  ;;  %v305_v43 = vsub.f32 0.0, %v831_v37  ;;  %v313_v44 = vsub.f32 0.0, %v834_v38 }
  0xff   :  { %649 = vpow2.f32 %v320_v41  ;;  %v322_v45 = vmul.f32 1.442695, %v305_v43  ;;  %v338_v46 = vmul.f32 1.442695, %v313_v44 }
 0x100   :  { %651 = vpow2.f32 %v336_v42  ;;  %v249_v47 = vpop.f32.mrb[4].mxu0  ;;  %v281_v48 = vpop.f32.mrb[4].mxu1 }
 0x101   :  { %653 = vpow2.f32 %v322_v45  ;;  %v839_v49 = vadd.f32 %v820_v26, %v249_v47  ;;  %v842_v50 = vadd.f32 %v820_v26, %v281_v48  ;;  %v251_v51 = vpop.f32.mrb[5].mxu0  ;;  %v283_v52 = vpop.f32.mrb[5].mxu1 }
 0x102   :  { %655 = vpow2.f32 %v338_v46  ;;  %v252_v53 = vpop.f32.mrb[6].mxu0  ;;  %v284_v54 = vpop.f32.mrb[6].mxu1 }
 0x103   :  { %v306_v55 = vsub.f32 0.0, %v839_v49  ;;  %v314_v56 = vsub.f32 0.0, %v842_v50  ;;  %v847_v57 = vadd.f32 %v820_v26, %v252_v53  ;;  %v850_v58 = vadd.f32 %v820_v26, %v284_v54  ;;  %v254_v59 = vpop.f32.mrb[7].mxu0  ;;  %v286_v60 = vpop.f32.mrb[7].mxu1 }
 0x105   :  { %v324_v61 = vmul.f32 1.442695, %v306_v55  ;;  %v340_v62 = vmul.f32 1.442695, %v314_v56  ;;  %v307_v63 = vsub.f32 0.0, %v847_v57  ;;  %v315_v0 = vsub.f32 0.0, %v850_v58 }
 0x107   :  { %657 = vpow2.f32 %v324_v61  ;;  %v326_v1 = vmul.f32 1.442695, %v307_v63  ;;  %v342_v2 = vmul.f32 1.442695, %v315_v0 }
 0x108   :  { %659 = vpow2.f32 %v340_v62  ;;  %v257_v3 = vpop.f32.mrb[8].mxu0  ;;  %v289_v4 = vpop.f32.mrb[8].mxu1 }
 0x109   :  { %v650_v5 = vpop.eup %649  ;;  %661 = vpow2.f32 %v326_v1  ;;  %v855_v6 = vadd.f32 %v820_v26, %v257_v3  ;;  %v858_v7 = vadd.f32 %v820_v26, %v289_v4  ;;  %v259_v8 = vpop.f32.mrb[9].mxu0 }
 0x10a   :  { %v291_v9 = vpop.f32.mrb[9].mxu1  ;;  %v652_v10 = vpop.eup %651  ;;  %v352_v11 = vadd.f32 1.0, %v650_v5  ;;  %663 = vpow2.f32 %v342_v2 }
 0x10b   :  { %v260_v12 = vpop.f32.mrb[10].mxu0  ;;  %v292_v13 = vpop.f32.mrb[10].mxu1  ;;  %v360_v15 = vadd.f32 1.0, %v652_v10  ;;  %v308_v16 = vsub.f32 0.0, %v855_v6  ;;  %v316_v17 = vsub.f32 0.0, %v858_v7 }
 0x10c   :  { %v654_v14 = vpop.eup %653  ;;  %v863_v18 = vadd.f32 %v820_v26, %v260_v12  ;;  %v262_v19 = vpop.f32.mrb[11].mxu0  ;;  %665 = vrcp.f32 %v352_v11  ;;  %v866_v23 = vadd.f32 %v820_v26, %v292_v13 }
 0x10d   :  { %v294_v20 = vpop.f32.mrb[11].mxu1  ;;  %v656_v21 = vpop.eup %655  ;;  %v353_v22 = vadd.f32 1.0, %v654_v14  ;;  %667 = vrcp.f32 %v360_v15  ;;  %v328_v25 = vmul.f32 1.442695, %v308_v16  ;;  %v344_v27 = vmul.f32 1.442695, %v316_v17 }
 0x10e   :  { %v361_v24 = vadd.f32 1.0, %v656_v21  ;;  %v309_v28 = vsub.f32 0.0, %v863_v18  ;;  %v317_v31 = vsub.f32 0.0, %v866_v23 }
 0x10f   :  { %669 = vrcp.f32 %v353_v22 }
 0x110   :  { %671 = vrcp.f32 %v361_v24  ;;  %v330_v32 = vmul.f32 1.442695, %v309_v28  ;;  %v346_v33 = vmul.f32 1.442695, %v317_v31  ;;  %v265_v34 = vpop.f32.mrb[12].mxu0  ;;  %v297_v35 = vpop.f32.mrb[12].mxu1 }
 0x111   :  { %673 = vpow2.f32 %v328_v25  ;;  %v658_v36 = vpop.eup %657  ;;  %v871_v39 = vadd.f32 %v820_v26, %v265_v34  ;;  %v874_v40 = vadd.f32 %v820_v26, %v297_v35  ;;  %v267_v41 = vpop.f32.mrb[13].mxu0 }
 0x112   :  { %675 = vpow2.f32 %v344_v27  ;;  %v299_v42 = vpop.f32.mrb[13].mxu1  ;;  %v660_v43 = vpop.eup %659  ;;  %v354_v44 = vadd.f32 1.0, %v658_v36 }
 0x113   :  { %677 = vpow2.f32 %v330_v32  ;;  %v268_v45 = vpop.f32.mrb[14].mxu0  ;;  %v300_v46 = vpop.f32.mrb[14].mxu1  ;;  %v362_v48 = vadd.f32 1.0, %v660_v43  ;;  %v310_v51 = vsub.f32 0.0, %v871_v39  ;;  %v318_v52 = vsub.f32 0.0, %v874_v40 }
 0x114   :  { %v662_v47 = vpop.eup %661  ;;  %679 = vpow2.f32 %v346_v33  ;;  %v270_v53 = vpop.f32.mrb[15].mxu0  ;;  %v879_v59 = vadd.f32 %v820_v26, %v268_v45  ;;  %v882_v60 = vadd.f32 %v820_v26, %v300_v46 }
 0x115   :  { %v302_v54 = vpop.f32.mrb[15].mxu1  ;;  %v664_v55 = vpop.eup %663  ;;  %681 = vrcp.f32 %v354_v44  ;;  %v355_v56 = vadd.f32 1.0, %v662_v47  ;;  %v332_v62 = vmul.f32 1.442695, %v310_v51  ;;  %v348_v63 = vmul.f32 1.442695, %v318_v52 }
 0x116   :  { %683 = vrcp.f32 %v362_v48  ;;  %v363_v61 = vadd.f32 1.0, %v664_v55  ;;  %v666_v0 = vpop.eup %665  ;;  %v311_v1 = vsub.f32 0.0, %v879_v59  ;;  %v319_v2 = vsub.f32 0.0, %v882_v60 }
 0x117   :  { %685 = vrcp.f32 %v355_v56  ;;  %v668_v3 = vpop.eup %667  ;;  %v384_v26 = vmul.f32 %v666_v0, %v823_v29 }
 0x118   :  { %687 = vrcp.f32 %v363_v61  ;;  %v334_v5 = vmul.f32 1.442695, %v311_v1  ;;  %v350_v8 = vmul.f32 1.442695, %v319_v2  ;;  %v392_v12 = vmul.f32 %v668_v3, %v826_v30 }
 0x119   :  { %v670_v4 = vpop.eup %669  ;;  %689 = vpow2.f32 %v332_v62 }
 0x11a   :  { %v672_v9 = vpop.eup %671  ;;  %v385_v10 = vmul.f32 %v670_v4, %v831_v37  ;;  %691 = vpow2.f32 %v348_v63 }
 0x11b   :  { %v674_v11 = vpop.eup %673  ;;  %v393_v13 = vmul.f32 %v672_v9, %v834_v38  ;;  %693 = vpow2.f32 %v334_v5 }
 0x11c   :  { %v676_v14 = vpop.eup %675  ;;  %v553_v15 = vpack.c.bf16 %v385_v10, %v384_v26  ;;  %v356_v16 = vadd.f32 1.0, %v674_v11  ;;  %695 = vpow2.f32 %v350_v8 }
 0x11d   :  { %v678_v17 = vpop.eup %677  ;;  %v573_v19 = vpack.c.bf16 %v393_v13, %v392_v12  ;;  %v364_v20 = vadd.f32 1.0, %v676_v14 }
 0x11e   :  { %v680_v21 = vpop.eup %679  ;;  %554 = vst [vmem:[%s929_s3] sm:$0xff] %v553_v15   ;;  %697 = vrcp.f32 %v356_v16  ;;  %v357_v29 = vadd.f32 1.0, %v678_v17 }
 0x11f   :  { %v682_v37 = vpop.eup %681  ;;  %593 = vst [vmem:[%s929_s3 + $0x20] sm:$0xff] %v573_v19   ;;  %699 = vrcp.f32 %v364_v20  ;;  %v365_v30 = vadd.f32 1.0, %v680_v21 }
 0x120   :  { %v684_v38 = vpop.eup %683  ;;  %701 = vrcp.f32 %v357_v29  ;;  %v386_v25 = vmul.f32 %v682_v37, %v839_v49 }
 0x121   :  { %v686_v22 = vpop.eup %685  ;;  %703 = vrcp.f32 %v365_v30  ;;  %v394_v31 = vmul.f32 %v684_v38, %v842_v50 }
 0x122   :  { %v688_v24 = vpop.eup %687  ;;  %v387_v27 = vmul.f32 %v686_v22, %v847_v57 }
 0x123   :  { %v690_v28 = vpop.eup %689  ;;  %v395_v32 = vmul.f32 %v688_v24, %v850_v58 }
 0x124   :  { %v692_v33 = vpop.eup %691  ;;  %v558_v34 = vpack.c.bf16 %v387_v27, %v386_v25  ;;  %v358_v35 = vadd.f32 1.0, %v690_v28 }
 0x125   :  { %v694_v36 = vpop.eup %693  ;;  %v578_v41 = vpack.c.bf16 %v395_v32, %v394_v31  ;;  %v366_v42 = vadd.f32 1.0, %v692_v33 }
 0x126   :  { %v696_v43 = vpop.eup %695  ;;  %590 = vst [vmem:[%s929_s3 + $0x8] sm:$0xff] %v558_v34   ;;  %705 = vrcp.f32 %v358_v35  ;;  %v359_v49 = vadd.f32 1.0, %v694_v36 }
 0x127   :  { %594 = vst [vmem:[%s929_s3 + $0x28] sm:$0xff] %v578_v41   ;;  %707 = vrcp.f32 %v366_v42  ;;  %v367_v50 = vadd.f32 1.0, %v696_v43 }
 0x128   :  { %v698_v57 = vpop.eup %697  ;;  %709 = vrcp.f32 %v359_v49 }
 0x129   :  { %v700_v58 = vpop.eup %699  ;;  %711 = vrcp.f32 %v367_v50  ;;  %v388_v46 = vmul.f32 %v698_v57, %v855_v6 }
 0x12a   :  { %v702_v44 = vpop.eup %701  ;;  %v396_v48 = vmul.f32 %v700_v58, %v858_v7 }
 0x12b   :  { %v704_v45 = vpop.eup %703  ;;  %v389_v47 = vmul.f32 %v702_v44, %v863_v18 }
 0x12c   :  { %v397_v51 = vmul.f32 %v704_v45, %v866_v23 }
 0x12d   :  { %v563_v52 = vpack.c.bf16 %v389_v47, %v388_v46 }
 0x12e   :  { %v583_v53 = vpack.c.bf16 %v397_v51, %v396_v48 }
 0x12f   :  { %591 = vst [vmem:[%s929_s3 + $0x10] sm:$0xff] %v563_v52  }
 0x130   :  { %v706_v54 = vpop.eup %705  ;;  %595 = vst [vmem:[%s929_s3 + $0x30] sm:$0xff] %v583_v53  }
 0x131   :  { %v708_v55 = vpop.eup %707  ;;  %v390_v18 = vmul.f32 %v706_v54, %v871_v39 }
 0x132   :  { %v710_v56 = vpop.eup %709  ;;  %v398_v23 = vmul.f32 %v708_v55, %v874_v40 }
 0x133   :  { %v712_v6 = vpop.eup %711  ;;  %v391_v7 = vmul.f32 %v710_v56, %v879_v59 }
 0x134   :  { %v399_v61 = vmul.f32 %v712_v6, %v882_v60 }
 0x135   :  { %v568_v62 = vpack.c.bf16 %v391_v7, %v390_v18 }
 0x136   :  { %v588_v63 = vpack.c.bf16 %v399_v61, %v398_v23 }
 0x137   :  { %592 = vst [vmem:[%s929_s3 + $0x18] sm:$0xff] %v568_v62  }
 0x138   :  { %596 = vst [vmem:[%s929_s3 + $0x38] sm:$0xff] %v588_v63  }

// kernel: _lambda_.49
= control target key start
LH: loop header
LB: loop body
LE: loop exit
PB: predicated region body
PF: predicated region fallthrough
CT: control target
= control target key end

     0   :  { %vm94_vm0 = vcmask 261120   ;;  %s769_s1 = inlined_call_operand.vmem [shape: bf16[32,128], index: 1, kind: input, shape index: {}]   ;;  %s770_s0 = inlined_call_operand.vmem [shape: bf16[128,32], index: 0, kind: input, shape index: {}]   ;;  %s771_s2 = inlined_call_operand.vmem [shape: f32[1,128], index: 2, kind: input, shape index: {}]   ;;  %s772_s3 = inlined_call_operand.vmem [shape: bf16[128,128], index: 3, kind: output, shape index: {}]  }
   0x1   :  { %v528_v0 = vld [vmem:[%s769_s1] sm:$0xff]   ;;  %v529_v1 = vld [vmem:[%s769_s1 + $0x8] sm:$0xff]   ;;  %v534_v6 = vld [vmem:[%s770_s0 + $0x10] sm:$0xff]  }
   0x2   :  { %504 = vmatprep.subr.bf16.mxu0 %v528_v0  ;;  %524 = vmatprep.subr.bf16.mxu1 %v528_v0  ;;  %v530_v2 = vld [vmem:[%s770_s0] sm:$0xff]   ;;  %v532_v4 = vld [vmem:[%s770_s0 + $0x8] sm:$0xff]   ;;  %v535_v7 = vld [vmem:[%s770_s0 + $0x30] sm:$0xff]  }
   0x3   :  { %505 = vmatpush3.bf16.msra.mxu0 %v528_v0  ;;  %526 = vmatpush3.bf16.msra.mxu1 %v528_v0  ;;  %v531_v3 = vld [vmem:[%s770_s0 + $0x20] sm:$0xff]   ;;  %v533_v5 = vld [vmem:[%s770_s0 + $0x28] sm:$0xff]   ;;  %v536_v8 = vld [vmem:[%s770_s0 + $0x18] sm:$0xff]  }
   0x4   :  { %506 = vmatprep.subr.bf16.mxu0 %v529_v1  ;;  %525 = vmatprep.subr.bf16.mxu1 %v529_v1  ;;  %v537_v9 = vld [vmem:[%s770_s0 + $0x38] sm:$0xff]   ;;  %v663_v10 = vld [vmem:[%s771_s2] ss:$0 sm:$0xff] }
   0x5   :  { %508 = vmatprep.mubr.msk.bf16.mxu0 %vm94_vm0, %v530_v2  ;;  %516 = vmatprep.mubr.msk.bf16.mxu1 %vm94_vm0, %v531_v3 }
   0x7   :  { %507 = vmatpush3.bf16.msra.mxu0 %v529_v1  ;;  %527 = vmatpush3.bf16.msra.mxu1 %v529_v1 }
   0xa   :  { %509 = vmatmul.mubr.msk.bf16.vlgmr.msra.gmra.mrb[0].mxu0 %vm94_vm0, %v532_v4  ;;  %517 = vmatmul.mubr.msk.bf16.vlgmr.msra.gmra.mrb[0].mxu1 %vm94_vm0, %v533_v5 }
   0xb   :  { %512 = vmatprep.mubr.msk.bf16.mxu0 %vm94_vm0, %v534_v6  ;;  %520 = vmatprep.mubr.msk.bf16.mxu1 %vm94_vm0, %v535_v7 }
  0x12   :  { %513 = vmatmul.mubr.msk.bf16.gmra.mrb[4].mxu0 %vm94_vm0, %v536_v8  ;;  %521 = vmatmul.mubr.msk.bf16.gmra.mrb[4].mxu1 %vm94_vm0, %v537_v9 }
  0xdd   :  { %v510_v11 = vpop.f32.mrb[0].mxu0  ;;  %v518_v12 = vpop.f32.mrb[0].mxu1 }
  0xde   :  { %v666_v13 = vadd.f32 %v510_v11, %v663_v10  ;;  %v669_v14 = vadd.f32 %v518_v12, %v663_v10  ;;  %v153_v15 = vpop.f32.mrb[1].mxu0  ;;  %v185_v16 = vpop.f32.mrb[1].mxu1 }
  0xdf   :  { %v672_v17 = vadd.f32 %v663_v10, %v153_v15  ;;  %v675_v18 = vadd.f32 %v663_v10, %v185_v16  ;;  %v511_v19 = vpop.f32.mrb[2].mxu0  ;;  %v519_v20 = vpop.f32.mrb[2].mxu1 }
  0xe0   :  { %v218_v21 = vsub.f32 0.0, %v666_v13  ;;  %v226_v22 = vsub.f32 0.0, %v669_v14  ;;  %v680_v23 = vadd.f32 %v511_v19, %v663_v10  ;;  %v683_v24 = vadd.f32 %v519_v20, %v663_v10  ;;  %v156_v25 = vpop.f32.mrb[3].mxu0  ;;  %v188_v26 = vpop.f32.mrb[3].mxu1 }
  0xe1   :  { %v216_v27 = vsub.f32 0.0, %v672_v17  ;;  %v224_v28 = vsub.f32 0.0, %v675_v18  ;;  %v688_v29 = vadd.f32 %v663_v10, %v156_v25  ;;  %v691_v30 = vadd.f32 %v663_v10, %v188_v26 }
  0xe2   :  { %v236_v31 = vmul.f32 1.442695, %v218_v21  ;;  %v252_v32 = vmul.f32 1.442695, %v226_v22  ;;  %v219_v33 = vsub.f32 0.0, %v680_v23  ;;  %v227_v34 = vsub.f32 0.0, %v683_v24 }
  0xe3   :  { %v232_v35 = vmul.f32 1.442695, %v216_v27  ;;  %v248_v36 = vmul.f32 1.442695, %v224_v28  ;;  %v217_v37 = vsub.f32 0.0, %v688_v29  ;;  %v225_v38 = vsub.f32 0.0, %v691_v30 }
  0xe4   :  { %538 = vpow2.f32 %v236_v31  ;;  %v238_v39 = vmul.f32 1.442695, %v219_v33  ;;  %v254_v40 = vmul.f32 1.442695, %v227_v34 }
  0xe5   :  { %540 = vpow2.f32 %v252_v32  ;;  %v514_v41 = vpop.f32.mrb[4].mxu0  ;;  %v522_v42 = vpop.f32.mrb[4].mxu1  ;;  %v234_v43 = vmul.f32 1.442695, %v217_v37  ;;  %v250_v48 = vmul.f32 1.442695, %v225_v38 }
  0xe6   :  { %542 = vpow2.f32 %v232_v35  ;;  %v698_v44 = vadd.f32 %v514_v41, %v663_v10  ;;  %v701_v45 = vadd.f32 %v522_v42, %v663_v10  ;;  %v169_v46 = vpop.f32.mrb[5].mxu0  ;;  %v201_v47 = vpop.f32.mrb[5].mxu1 }
  0xe7   :  { %544 = vpow2.f32 %v248_v36  ;;  %v704_v49 = vadd.f32 %v663_v10, %v169_v46  ;;  %v515_v50 = vpop.f32.mrb[6].mxu0  ;;  %v523_v51 = vpop.f32.mrb[6].mxu1  ;;  %v714_v63 = vadd.f32 %v663_v10, %v201_v47 }
  0xe8   :  { %546 = vpow2.f32 %v238_v39  ;;  %v222_v52 = vsub.f32 0.0, %v698_v44  ;;  %v230_v53 = vsub.f32 0.0, %v701_v45  ;;  %v709_v54 = vadd.f32 %v515_v50, %v663_v10  ;;  %v172_v55 = vpop.f32.mrb[7].mxu0  ;;  %v204_v56 = vpop.f32.mrb[7].mxu1 }
  0xe9   :  { %548 = vpow2.f32 %v254_v40  ;;  %v220_v57 = vsub.f32 0.0, %v704_v49  ;;  %v228_v7 = vsub.f32 0.0, %v714_v63  ;;  %v718_v11 = vadd.f32 %v523_v51, %v663_v10 }
  0xea   :  { %550 = vpow2.f32 %v234_v43  ;;  %v244_v58 = vmul.f32 1.442695, %v222_v52  ;;  %v260_v59 = vmul.f32 1.442695, %v230_v53  ;;  %v223_v60 = vsub.f32 0.0, %v709_v54 }
  0xeb   :  { %552 = vpow2.f32 %v250_v48  ;;  %v240_v61 = vmul.f32 1.442695, %v220_v57  ;;  %v721_v16 = vadd.f32 %v663_v10, %v172_v55  ;;  %v724_v21 = vadd.f32 %v663_v10, %v204_v56 }
  0xec   :  { %554 = vpow2.f32 %v244_v58  ;;  %v246_v62 = vmul.f32 1.442695, %v223_v60  ;;  %v256_v26 = vmul.f32 1.442695, %v228_v7  ;;  %v231_v31 = vsub.f32 0.0, %v718_v11 }
  0xed   :  { %556 = vpow2.f32 %v260_v59  ;;  %v221_v33 = vsub.f32 0.0, %v721_v16  ;;  %v229_v35 = vsub.f32 0.0, %v724_v21 }
  0xee   :  { %v539_v0 = vpop.eup %538  ;;  %558 = vpow2.f32 %v240_v61  ;;  %v262_v37 = vmul.f32 1.442695, %v231_v31 }
  0xef   :  { %v541_v1 = vpop.eup %540  ;;  %v266_v2 = vadd.f32 1.0, %v539_v0  ;;  %560 = vpow2.f32 %v246_v62  ;;  %v242_v40 = vmul.f32 1.442695, %v221_v33  ;;  %v258_v42 = vmul.f32 1.442695, %v229_v35 }
  0xf0   :  { %v543_v3 = vpop.eup %542  ;;  %v274_v4 = vadd.f32 1.0, %v541_v1 }
  0xf1   :  { %v545_v5 = vpop.eup %544  ;;  %562 = vrcp.f32 %v266_v2  ;;  %v264_v6 = vadd.f32 1.0, %v543_v3 }
  0xf2   :  { %v547_v8 = vpop.eup %546  ;;  %564 = vrcp.f32 %v274_v4  ;;  %v272_v9 = vadd.f32 1.0, %v545_v5 }
  0xf3   :  { %v549_v12 = vpop.eup %548  ;;  %566 = vrcp.f32 %v264_v6  ;;  %v267_v15 = vadd.f32 1.0, %v547_v8 }
  0xf4   :  { %v551_v19 = vpop.eup %550  ;;  %568 = vrcp.f32 %v272_v9  ;;  %v275_v20 = vadd.f32 1.0, %v549_v12 }
  0xf5   :  { %v553_v22 = vpop.eup %552  ;;  %570 = vrcp.f32 %v267_v15  ;;  %v265_v25 = vadd.f32 1.0, %v551_v19 }
  0xf6   :  { %v555_v27 = vpop.eup %554  ;;  %572 = vrcp.f32 %v275_v20  ;;  %v273_v28 = vadd.f32 1.0, %v553_v22 }
  0xf7   :  { %574 = vrcp.f32 %v265_v25  ;;  %v270_v32 = vadd.f32 1.0, %v555_v27  ;;  %v557_v34 = vpop.eup %556 }
  0xf8   :  { %576 = vrcp.f32 %v273_v28  ;;  %v559_v36 = vpop.eup %558 }
  0xf9   :  { %578 = vpow2.f32 %v256_v26  ;;  %v561_v10 = vpop.eup %560 }
  0xfa   :  { %580 = vrcp.f32 %v270_v32  ;;  %v271_v39 = vadd.f32 1.0, %v561_v10 }
  0xfb   :  { %v563_v38 = vpop.eup %562 }
  0xfc   :  { %v565_v41 = vpop.eup %564  ;;  %582 = vrcp.f32 %v271_v39  ;;  %v298_v50 = vmul.f32 %v563_v38, %v666_v13 }
  0xfd   :  { %v567_v43 = vpop.eup %566  ;;  %584 = vpow2.f32 %v262_v37  ;;  %v306_v53 = vmul.f32 %v565_v41, %v669_v14  ;;  %v278_v14 = vadd.f32 1.0, %v557_v34 }
  0xfe   :  { %v569_v46 = vpop.eup %568  ;;  %586 = vpow2.f32 %v242_v40  ;;  %v296_v57 = vmul.f32 %v567_v43, %v672_v17 }
  0xff   :  { %v571_v47 = vpop.eup %570  ;;  %588 = vpow2.f32 %v258_v42  ;;  %v304_v61 = vmul.f32 %v569_v46, %v675_v18 }
 0x100   :  { %v573_v48 = vpop.eup %572  ;;  %v299_v51 = vmul.f32 %v571_v47, %v680_v23  ;;  %590 = vrcp.f32 %v278_v14 }
 0x101   :  { %v575_v52 = vpop.eup %574  ;;  %v307_v55 = vmul.f32 %v573_v48, %v683_v24  ;;  %v268_v24 = vadd.f32 1.0, %v559_v36 }
 0x102   :  { %v577_v56 = vpop.eup %576  ;;  %v455_v58 = vpack.c.bf16 %v299_v51, %v298_v50  ;;  %v297_v59 = vmul.f32 %v575_v52, %v688_v29 }
 0x103   :  { %v579_v60 = vpop.eup %578  ;;  %v475_v62 = vpack.c.bf16 %v307_v55, %v306_v53  ;;  %v305_v13 = vmul.f32 %v577_v56, %v691_v30  ;;  %592 = vrcp.f32 %v268_v24 }
 0x104   :  { %487 = vst [vmem:[%s772_s3 + $0x8] sm:$0xff] %v455_v58   ;;  %v450_v23 = vpack.c.bf16 %v297_v59, %v296_v57  ;;  %v581_v0 = vpop.eup %580  ;;  %v276_v18 = vadd.f32 1.0, %v579_v60 }
 0x105   :  { %491 = vst [vmem:[%s772_s3 + $0x28] sm:$0xff] %v475_v62   ;;  %v470_v17 = vpack.c.bf16 %v305_v13, %v304_v61  ;;  %v302_v1 = vmul.f32 %v581_v0, %v698_v44 }
 0x106   :  { %451 = vst [vmem:[%s772_s3] sm:$0xff] %v450_v23   ;;  %v583_v29 = vpop.eup %582  ;;  %594 = vrcp.f32 %v276_v18 }
 0x107   :  { %490 = vst [vmem:[%s772_s3 + $0x20] sm:$0xff] %v470_v17   ;;  %v585_v30 = vpop.eup %584  ;;  %v303_v2 = vmul.f32 %v583_v29, %v709_v54 }
 0x108   :  { %v587_v3 = vpop.eup %586  ;;  %v279_v4 = vadd.f32 1.0, %v585_v30 }
 0x109   :  { %v589_v5 = vpop.eup %588  ;;  %v465_v6 = vpack.c.bf16 %v303_v2, %v302_v1  ;;  %v269_v7 = vadd.f32 1.0, %v587_v3 }
 0x10a   :  { %596 = vrcp.f32 %v279_v4  ;;  %v277_v8 = vadd.f32 1.0, %v589_v5  ;;  %v591_v9 = vpop.eup %590 }
 0x10b   :  { %489 = vst [vmem:[%s772_s3 + $0x18] sm:$0xff] %v465_v6   ;;  %598 = vrcp.f32 %v269_v7  ;;  %v310_v19 = vmul.f32 %v591_v9, %v701_v45 }
 0x10c   :  { %600 = vrcp.f32 %v277_v8 }
 0x10d   :  { %v593_v44 = vpop.eup %592 }
 0x10e   :  { %v300_v25 = vmul.f32 %v593_v44, %v704_v49 }
 0x110   :  { %v595_v12 = vpop.eup %594 }
 0x111   :  { %v308_v27 = vmul.f32 %v595_v12, %v714_v63 }
 0x114   :  { %v597_v15 = vpop.eup %596 }
 0x115   :  { %v599_v54 = vpop.eup %598  ;;  %v311_v20 = vmul.f32 %v597_v15, %v718_v11 }
 0x116   :  { %v601_v22 = vpop.eup %600  ;;  %v301_v26 = vmul.f32 %v599_v54, %v721_v16 }
 0x117   :  { %v485_v28 = vpack.c.bf16 %v311_v20, %v310_v19  ;;  %v309_v31 = vmul.f32 %v601_v22, %v724_v21 }
 0x118   :  { %v460_v32 = vpack.c.bf16 %v301_v26, %v300_v25 }
 0x119   :  { %493 = vst [vmem:[%s772_s3 + $0x38] sm:$0xff] %v485_v28   ;;  %v480_v33 = vpack.c.bf16 %v309_v31, %v308_v27 }
 0x11a   :  { %488 = vst [vmem:[%s772_s3 + $0x10] sm:$0xff] %v460_v32  }
 0x11b   :  { %492 = vst [vmem:[%s772_s3 + $0x30] sm:$0xff] %v480_v33  }

// kernel: _lambda_.50
= control target key start
LH: loop header
LB: loop body
LE: loop exit
PB: predicated region body
PF: predicated region fallthrough
CT: control target
= control target key end

     0   :  { %vm86_vm0 = vcmask 130048   ;;  %s751_s1 = inlined_call_operand.vmem [shape: bf16[16,128], index: 1, kind: input, shape index: {}]   ;;  %s752_s0 = inlined_call_operand.vmem [shape: bf16[128,16], index: 0, kind: input, shape index: {}]   ;;  %s753_s2 = inlined_call_operand.vmem [shape: f32[1,128], index: 2, kind: input, shape index: {}]   ;;  %s754_s3 = inlined_call_operand.vmem [shape: bf16[128,128], index: 3, kind: output, shape index: {}]  }
   0x1   :  { %v514_v0 = vld [vmem:[%s751_s1] sm:$0xff]   ;;  %v517_v3 = vld [vmem:[%s752_s0 + $0x8] sm:$0xff]   ;;  %v519_v5 = vld [vmem:[%s752_s0 + $0x10] sm:$0xff]  }
   0x2   :  { %v515_v1 = vld [vmem:[%s752_s0] sm:$0xff]   ;;  %494 = vmatprep.subr.bf16.mxu0 %v514_v0  ;;  %512 = vmatprep.subr.bf16.mxu1 %v514_v0  ;;  %v518_v4 = vld [vmem:[%s752_s0 + $0x28] sm:$0xff]   ;;  %v520_v6 = vld [vmem:[%s752_s0 + $0x30] sm:$0xff]  }
   0x3   :  { %v516_v2 = vld [vmem:[%s752_s0 + $0x20] sm:$0xff]   ;;  %495 = vmatpush3.bf16.msra.mxu0 %v514_v0  ;;  %513 = vmatpush3.bf16.msra.mxu1 %v514_v0  ;;  %v521_v7 = vld [vmem:[%s752_s0 + $0x18] sm:$0xff]  }
   0x4   :  { %496 = vmatprep.mubr.msk.bf16.mxu0 %vm86_vm0, %v515_v1  ;;  %504 = vmatprep.mubr.msk.bf16.mxu1 %vm86_vm0, %v516_v2  ;;  %v522_v8 = vld [vmem:[%s752_s0 + $0x38] sm:$0xff]   ;;  %v645_v9 = vld [vmem:[%s753_s2] ss:$0 sm:$0xff] }
   0x6   :  { %497 = vmatmul.mubr.msk.bf16.vlgmr.msra.gmra.mrb[0].mxu0 %vm86_vm0, %v517_v3  ;;  %505 = vmatmul.mubr.msk.bf16.vlgmr.msra.gmra.mrb[0].mxu1 %vm86_vm0, %v518_v4 }
   0x7   :  { %500 = vmatprep.mubr.msk.bf16.mxu0 %vm86_vm0, %v519_v5  ;;  %508 = vmatprep.mubr.msk.bf16.mxu1 %vm86_vm0, %v520_v6 }
   0xe   :  { %501 = vmatmul.mubr.msk.bf16.gmra.mrb[4].mxu0 %vm86_vm0, %v521_v7  ;;  %509 = vmatmul.mubr.msk.bf16.gmra.mrb[4].mxu1 %vm86_vm0, %v522_v8 }
  0xd9   :  { %v498_v10 = vpop.f32.mrb[0].mxu0  ;;  %v506_v11 = vpop.f32.mrb[0].mxu1 }
  0xda   :  { %v648_v12 = vadd.f32 %v498_v10, %v645_v9  ;;  %v651_v13 = vadd.f32 %v506_v11, %v645_v9  ;;  %v145_v14 = vpop.f32.mrb[1].mxu0  ;;  %v177_v15 = vpop.f32.mrb[1].mxu1 }
  0xdb   :  { %v654_v16 = vadd.f32 %v645_v9, %v145_v14  ;;  %v657_v17 = vadd.f32 %v645_v9, %v177_v15  ;;  %v499_v18 = vpop.f32.mrb[2].mxu0  ;;  %v507_v19 = vpop.f32.mrb[2].mxu1 }
  0xdc   :  { %v210_v20 = vsub.f32 0.0, %v648_v12  ;;  %v218_v21 = vsub.f32 0.0, %v651_v13  ;;  %v662_v22 = vadd.f32 %v499_v18, %v645_v9  ;;  %v665_v23 = vadd.f32 %v507_v19, %v645_v9  ;;  %v148_v24 = vpop.f32.mrb[3].mxu0  ;;  %v180_v25 = vpop.f32.mrb[3].mxu1 }
  0xdd   :  { %v208_v26 = vsub.f32 0.0, %v654_v16  ;;  %v216_v27 = vsub.f32 0.0, %v657_v17  ;;  %v670_v28 = vadd.f32 %v645_v9, %v148_v24  ;;  %v673_v29 = vadd.f32 %v645_v9, %v180_v25 }
  0xde   :  { %v228_v30 = vmul.f32 1.442695, %v210_v20  ;;  %v244_v31 = vmul.f32 1.442695, %v218_v21  ;;  %v211_v32 = vsub.f32 0.0, %v662_v22  ;;  %v219_v33 = vsub.f32 0.0, %v665_v23 }
  0xdf   :  { %v224_v34 = vmul.f32 1.442695, %v208_v26  ;;  %v240_v35 = vmul.f32 1.442695, %v216_v27  ;;  %v209_v36 = vsub.f32 0.0, %v670_v28  ;;  %v217_v37 = vsub.f32 0.0, %v673_v29 }
  0xe0   :  { %523 = vpow2.f32 %v228_v30  ;;  %v230_v38 = vmul.f32 1.442695, %v211_v32  ;;  %v246_v39 = vmul.f32 1.442695, %v219_v33 }
  0xe1   :  { %525 = vpow2.f32 %v244_v31  ;;  %v502_v40 = vpop.f32.mrb[4].mxu0  ;;  %v510_v41 = vpop.f32.mrb[4].mxu1  ;;  %v226_v42 = vmul.f32 1.442695, %v209_v36  ;;  %v242_v47 = vmul.f32 1.442695, %v217_v37 }
  0xe2   :  { %527 = vpow2.f32 %v224_v34  ;;  %v680_v43 = vadd.f32 %v502_v40, %v645_v9  ;;  %v683_v44 = vadd.f32 %v510_v41, %v645_v9  ;;  %v161_v45 = vpop.f32.mrb[5].mxu0  ;;  %v193_v46 = vpop.f32.mrb[5].mxu1 }
  0xe3   :  { %529 = vpow2.f32 %v240_v35  ;;  %v686_v48 = vadd.f32 %v645_v9, %v161_v45  ;;  %v503_v49 = vpop.f32.mrb[6].mxu0  ;;  %v511_v50 = vpop.f32.mrb[6].mxu1  ;;  %v696_v62 = vadd.f32 %v645_v9, %v193_v46 }
  0xe4   :  { %531 = vpow2.f32 %v230_v38  ;;  %v214_v51 = vsub.f32 0.0, %v680_v43  ;;  %v222_v52 = vsub.f32 0.0, %v683_v44  ;;  %v691_v53 = vadd.f32 %v503_v49, %v645_v9  ;;  %v164_v54 = vpop.f32.mrb[7].mxu0  ;;  %v196_v55 = vpop.f32.mrb[7].mxu1 }
  0xe5   :  { %533 = vpow2.f32 %v246_v39  ;;  %v212_v56 = vsub.f32 0.0, %v686_v48  ;;  %v220_v6 = vsub.f32 0.0, %v696_v62  ;;  %v700_v10 = vadd.f32 %v511_v50, %v645_v9 }
  0xe6   :  { %535 = vpow2.f32 %v226_v42  ;;  %v236_v57 = vmul.f32 1.442695, %v214_v51  ;;  %v252_v58 = vmul.f32 1.442695, %v222_v52  ;;  %v215_v59 = vsub.f32 0.0, %v691_v53 }
  0xe7   :  { %537 = vpow2.f32 %v242_v47  ;;  %v232_v60 = vmul.f32 1.442695, %v212_v56  ;;  %v703_v15 = vadd.f32 %v645_v9, %v164_v54  ;;  %v706_v20 = vadd.f32 %v645_v9, %v196_v55 }
  0xe8   :  { %539 = vpow2.f32 %v236_v57  ;;  %v238_v61 = vmul.f32 1.442695, %v215_v59  ;;  %v248_v25 = vmul.f32 1.442695, %v220_v6  ;;  %v223_v30 = vsub.f32 0.0, %v700_v10 }
  0xe9   :  { %541 = vpow2.f32 %v252_v58  ;;  %v213_v32 = vsub.f32 0.0, %v703_v15  ;;  %v221_v34 = vsub.f32 0.0, %v706_v20 }
  0xea   :  { %v524_v63 = vpop.eup %523  ;;  %543 = vpow2.f32 %v232_v60  ;;  %v254_v36 = vmul.f32 1.442695, %v223_v30 }
  0xeb   :  { %v526_v0 = vpop.eup %525  ;;  %v258_v1 = vadd.f32 1.0, %v524_v63  ;;  %545 = vpow2.f32 %v238_v61  ;;  %v234_v39 = vmul.f32 1.442695, %v213_v32  ;;  %v250_v41 = vmul.f32 1.442695, %v221_v34 }
  0xec   :  { %v528_v2 = vpop.eup %527  ;;  %v266_v3 = vadd.f32 1.0, %v526_v0 }
  0xed   :  { %v530_v4 = vpop.eup %529  ;;  %547 = vrcp.f32 %v258_v1  ;;  %v256_v5 = vadd.f32 1.0, %v528_v2 }
  0xee   :  { %v532_v7 = vpop.eup %531  ;;  %549 = vrcp.f32 %v266_v3  ;;  %v264_v8 = vadd.f32 1.0, %v530_v4 }
  0xef   :  { %v534_v11 = vpop.eup %533  ;;  %551 = vrcp.f32 %v256_v5  ;;  %v259_v14 = vadd.f32 1.0, %v532_v7 }
  0xf0   :  { %v536_v18 = vpop.eup %535  ;;  %553 = vrcp.f32 %v264_v8  ;;  %v267_v19 = vadd.f32 1.0, %v534_v11 }
  0xf1   :  { %v538_v21 = vpop.eup %537  ;;  %555 = vrcp.f32 %v259_v14  ;;  %v257_v24 = vadd.f32 1.0, %v536_v18 }
  0xf2   :  { %v540_v26 = vpop.eup %539  ;;  %557 = vrcp.f32 %v267_v19  ;;  %v265_v27 = vadd.f32 1.0, %v538_v21 }
  0xf3   :  { %559 = vrcp.f32 %v257_v24  ;;  %v262_v31 = vadd.f32 1.0, %v540_v26  ;;  %v542_v33 = vpop.eup %541 }
  0xf4   :  { %561 = vrcp.f32 %v265_v27  ;;  %v544_v35 = vpop.eup %543 }
  0xf5   :  { %563 = vpow2.f32 %v248_v25  ;;  %v546_v9 = vpop.eup %545 }
  0xf6   :  { %565 = vrcp.f32 %v262_v31  ;;  %v263_v38 = vadd.f32 1.0, %v546_v9 }
  0xf7   :  { %v548_v37 = vpop.eup %547 }
  0xf8   :  { %v550_v40 = vpop.eup %549  ;;  %567 = vrcp.f32 %v263_v38  ;;  %v290_v49 = vmul.f32 %v548_v37, %v648_v12 }
  0xf9   :  { %v552_v42 = vpop.eup %551  ;;  %569 = vpow2.f32 %v254_v36  ;;  %v298_v52 = vmul.f32 %v550_v40, %v651_v13  ;;  %v270_v13 = vadd.f32 1.0, %v542_v33 }
  0xfa   :  { %v554_v45 = vpop.eup %553  ;;  %571 = vpow2.f32 %v234_v39  ;;  %v288_v56 = vmul.f32 %v552_v42, %v654_v16 }
  0xfb   :  { %v556_v46 = vpop.eup %555  ;;  %573 = vpow2.f32 %v250_v41  ;;  %v296_v60 = vmul.f32 %v554_v45, %v657_v17 }
  0xfc   :  { %v558_v47 = vpop.eup %557  ;;  %v291_v50 = vmul.f32 %v556_v46, %v662_v22  ;;  %575 = vrcp.f32 %v270_v13 }
  0xfd   :  { %v560_v51 = vpop.eup %559  ;;  %v299_v54 = vmul.f32 %v558_v47, %v665_v23  ;;  %v260_v23 = vadd.f32 1.0, %v544_v35 }
  0xfe   :  { %v562_v55 = vpop.eup %561  ;;  %v446_v57 = vpack.c.bf16 %v291_v50, %v290_v49  ;;  %v289_v58 = vmul.f32 %v560_v51, %v670_v28 }
  0xff   :  { %v564_v59 = vpop.eup %563  ;;  %v466_v61 = vpack.c.bf16 %v299_v54, %v298_v52  ;;  %v297_v12 = vmul.f32 %v562_v55, %v673_v29  ;;  %577 = vrcp.f32 %v260_v23 }
 0x100   :  { %478 = vst [vmem:[%s754_s3 + $0x8] sm:$0xff] %v446_v57   ;;  %v441_v22 = vpack.c.bf16 %v289_v58, %v288_v56  ;;  %v566_v63 = vpop.eup %565  ;;  %v268_v17 = vadd.f32 1.0, %v564_v59 }
 0x101   :  { %482 = vst [vmem:[%s754_s3 + $0x28] sm:$0xff] %v466_v61   ;;  %v461_v16 = vpack.c.bf16 %v297_v12, %v296_v60  ;;  %v294_v0 = vmul.f32 %v566_v63, %v680_v43 }
 0x102   :  { %442 = vst [vmem:[%s754_s3] sm:$0xff] %v441_v22   ;;  %v568_v28 = vpop.eup %567  ;;  %579 = vrcp.f32 %v268_v17 }
 0x103   :  { %481 = vst [vmem:[%s754_s3 + $0x20] sm:$0xff] %v461_v16   ;;  %v570_v29 = vpop.eup %569  ;;  %v295_v1 = vmul.f32 %v568_v28, %v691_v53 }
 0x104   :  { %v572_v2 = vpop.eup %571  ;;  %v271_v3 = vadd.f32 1.0, %v570_v29 }
 0x105   :  { %v574_v4 = vpop.eup %573  ;;  %v456_v5 = vpack.c.bf16 %v295_v1, %v294_v0  ;;  %v261_v6 = vadd.f32 1.0, %v572_v2 }
 0x106   :  { %581 = vrcp.f32 %v271_v3  ;;  %v269_v7 = vadd.f32 1.0, %v574_v4  ;;  %v576_v8 = vpop.eup %575 }
 0x107   :  { %480 = vst [vmem:[%s754_s3 + $0x18] sm:$0xff] %v456_v5   ;;  %583 = vrcp.f32 %v261_v6  ;;  %v302_v18 = vmul.f32 %v576_v8, %v683_v44 }
 0x108   :  { %585 = vrcp.f32 %v269_v7 }
 0x109   :  { %v578_v43 = vpop.eup %577 }
 0x10a   :  { %v292_v24 = vmul.f32 %v578_v43, %v686_v48 }
 0x10c   :  { %v580_v11 = vpop.eup %579 }
 0x10d   :  { %v300_v26 = vmul.f32 %v580_v11, %v696_v62 }
 0x110   :  { %v582_v14 = vpop.eup %581 }
 0x111   :  { %v584_v53 = vpop.eup %583  ;;  %v303_v19 = vmul.f32 %v582_v14, %v700_v10 }
 0x112   :  { %v586_v21 = vpop.eup %585  ;;  %v293_v25 = vmul.f32 %v584_v53, %v703_v15 }
 0x113   :  { %v476_v27 = vpack.c.bf16 %v303_v19, %v302_v18  ;;  %v301_v30 = vmul.f32 %v586_v21, %v706_v20 }
 0x114   :  { %v451_v31 = vpack.c.bf16 %v293_v25, %v292_v24 }
 0x115   :  { %484 = vst [vmem:[%s754_s3 + $0x38] sm:$0xff] %v476_v27   ;;  %v471_v32 = vpack.c.bf16 %v301_v30, %v300_v26 }
 0x116   :  { %479 = vst [vmem:[%s754_s3 + $0x10] sm:$0xff] %v451_v31  }
 0x117   :  { %483 = vst [vmem:[%s754_s3 + $0x30] sm:$0xff] %v471_v32  }

// kernel: _lambda_.53
= control target key start
LH: loop header
LB: loop body
LE: loop exit
PB: predicated region body
PF: predicated region fallthrough
CT: control target
= control target key end

     0   :  { %vm102_vm0 = vcmask 392192   ;;  %s787_s1 = inlined_call_operand.vmem [shape: bf16[48,128], index: 1, kind: input, shape index: {}]   ;;  %s788_s0 = inlined_call_operand.vmem [shape: bf16[128,48], index: 0, kind: input, shape index: {}]   ;;  %s789_s2 = inlined_call_operand.vmem [shape: f32[1,128], index: 2, kind: input, shape index: {}]   ;;  %s790_s3 = inlined_call_operand.vmem [shape: bf16[128,128], index: 3, kind: output, shape index: {}]  }
   0x1   :  { %v542_v0 = vld [vmem:[%s787_s1] sm:$0xff]   ;;  %v543_v1 = vld [vmem:[%s787_s1 + $0x8] sm:$0xff]   ;;  %v544_v2 = vld [vmem:[%s787_s1 + $0x10] sm:$0xff]  }
   0x2   :  { %514 = vmatprep.subr.bf16.mxu0 %v542_v0  ;;  %536 = vmatprep.subr.bf16.mxu1 %v542_v0  ;;  %v545_v3 = vld [vmem:[%s788_s0] sm:$0xff]   ;;  %v547_v5 = vld [vmem:[%s788_s0 + $0x8] sm:$0xff]   ;;  %v549_v7 = vld [vmem:[%s788_s0 + $0x10] sm:$0xff]  }
   0x3   :  { %515 = vmatpush3.bf16.msra.mxu0 %v542_v0  ;;  %539 = vmatpush3.bf16.msra.mxu1 %v542_v0  ;;  %v546_v4 = vld [vmem:[%s788_s0 + $0x20] sm:$0xff]   ;;  %v548_v6 = vld [vmem:[%s788_s0 + $0x28] sm:$0xff]   ;;  %v550_v8 = vld [vmem:[%s788_s0 + $0x30] sm:$0xff]  }
   0x4   :  { %516 = vmatprep.subr.bf16.mxu0 %v543_v1  ;;  %537 = vmatprep.subr.bf16.mxu1 %v543_v1  ;;  %v551_v9 = vld [vmem:[%s788_s0 + $0x18] sm:$0xff]   ;;  %v681_v11 = vld [vmem:[%s789_s2] ss:$0 sm:$0xff] }
   0x5   :  { %520 = vmatprep.mubr.msk.bf16.mxu0 %vm102_vm0, %v545_v3  ;;  %528 = vmatprep.mubr.msk.bf16.mxu1 %vm102_vm0, %v546_v4  ;;  %v552_v10 = vld [vmem:[%s788_s0 + $0x38] sm:$0xff]  }
   0x7   :  { %517 = vmatpush3.bf16.msra.mxu0 %v543_v1  ;;  %540 = vmatpush3.bf16.msra.mxu1 %v543_v1 }
   0x8   :  { %518 = vmatprep.subr.bf16.mxu0 %v544_v2  ;;  %538 = vmatprep.subr.bf16.mxu1 %v544_v2 }
   0xb   :  { %519 = vmatpush3.bf16.msra.mxu0 %v544_v2  ;;  %541 = vmatpush3.bf16.msra.mxu1 %v544_v2 }
   0xe   :  { %521 = vmatmul.mubr.msk.bf16.vlgmr.msra.gmra.mrb[0].mxu0 %vm102_vm0, %v547_v5  ;;  %529 = vmatmul.mubr.msk.bf16.vlgmr.msra.gmra.mrb[0].mxu1 %vm102_vm0, %v548_v6 }
   0xf   :  { %524 = vmatprep.mubr.msk.bf16.mxu0 %vm102_vm0, %v549_v7  ;;  %532 = vmatprep.mubr.msk.bf16.mxu1 %vm102_vm0, %v550_v8 }
  0x16   :  { %525 = vmatmul.mubr.msk.bf16.gmra.mrb[4].mxu0 %vm102_vm0, %v551_v9  ;;  %533 = vmatmul.mubr.msk.bf16.gmra.mrb[4].mxu1 %vm102_vm0, %v552_v10 }
  0xe1   :  { %v522_v12 = vpop.f32.mrb[0].mxu0  ;;  %v530_v13 = vpop.f32.mrb[0].mxu1 }
  0xe2   :  { %v684_v14 = vadd.f32 %v522_v12, %v681_v11  ;;  %v687_v15 = vadd.f32 %v530_v13, %v681_v11  ;;  %v161_v16 = vpop.f32.mrb[1].mxu0  ;;  %v193_v17 = vpop.f32.mrb[1].mxu1 }
  0xe3   :  { %v690_v18 = vadd.f32 %v681_v11, %v161_v16  ;;  %v693_v19 = vadd.f32 %v681_v11, %v193_v17  ;;  %v523_v20 = vpop.f32.mrb[2].mxu0  ;;  %v531_v21 = vpop.f32.mrb[2].mxu1 }
  0xe4   :  { %v226_v22 = vsub.f32 0.0, %v684_v14  ;;  %v234_v23 = vsub.f32 0.0, %v687_v15  ;;  %v698_v24 = vadd.f32 %v523_v20, %v681_v11  ;;  %v701_v25 = vadd.f32 %v531_v21, %v681_v11  ;;  %v164_v26 = vpop.f32.mrb[3].mxu0  ;;  %v196_v27 = vpop.f32.mrb[3].mxu1 }
  0xe5   :  { %v224_v28 = vsub.f32 0.0, %v690_v18  ;;  %v232_v29 = vsub.f32 0.0, %v693_v19  ;;  %v706_v30 = vadd.f32 %v681_v11, %v164_v26  ;;  %v709_v31 = vadd.f32 %v681_v11, %v196_v27 }
  0xe6   :  { %v244_v32 = vmul.f32 1.442695, %v226_v22  ;;  %v260_v33 = vmul.f32 1.442695, %v234_v23  ;;  %v227_v34 = vsub.f32 0.0, %v698_v24  ;;  %v235_v35 = vsub.f32 0.0, %v701_v25 }
  0xe7   :  { %v240_v36 = vmul.f32 1.442695, %v224_v28  ;;  %v256_v37 = vmul.f32 1.442695, %v232_v29  ;;  %v225_v38 = vsub.f32 0.0, %v706_v30  ;;  %v233_v39 = vsub.f32 0.0, %v709_v31 }
  0xe8   :  { %553 = vpow2.f32 %v244_v32  ;;  %v246_v40 = vmul.f32 1.442695, %v227_v34  ;;  %v262_v41 = vmul.f32 1.442695, %v235_v35 }
  0xe9   :  { %555 = vpow2.f32 %v260_v33  ;;  %v526_v42 = vpop.f32.mrb[4].mxu0  ;;  %v534_v43 = vpop.f32.mrb[4].mxu1  ;;  %v242_v44 = vmul.f32 1.442695, %v225_v38  ;;  %v258_v49 = vmul.f32 1.442695, %v233_v39 }
  0xea   :  { %557 = vpow2.f32 %v240_v36  ;;  %v716_v45 = vadd.f32 %v526_v42, %v681_v11  ;;  %v719_v46 = vadd.f32 %v534_v43, %v681_v11  ;;  %v177_v47 = vpop.f32.mrb[5].mxu0  ;;  %v209_v48 = vpop.f32.mrb[5].mxu1 }
  0xeb   :  { %559 = vpow2.f32 %v256_v37  ;;  %v722_v50 = vadd.f32 %v681_v11, %v177_v47  ;;  %v527_v51 = vpop.f32.mrb[6].mxu0  ;;  %v535_v52 = vpop.f32.mrb[6].mxu1  ;;  %v732_v0 = vadd.f32 %v681_v11, %v209_v48 }
  0xec   :  { %561 = vpow2.f32 %v246_v40  ;;  %v230_v53 = vsub.f32 0.0, %v716_v45  ;;  %v238_v54 = vsub.f32 0.0, %v719_v46  ;;  %v727_v55 = vadd.f32 %v527_v51, %v681_v11  ;;  %v180_v56 = vpop.f32.mrb[7].mxu0  ;;  %v212_v57 = vpop.f32.mrb[7].mxu1 }
  0xed   :  { %563 = vpow2.f32 %v262_v41  ;;  %v228_v58 = vsub.f32 0.0, %v722_v50  ;;  %v236_v8 = vsub.f32 0.0, %v732_v0  ;;  %v736_v12 = vadd.f32 %v535_v52, %v681_v11 }
  0xee   :  { %565 = vpow2.f32 %v242_v44  ;;  %v252_v59 = vmul.f32 1.442695, %v230_v53  ;;  %v268_v60 = vmul.f32 1.442695, %v238_v54  ;;  %v231_v61 = vsub.f32 0.0, %v727_v55 }
  0xef   :  { %567 = vpow2.f32 %v258_v49  ;;  %v248_v62 = vmul.f32 1.442695, %v228_v58  ;;  %v739_v17 = vadd.f32 %v681_v11, %v180_v56  ;;  %v742_v22 = vadd.f32 %v681_v11, %v212_v57 }
  0xf0   :  { %569 = vpow2.f32 %v252_v59  ;;  %v254_v63 = vmul.f32 1.442695, %v231_v61  ;;  %v264_v27 = vmul.f32 1.442695, %v236_v8  ;;  %v239_v32 = vsub.f32 0.0, %v736_v12 }
  0xf1   :  { %571 = vpow2.f32 %v268_v60  ;;  %v229_v34 = vsub.f32 0.0, %v739_v17  ;;  %v237_v36 = vsub.f32 0.0, %v742_v22 }
  0xf2   :  { %v554_v1 = vpop.eup %553  ;;  %573 = vpow2.f32 %v248_v62  ;;  %v270_v38 = vmul.f32 1.442695, %v239_v32 }
  0xf3   :  { %v556_v2 = vpop.eup %555  ;;  %v274_v3 = vadd.f32 1.0, %v554_v1  ;;  %575 = vpow2.f32 %v254_v63  ;;  %v250_v41 = vmul.f32 1.442695, %v229_v34  ;;  %v266_v43 = vmul.f32 1.442695, %v237_v36 }
  0xf4   :  { %v558_v4 = vpop.eup %557  ;;  %v282_v5 = vadd.f32 1.0, %v556_v2 }
  0xf5   :  { %v560_v6 = vpop.eup %559  ;;  %577 = vrcp.f32 %v274_v3  ;;  %v272_v7 = vadd.f32 1.0, %v558_v4 }
  0xf6   :  { %v562_v9 = vpop.eup %561  ;;  %579 = vrcp.f32 %v282_v5  ;;  %v280_v10 = vadd.f32 1.0, %v560_v6 }
  0xf7   :  { %v564_v13 = vpop.eup %563  ;;  %581 = vrcp.f32 %v272_v7  ;;  %v275_v16 = vadd.f32 1.0, %v562_v9 }
  0xf8   :  { %v566_v20 = vpop.eup %565  ;;  %583 = vrcp.f32 %v280_v10  ;;  %v283_v21 = vadd.f32 1.0, %v564_v13 }
  0xf9   :  { %v568_v23 = vpop.eup %567  ;;  %585 = vrcp.f32 %v275_v16  ;;  %v273_v26 = vadd.f32 1.0, %v566_v20 }
  0xfa   :  { %v570_v28 = vpop.eup %569  ;;  %587 = vrcp.f32 %v283_v21  ;;  %v281_v29 = vadd.f32 1.0, %v568_v23 }
  0xfb   :  { %589 = vrcp.f32 %v273_v26  ;;  %v278_v33 = vadd.f32 1.0, %v570_v28  ;;  %v572_v35 = vpop.eup %571 }
  0xfc   :  { %591 = vrcp.f32 %v281_v29  ;;  %v574_v37 = vpop.eup %573 }
  0xfd   :  { %593 = vpow2.f32 %v264_v27  ;;  %v576_v11 = vpop.eup %575 }
  0xfe   :  { %595 = vrcp.f32 %v278_v33  ;;  %v279_v40 = vadd.f32 1.0, %v576_v11 }
  0xff   :  { %v578_v39 = vpop.eup %577 }
 0x100   :  { %v580_v42 = vpop.eup %579  ;;  %597 = vrcp.f32 %v279_v40  ;;  %v306_v51 = vmul.f32 %v578_v39, %v684_v14 }
 0x101   :  { %v582_v44 = vpop.eup %581  ;;  %599 = vpow2.f32 %v270_v38  ;;  %v314_v54 = vmul.f32 %v580_v42, %v687_v15  ;;  %v286_v15 = vadd.f32 1.0, %v572_v35 }
 0x102   :  { %v584_v47 = vpop.eup %583  ;;  %601 = vpow2.f32 %v250_v41  ;;  %v304_v58 = vmul.f32 %v582_v44, %v690_v18 }
 0x103   :  { %v586_v48 = vpop.eup %585  ;;  %603 = vpow2.f32 %v266_v43  ;;  %v312_v62 = vmul.f32 %v584_v47, %v693_v19 }
 0x104   :  { %v588_v49 = vpop.eup %587  ;;  %v307_v52 = vmul.f32 %v586_v48, %v698_v24  ;;  %605 = vrcp.f32 %v286_v15 }
 0x105   :  { %v590_v53 = vpop.eup %589  ;;  %v315_v56 = vmul.f32 %v588_v49, %v701_v25  ;;  %v276_v25 = vadd.f32 1.0, %v574_v37 }
 0x106   :  { %v592_v57 = vpop.eup %591  ;;  %v464_v59 = vpack.c.bf16 %v307_v52, %v306_v51  ;;  %v305_v60 = vmul.f32 %v590_v53, %v706_v30 }
 0x107   :  { %v594_v61 = vpop.eup %593  ;;  %v484_v63 = vpack.c.bf16 %v315_v56, %v314_v54  ;;  %v313_v14 = vmul.f32 %v592_v57, %v709_v31  ;;  %607 = vrcp.f32 %v276_v25 }
 0x108   :  { %496 = vst [vmem:[%s790_s3 + $0x8] sm:$0xff] %v464_v59   ;;  %v459_v24 = vpack.c.bf16 %v305_v60, %v304_v58  ;;  %v596_v1 = vpop.eup %595  ;;  %v284_v19 = vadd.f32 1.0, %v594_v61 }
 0x109   :  { %500 = vst [vmem:[%s790_s3 + $0x28] sm:$0xff] %v484_v63   ;;  %v479_v18 = vpack.c.bf16 %v313_v14, %v312_v62  ;;  %v310_v2 = vmul.f32 %v596_v1, %v716_v45 }
 0x10a   :  { %460 = vst [vmem:[%s790_s3] sm:$0xff] %v459_v24   ;;  %v598_v30 = vpop.eup %597  ;;  %609 = vrcp.f32 %v284_v19 }
 0x10b   :  { %499 = vst [vmem:[%s790_s3 + $0x20] sm:$0xff] %v479_v18   ;;  %v600_v31 = vpop.eup %599  ;;  %v311_v3 = vmul.f32 %v598_v30, %v727_v55 }
 0x10c   :  { %v602_v4 = vpop.eup %601  ;;  %v287_v5 = vadd.f32 1.0, %v600_v31 }
 0x10d   :  { %v604_v6 = vpop.eup %603  ;;  %v474_v7 = vpack.c.bf16 %v311_v3, %v310_v2  ;;  %v277_v8 = vadd.f32 1.0, %v602_v4 }
 0x10e   :  { %611 = vrcp.f32 %v287_v5  ;;  %v285_v9 = vadd.f32 1.0, %v604_v6  ;;  %v606_v10 = vpop.eup %605 }
 0x10f   :  { %498 = vst [vmem:[%s790_s3 + $0x18] sm:$0xff] %v474_v7   ;;  %613 = vrcp.f32 %v277_v8  ;;  %v318_v20 = vmul.f32 %v606_v10, %v719_v46 }
 0x110   :  { %615 = vrcp.f32 %v285_v9 }
 0x111   :  { %v608_v45 = vpop.eup %607 }
 0x112   :  { %v308_v26 = vmul.f32 %v608_v45, %v722_v50 }
 0x114   :  { %v610_v13 = vpop.eup %609 }
 0x115   :  { %v316_v28 = vmul.f32 %v610_v13, %v732_v0 }
 0x118   :  { %v612_v16 = vpop.eup %611 }
 0x119   :  { %v614_v55 = vpop.eup %613  ;;  %v319_v21 = vmul.f32 %v612_v16, %v736_v12 }
 0x11a   :  { %v616_v23 = vpop.eup %615  ;;  %v309_v27 = vmul.f32 %v614_v55, %v739_v17 }
 0x11b   :  { %v494_v29 = vpack.c.bf16 %v319_v21, %v318_v20  ;;  %v317_v32 = vmul.f32 %v616_v23, %v742_v22 }
 0x11c   :  { %v469_v33 = vpack.c.bf16 %v309_v27, %v308_v26 }
 0x11d   :  { %502 = vst [vmem:[%s790_s3 + $0x38] sm:$0xff] %v494_v29   ;;  %v489_v34 = vpack.c.bf16 %v317_v32, %v316_v28 }
 0x11e   :  { %497 = vst [vmem:[%s790_s3 + $0x10] sm:$0xff] %v469_v33  }
 0x11f   :  { %501 = vst [vmem:[%s790_s3 + $0x30] sm:$0xff] %v489_v34  }

// kernel: _lambda_.63
= control target key start
LH: loop header
LB: loop body
LE: loop exit
PB: predicated region body
PF: predicated region fallthrough
CT: control target
= control target key end

     0   :  { %vm204_vm0 = vcmask 261120   ;;  %s586_s1 = inlined_call_operand.vmem [shape: bf16[288,128], index: 1, kind: input, shape index: {}]   ;;  %s587_s0 = inlined_call_operand.vmem [shape: bf16[32,288], index: 0, kind: input, shape index: {}]   ;;  %s588_s2 = inlined_call_operand.vmem [shape: f32[1,128], index: 2, kind: input, shape index: {}]   ;;  %s589_s3 = inlined_call_operand.vmem [shape: bf16[32,128], index: 3, kind: output, shape index: {}]  }
   0x1   :  { %v443_v0 = vld [vmem:[%s586_s1 + $0x40] sm:$0xff]   ;;  %v445_v2 = vld [vmem:[%s586_s1 + $0x48] sm:$0xff]   ;;  %v447_v4 = vld [vmem:[%s586_s1 + $0x50] sm:$0xff]  }
   0x2   :  { %v444_v1 = vld [vmem:[%s586_s1] sm:$0xff]   ;;  %403 = vmatprep.subr.bf16.mxu0 %v443_v0  ;;  %v446_v3 = vld [vmem:[%s586_s1 + $0x8] sm:$0xff]   ;;  %v448_v5 = vld [vmem:[%s586_s1 + $0x10] sm:$0xff]  }
   0x3   :  { %404 = vmatpush3.bf16.msra.mxu0 %v444_v1  ;;  %v449_v6 = vld [vmem:[%s586_s1 + $0x58] sm:$0xff]   ;;  %v451_v8 = vld [vmem:[%s586_s1 + $0x60] sm:$0xff]   ;;  %v453_v11 = vld [vmem:[%s586_s1 + $0x68] sm:$0xff]  }
   0x4   :  { %405 = vmatprep.subr.bf16.mxu0 %v445_v2  ;;  %v450_v7 = vld [vmem:[%s586_s1 + $0x18] sm:$0xff]   ;;  %v452_v9 = vld [vmem:[%s586_s1 + $0x20] sm:$0xff]   ;;  %v454_v12 = vld [vmem:[%s586_s1 + $0x28] sm:$0xff]  }
   0x5   :  { %v458_v10 = vld [vmem:[%s586_s1 + $0x80] sm:$0xff]   ;;  %v455_v13 = vld [vmem:[%s586_s1 + $0x70] sm:$0xff]   ;;  %v463_v15 = vld [vmem:[%s586_s1 + $0x88] sm:$0xff]  }
   0x6   :  { %435 = vmatprep.subr.bf16.mxu1 %v458_v10  ;;  %v462_v14 = vld [vmem:[%s587_s0 + $0x4] ss:$12 sps:$4 sm:$0xff]   ;;  %v464_v16 = vld [vmem:[%s587_s0 + $0x8] ss:$12 sps:$4 sm:$0xff]   ;;  %v465_v17 = vld [vmem:[%s587_s0 + $0x20] ss:$12 sps:$4 sm:$0xff]  }
   0x7   :  { %406 = vmatpush3.bf16.msra.mxu0 %v446_v3  ;;  %436 = vmatpush3.bf16.msra.mxu1 %v458_v10  ;;  %v456_v18 = vld [vmem:[%s586_s1 + $0x30] sm:$0xff]   ;;  %v457_v19 = vld [vmem:[%s586_s1 + $0x78] sm:$0xff]   ;;  %v460_v21 = vld [vmem:[%s587_s0] ss:$12 sps:$4 sm:$0xff]  }
   0x8   :  { %407 = vmatprep.subr.bf16.mxu0 %v447_v4  ;;  %243 = vmatprep.mubr.bf16.mxu0 %v462_v14  ;;  %v459_v20 = vld [vmem:[%s586_s1 + $0x38] sm:$0xff]   ;;  %v357_v30 = vld [vmem:[%s588_s2] ss:$0 sm:$0xff] }
   0x9   :  { %437 = vmatprep.subr.bf16.mxu1 %v463_v15  ;;  %439 = vmatprep.mubr.msk.bf16.mxu1 %vm204_vm0, %v464_v16  ;;  %v466_v22 = vld [vmem:[%s587_s0 + $0x1c] ss:$12 sps:$4 sm:$0xff]   ;;  %v468_v23 = vld [vmem:[%s587_s0 + $0x18] ss:$12 sps:$4 sm:$0xff]  }
   0xb   :  { %408 = vmatpush3.bf16.msra.mxu0 %v448_v5  ;;  %438 = vmatpush3.bf16.msra.mxu1 %v463_v15 }
   0xc   :  { %409 = vmatprep.subr.bf16.mxu0 %v449_v6 }
   0xe   :  { %440 = vmatmul.mubr.msk.bf16.vlgmr.msra.gmra.mrb[0].mxu1 %vm204_vm0, %v465_v17 }
   0xf   :  { %410 = vmatpush3.bf16.msra.mxu0 %v450_v7 }
  0x10   :  { %411 = vmatprep.subr.bf16.mxu0 %v451_v8 }
  0x13   :  { %412 = vmatpush3.bf16.msra.mxu0 %v452_v9 }
  0x14   :  { %413 = vmatprep.subr.bf16.mxu0 %v453_v11 }
  0x17   :  { %414 = vmatpush3.bf16.msra.mxu0 %v454_v12 }
  0x18   :  { %415 = vmatprep.subr.bf16.mxu0 %v455_v13 }
  0x1b   :  { %416 = vmatpush3.bf16.msra.mxu0 %v456_v18 }
  0x1c   :  { %417 = vmatprep.subr.bf16.mxu0 %v457_v19 }
  0x1f   :  { %418 = vmatpush3.bf16.msra.mxu0 %v459_v20 }
  0x22   :  { %244 = vmatmul.mubr.bf16.vlgmr.msra.gmra.mrb[0].mxu0 %v460_v21 }
  0x23   :  { %251 = vmatprep.mubr.bf16.mxu0 %v466_v22 }
  0x2a   :  { %252 = vmatmul.mubr.bf16.gmra.mrb[4].mxu0 %v468_v23 }
  0xe1   :  { %v441_v24 = vpop.f32.mrb[0].mxu1 }
  0xe2   :  { %v294_v25 = vpop.f32.mrb[1].mxu1 }
  0xe3   :  { %v442_v26 = vpop.f32.mrb[2].mxu1 }
  0xe4   :  { %v297_v27 = vpop.f32.mrb[3].mxu1 }
  0xf5   :  { %v419_v28 = vpop.f32.mrb[0].mxu0 }
  0xf6   :  { %v420_v29 = vpop.f32.mrb[1].mxu0 }
  0xf7   :  { %v421_v31 = vadd.f32 %v420_v29, %v419_v28  ;;  %v422_v32 = vpop.f32.mrb[2].mxu0 }
  0xf8   :  { %v423_v33 = vpop.f32.mrb[3].mxu0 }
  0xf9   :  { %v424_v34 = vadd.f32 %v423_v33, %v422_v32  ;;  %v246_v35 = vadd.f32 %v421_v31, %v357_v30 }
  0xfb   :  { %v295_v36 = vadd.f32 %v294_v25, %v246_v35  ;;  %v249_v37 = vadd.f32 %v424_v34, %v357_v30 }
  0xfd   :  { %v309_v38 = vsub.f32 0.0, %v295_v36  ;;  %v298_v39 = vadd.f32 %v297_v27, %v249_v37  ;;  %v425_v40 = vpop.f32.mrb[4].mxu0 }
  0xfe   :  { %v426_v41 = vpop.f32.mrb[5].mxu0 }
  0xff   :  { %v313_v42 = vmul.f32 1.442695, %v309_v38  ;;  %v310_v43 = vsub.f32 0.0, %v298_v39  ;;  %v427_v44 = vadd.f32 %v426_v41, %v425_v40  ;;  %v428_v45 = vpop.f32.mrb[6].mxu0 }
 0x100   :  { %v429_v46 = vpop.f32.mrb[7].mxu0 }
 0x101   :  { %469 = vpow2.f32 %v313_v42  ;;  %v315_v47 = vmul.f32 1.442695, %v310_v43  ;;  %v254_v48 = vadd.f32 %v427_v44, %v357_v30  ;;  %v430_v49 = vadd.f32 %v429_v46, %v428_v45 }
 0x103   :  { %471 = vpow2.f32 %v315_v47  ;;  %v303_v50 = vadd.f32 %v441_v24, %v254_v48  ;;  %v257_v51 = vadd.f32 %v430_v49, %v357_v30 }
 0x105   :  { %v311_v52 = vsub.f32 0.0, %v303_v50  ;;  %v306_v53 = vadd.f32 %v442_v26, %v257_v51 }
 0x107   :  { %v317_v54 = vmul.f32 1.442695, %v311_v52  ;;  %v312_v55 = vsub.f32 0.0, %v306_v53 }
 0x109   :  { %473 = vpow2.f32 %v317_v54  ;;  %v319_v56 = vmul.f32 1.442695, %v312_v55 }
 0x10b   :  { %v470_v57 = vpop.eup %469  ;;  %475 = vpow2.f32 %v319_v56 }
 0x10c   :  { %v321_v58 = vadd.f32 1.0, %v470_v57 }
 0x10d   :  { %v472_v59 = vpop.eup %471 }
 0x10e   :  { %477 = vrcp.f32 %v321_v58  ;;  %v322_v60 = vadd.f32 1.0, %v472_v59 }
 0x110   :  { %479 = vrcp.f32 %v322_v60 }
 0x113   :  { %v474_v61 = vpop.eup %473 }
 0x114   :  { %v323_v62 = vadd.f32 1.0, %v474_v61 }
 0x115   :  { %v476_v63 = vpop.eup %475 }
 0x116   :  { %481 = vrcp.f32 %v323_v62  ;;  %v324_v0 = vadd.f32 1.0, %v476_v63 }
 0x118   :  { %v478_v1 = vpop.eup %477  ;;  %483 = vrcp.f32 %v324_v0 }
 0x119   :  { %v329_v3 = vmul.f32 %v478_v1, %v295_v36 }
 0x11a   :  { %v480_v2 = vpop.eup %479 }
 0x11b   :  { %v330_v4 = vmul.f32 %v480_v2, %v298_v39 }
 0x11d   :  { %v395_v5 = vpack.c.bf16 %v330_v4, %v329_v3 }
 0x11f   :  { %396 = vst [vmem:[%s589_s3] sm:$0xff] %v395_v5  }
 0x120   :  { %v482_v6 = vpop.eup %481 }
 0x121   :  { %v331_v8 = vmul.f32 %v482_v6, %v303_v50 }
 0x122   :  { %v484_v7 = vpop.eup %483 }
 0x123   :  { %v332_v9 = vmul.f32 %v484_v7, %v306_v53 }
 0x125   :  { %v400_v10 = vpack.c.bf16 %v332_v9, %v331_v8 }
 0x127   :  { %402 = vst [vmem:[%s589_s3 + $0x8] sm:$0xff] %v400_v10  }

// kernel: _lambda_.65
= control target key start
LH: loop header
LB: loop body
LE: loop exit
PB: predicated region body
PF: predicated region fallthrough
CT: control target
= control target key end

     0   :  { %vm52_vm0 = vcmask 261120   ;;  %s255_s1 = inlined_call_operand.vmem [shape: bf16[32,128], index: 1, kind: input, shape index: {}]   ;;  %s256_s0 = inlined_call_operand.vmem [shape: bf16[32,32], index: 0, kind: input, shape index: {}]   ;;  %s257_s2 = inlined_call_operand.vmem [shape: f32[1,128], index: 2, kind: input, shape index: {}]   ;;  %s258_s3 = inlined_call_operand.vmem [shape: bf16[32,128], index: 3, kind: output, shape index: {}]  }
   0x1   :  { %v194_v0 = vld [vmem:[%s255_s1] sm:$0xff]   ;;  %v195_v1 = vld [vmem:[%s255_s1 + $0x8] sm:$0xff]  }
   0x2   :  { %186 = vmatprep.subr.bf16.mxu0 %v194_v0  ;;  %v196_v2 = vld [vmem:[%s256_s0] sm:$0xff]   ;;  %v197_v3 = vld [vmem:[%s256_s0 + $0x8] sm:$0xff]  }
   0x3   :  { %187 = vmatpush3.bf16.msra.mxu0 %v194_v0  ;;  %190 = vmatprep.mubr.msk.bf16.mxu0 %vm52_vm0, %v196_v2  ;;  %v156_v4 = vld [vmem:[%s257_s2] ss:$0 sm:$0xff] }
   0x4   :  { %188 = vmatprep.subr.bf16.mxu0 %v195_v1 }
   0x7   :  { %189 = vmatpush3.bf16.msra.mxu0 %v195_v1 }
   0xa   :  { %191 = vmatmul.mubr.msk.bf16.vlgmr.msra.gmra.mrb[0].mxu0 %vm52_vm0, %v197_v3 }
  0xdd   :  { %v192_v5 = vpop.f32.mrb[0].mxu0 }
  0xde   :  { %v102_v6 = vadd.f32 %v192_v5, %v156_v4  ;;  %v93_v7 = vpop.f32.mrb[1].mxu0 }
  0xdf   :  { %v94_v8 = vadd.f32 %v156_v4, %v93_v7  ;;  %v193_v9 = vpop.f32.mrb[2].mxu0 }
  0xe0   :  { %v110_v10 = vsub.f32 0.0, %v102_v6  ;;  %v105_v11 = vadd.f32 %v193_v9, %v156_v4  ;;  %v96_v12 = vpop.f32.mrb[3].mxu0 }
  0xe1   :  { %v108_v13 = vsub.f32 0.0, %v94_v8  ;;  %v97_v14 = vadd.f32 %v156_v4, %v96_v12 }
  0xe2   :  { %v116_v15 = vmul.f32 1.442695, %v110_v10  ;;  %v111_v16 = vsub.f32 0.0, %v105_v11 }
  0xe3   :  { %v112_v17 = vmul.f32 1.442695, %v108_v13  ;;  %v109_v18 = vsub.f32 0.0, %v97_v14 }
  0xe4   :  { %198 = vpow2.f32 %v116_v15  ;;  %v118_v19 = vmul.f32 1.442695, %v111_v16 }
  0xe5   :  { %200 = vpow2.f32 %v112_v17  ;;  %v114_v20 = vmul.f32 1.442695, %v109_v18 }
  0xe6   :  { %202 = vpow2.f32 %v118_v19 }
  0xe7   :  { %204 = vpow2.f32 %v114_v20 }
  0xee   :  { %v199_v21 = vpop.eup %198 }
  0xef   :  { %v201_v22 = vpop.eup %200  ;;  %v122_v23 = vadd.f32 1.0, %v199_v21 }
  0xf0   :  { %v203_v24 = vpop.eup %202  ;;  %v120_v25 = vadd.f32 1.0, %v201_v22 }
  0xf1   :  { %v205_v26 = vpop.eup %204  ;;  %206 = vrcp.f32 %v122_v23  ;;  %v123_v27 = vadd.f32 1.0, %v203_v24 }
  0xf2   :  { %208 = vrcp.f32 %v120_v25  ;;  %v121_v28 = vadd.f32 1.0, %v205_v26 }
  0xf3   :  { %210 = vrcp.f32 %v123_v27 }
  0xf4   :  { %212 = vrcp.f32 %v121_v28 }
  0xfb   :  { %v207_v29 = vpop.eup %206 }
  0xfc   :  { %v209_v30 = vpop.eup %208  ;;  %v130_v33 = vmul.f32 %v207_v29, %v102_v6 }
  0xfd   :  { %v211_v31 = vpop.eup %210  ;;  %v128_v35 = vmul.f32 %v209_v30, %v94_v8 }
  0xfe   :  { %v213_v32 = vpop.eup %212  ;;  %v131_v34 = vmul.f32 %v211_v31, %v105_v11 }
  0xff   :  { %v129_v36 = vmul.f32 %v213_v32, %v97_v14 }
 0x100   :  { %v179_v37 = vpack.c.bf16 %v131_v34, %v130_v33 }
 0x101   :  { %v174_v38 = vpack.c.bf16 %v129_v36, %v128_v35 }
 0x102   :  { %181 = vst [vmem:[%s258_s3 + $0x8] sm:$0xff] %v179_v37  }
 0x103   :  { %175 = vst [vmem:[%s258_s3] sm:$0xff] %v174_v38  }

// kernel: _lambda_.64
= control target key start
LH: loop header
LB: loop body
LE: loop exit
PB: predicated region body
PF: predicated region fallthrough
CT: control target
= control target key end

     0   :  { %vm68_vm0 = vcmask 523264   ;;  %s287_s1 = inlined_call_operand.vmem [shape: bf16[64,128], index: 1, kind: input, shape index: {}]   ;;  %s288_s0 = inlined_call_operand.vmem [shape: bf16[32,64], index: 0, kind: input, shape index: {}]   ;;  %s289_s2 = inlined_call_operand.vmem [shape: f32[1,128], index: 2, kind: input, shape index: {}]   ;;  %s290_s3 = inlined_call_operand.vmem [shape: bf16[32,128], index: 3, kind: output, shape index: {}]  }
   0x1   :  { %v218_v0 = vld [vmem:[%s287_s1] sm:$0xff]   ;;  %v219_v1 = vld [vmem:[%s287_s1 + $0x8] sm:$0xff]   ;;  %v220_v2 = vld [vmem:[%s287_s1 + $0x10] sm:$0xff]  }
   0x2   :  { %206 = vmatprep.subr.bf16.mxu0 %v218_v0  ;;  %v222_v3 = vld [vmem:[%s288_s0] sm:$0xff]   ;;  %v221_v4 = vld [vmem:[%s287_s1 + $0x18] sm:$0xff]   ;;  %v223_v5 = vld [vmem:[%s288_s0 + $0x8] sm:$0xff]  }
   0x3   :  { %207 = vmatpush3.bf16.msra.mxu0 %v218_v0  ;;  %214 = vmatprep.mubr.msk.bf16.mxu0 %vm68_vm0, %v222_v3  ;;  %v172_v6 = vld [vmem:[%s289_s2] ss:$0 sm:$0xff] }
   0x4   :  { %208 = vmatprep.subr.bf16.mxu0 %v219_v1 }
   0x7   :  { %209 = vmatpush3.bf16.msra.mxu0 %v219_v1 }
   0x8   :  { %210 = vmatprep.subr.bf16.mxu0 %v220_v2 }
   0xb   :  { %211 = vmatpush3.bf16.msra.mxu0 %v220_v2 }
   0xc   :  { %212 = vmatprep.subr.bf16.mxu0 %v221_v4 }
   0xf   :  { %213 = vmatpush3.bf16.msra.mxu0 %v221_v4 }
  0x12   :  { %215 = vmatmul.mubr.msk.bf16.vlgmr.msra.gmra.mrb[0].mxu0 %vm68_vm0, %v223_v5 }
  0xe5   :  { %v216_v7 = vpop.f32.mrb[0].mxu0 }
  0xe6   :  { %v118_v8 = vadd.f32 %v216_v7, %v172_v6  ;;  %v109_v9 = vpop.f32.mrb[1].mxu0 }
  0xe7   :  { %v110_v10 = vadd.f32 %v172_v6, %v109_v9  ;;  %v217_v11 = vpop.f32.mrb[2].mxu0 }
  0xe8   :  { %v126_v12 = vsub.f32 0.0, %v118_v8  ;;  %v121_v13 = vadd.f32 %v217_v11, %v172_v6  ;;  %v112_v14 = vpop.f32.mrb[3].mxu0 }
  0xe9   :  { %v124_v15 = vsub.f32 0.0, %v110_v10  ;;  %v113_v16 = vadd.f32 %v172_v6, %v112_v14 }
  0xea   :  { %v132_v17 = vmul.f32 1.442695, %v126_v12  ;;  %v127_v18 = vsub.f32 0.0, %v121_v13 }
  0xeb   :  { %v128_v19 = vmul.f32 1.442695, %v124_v15  ;;  %v125_v20 = vsub.f32 0.0, %v113_v16 }
  0xec   :  { %224 = vpow2.f32 %v132_v17  ;;  %v134_v21 = vmul.f32 1.442695, %v127_v18 }
  0xed   :  { %226 = vpow2.f32 %v128_v19  ;;  %v130_v22 = vmul.f32 1.442695, %v125_v20 }
  0xee   :  { %228 = vpow2.f32 %v134_v21 }
  0xef   :  { %230 = vpow2.f32 %v130_v22 }
  0xf6   :  { %v225_v23 = vpop.eup %224 }
  0xf7   :  { %v227_v24 = vpop.eup %226  ;;  %v138_v25 = vadd.f32 1.0, %v225_v23 }
  0xf8   :  { %v229_v26 = vpop.eup %228  ;;  %v136_v27 = vadd.f32 1.0, %v227_v24 }
  0xf9   :  { %v231_v28 = vpop.eup %230  ;;  %232 = vrcp.f32 %v138_v25  ;;  %v139_v29 = vadd.f32 1.0, %v229_v26 }
  0xfa   :  { %234 = vrcp.f32 %v136_v27  ;;  %v137_v30 = vadd.f32 1.0, %v231_v28 }
  0xfb   :  { %236 = vrcp.f32 %v139_v29 }
  0xfc   :  { %238 = vrcp.f32 %v137_v30 }
 0x103   :  { %v233_v31 = vpop.eup %232 }
 0x104   :  { %v235_v32 = vpop.eup %234  ;;  %v146_v35 = vmul.f32 %v233_v31, %v118_v8 }
 0x105   :  { %v237_v33 = vpop.eup %236  ;;  %v144_v37 = vmul.f32 %v235_v32, %v110_v10 }
 0x106   :  { %v239_v34 = vpop.eup %238  ;;  %v147_v36 = vmul.f32 %v237_v33, %v121_v13 }
 0x107   :  { %v145_v38 = vmul.f32 %v239_v34, %v113_v16 }
 0x108   :  { %v197_v39 = vpack.c.bf16 %v147_v36, %v146_v35 }
 0x109   :  { %v192_v40 = vpack.c.bf16 %v145_v38, %v144_v37 }
 0x10a   :  { %199 = vst [vmem:[%s290_s3 + $0x8] sm:$0xff] %v197_v39  }
 0x10b   :  { %193 = vst [vmem:[%s290_s3] sm:$0xff] %v192_v40  }

// kernel: _lambda_.72
= control target key start
LH: loop header
LB: loop body
LE: loop exit
PB: predicated region body
PF: predicated region fallthrough
CT: control target
= control target key end

     0   :  { %vm84_vm0 = vcmask 785408   ;;  %s321_s1 = inlined_call_operand.vmem [shape: bf16[96,128], index: 1, kind: input, shape index: {}]   ;;  %s322_s0 = inlined_call_operand.vmem [shape: bf16[32,96], index: 0, kind: input, shape index: {}]   ;;  %s323_s2 = inlined_call_operand.vmem [shape: f32[1,128], index: 2, kind: input, shape index: {}]   ;;  %s324_s3 = inlined_call_operand.vmem [shape: bf16[32,128], index: 3, kind: output, shape index: {}]  }
   0x1   :  { %v242_v0 = vld [vmem:[%s321_s1] sm:$0xff]   ;;  %v243_v1 = vld [vmem:[%s321_s1 + $0x8] sm:$0xff]   ;;  %v244_v2 = vld [vmem:[%s321_s1 + $0x10] sm:$0xff]  }
   0x2   :  { %226 = vmatprep.subr.bf16.mxu0 %v242_v0  ;;  %v248_v3 = vld [vmem:[%s322_s0] sm:$0xff]   ;;  %v245_v4 = vld [vmem:[%s321_s1 + $0x18] sm:$0xff]   ;;  %v247_v6 = vld [vmem:[%s321_s1 + $0x28] sm:$0xff]  }
   0x3   :  { %227 = vmatpush3.bf16.msra.mxu0 %v242_v0  ;;  %238 = vmatprep.mubr.msk.bf16.mxu0 %vm84_vm0, %v248_v3  ;;  %v246_v5 = vld [vmem:[%s321_s1 + $0x20] sm:$0xff]   ;;  %v249_v7 = vld [vmem:[%s322_s0 + $0x8] sm:$0xff]  }
   0x4   :  { %228 = vmatprep.subr.bf16.mxu0 %v243_v1  ;;  %v188_v8 = vld [vmem:[%s323_s2] ss:$0 sm:$0xff] }
   0x7   :  { %229 = vmatpush3.bf16.msra.mxu0 %v243_v1 }
   0x8   :  { %230 = vmatprep.subr.bf16.mxu0 %v244_v2 }
   0xb   :  { %231 = vmatpush3.bf16.msra.mxu0 %v244_v2 }
   0xc   :  { %232 = vmatprep.subr.bf16.mxu0 %v245_v4 }
   0xf   :  { %233 = vmatpush3.bf16.msra.mxu0 %v245_v4 }
  0x10   :  { %234 = vmatprep.subr.bf16.mxu0 %v246_v5 }
  0x13   :  { %235 = vmatpush3.bf16.msra.mxu0 %v246_v5 }
  0x14   :  { %236 = vmatprep.subr.bf16.mxu0 %v247_v6 }
  0x17   :  { %237 = vmatpush3.bf16.msra.mxu0 %v247_v6 }
  0x1a   :  { %239 = vmatmul.mubr.msk.bf16.vlgmr.msra.gmra.mrb[0].mxu0 %vm84_vm0, %v249_v7 }
  0xed   :  { %v240_v9 = vpop.f32.mrb[0].mxu0 }
  0xee   :  { %v134_v10 = vadd.f32 %v240_v9, %v188_v8  ;;  %v125_v11 = vpop.f32.mrb[1].mxu0 }
  0xef   :  { %v126_v12 = vadd.f32 %v188_v8, %v125_v11  ;;  %v241_v13 = vpop.f32.mrb[2].mxu0 }
  0xf0   :  { %v142_v14 = vsub.f32 0.0, %v134_v10  ;;  %v137_v15 = vadd.f32 %v241_v13, %v188_v8  ;;  %v128_v16 = vpop.f32.mrb[3].mxu0 }
  0xf1   :  { %v140_v17 = vsub.f32 0.0, %v126_v12  ;;  %v129_v18 = vadd.f32 %v188_v8, %v128_v16 }
  0xf2   :  { %v148_v19 = vmul.f32 1.442695, %v142_v14  ;;  %v143_v20 = vsub.f32 0.0, %v137_v15 }
  0xf3   :  { %v144_v21 = vmul.f32 1.442695, %v140_v17  ;;  %v141_v22 = vsub.f32 0.0, %v129_v18 }
  0xf4   :  { %250 = vpow2.f32 %v148_v19  ;;  %v150_v23 = vmul.f32 1.442695, %v143_v20 }
  0xf5   :  { %252 = vpow2.f32 %v144_v21  ;;  %v146_v24 = vmul.f32 1.442695, %v141_v22 }
  0xf6   :  { %254 = vpow2.f32 %v150_v23 }
  0xf7   :  { %256 = vpow2.f32 %v146_v24 }
  0xfe   :  { %v251_v25 = vpop.eup %250 }
  0xff   :  { %v253_v26 = vpop.eup %252  ;;  %v154_v27 = vadd.f32 1.0, %v251_v25 }
 0x100   :  { %v255_v28 = vpop.eup %254  ;;  %v152_v29 = vadd.f32 1.0, %v253_v26 }
 0x101   :  { %v257_v30 = vpop.eup %256  ;;  %258 = vrcp.f32 %v154_v27  ;;  %v155_v31 = vadd.f32 1.0, %v255_v28 }
 0x102   :  { %260 = vrcp.f32 %v152_v29  ;;  %v153_v32 = vadd.f32 1.0, %v257_v30 }
 0x103   :  { %262 = vrcp.f32 %v155_v31 }
 0x104   :  { %264 = vrcp.f32 %v153_v32 }
 0x10b   :  { %v259_v33 = vpop.eup %258 }
 0x10c   :  { %v261_v34 = vpop.eup %260  ;;  %v162_v37 = vmul.f32 %v259_v33, %v134_v10 }
 0x10d   :  { %v263_v35 = vpop.eup %262  ;;  %v160_v39 = vmul.f32 %v261_v34, %v126_v12 }
 0x10e   :  { %v265_v36 = vpop.eup %264  ;;  %v163_v38 = vmul.f32 %v263_v35, %v137_v15 }
 0x10f   :  { %v161_v40 = vmul.f32 %v265_v36, %v129_v18 }
 0x110   :  { %v215_v41 = vpack.c.bf16 %v163_v38, %v162_v37 }
 0x111   :  { %v210_v42 = vpack.c.bf16 %v161_v40, %v160_v39 }
 0x112   :  { %217 = vst [vmem:[%s324_s3 + $0x8] sm:$0xff] %v215_v41  }
 0x113   :  { %211 = vst [vmem:[%s324_s3] sm:$0xff] %v210_v42  }

// kernel: _lambda_.77
= control target key start
LH: loop header
LB: loop body
LE: loop exit
PB: predicated region body
PF: predicated region fallthrough
CT: control target
= control target key end

     0   :  { %v191_v0 = vmov 0.0   ;;  %vm192_vm0 = vmmov 0   ;;  %s246_s1 = inlined_call_operand.vmem [shape: bf16[128,128], index: 1, kind: input, shape index: {}]   ;;  %s247_s0 = inlined_call_operand.vmem [shape: bf16[8,128], index: 0, kind: input, shape index: {}]   ;;  %s248_s2 = inlined_call_operand.vmem [shape: f32[1,128], index: 2, kind: input, shape index: {}]   ;;  %s249_s3 = inlined_call_operand.vmem [shape: bf16[8,128], index: 3, kind: output, shape index: {}]  }
   0x1   :  { %157 = vmatprep.subr.bf16.mxu0 %v191_v0  ;;  %v179_v1 = vld [vmem:[%s246_s1] sm:$0xff]   ;;  %173 = vmatprep.mubr.msk.bf16.mxu0 %vm192_vm0, %v191_v0  ;;  %v180_v2 = vld [vmem:[%s246_s1 + $0x8] sm:$0xff]   ;;  %v181_v3 = vld [vmem:[%s246_s1 + $0x10] sm:$0xff]  }
   0x2   :  { %158 = vmatpush3.bf16.msra.mxu0 %v179_v1  ;;  %v182_v4 = vld [vmem:[%s246_s1 + $0x18] sm:$0xff]   ;;  %v183_v5 = vld [vmem:[%s246_s1 + $0x20] sm:$0xff]   ;;  %v184_v6 = vld [vmem:[%s246_s1 + $0x28] sm:$0xff]  }
   0x3   :  { %159 = vmatprep.subr.bf16.mxu0 %v191_v0  ;;  %v185_v7 = vld [vmem:[%s246_s1 + $0x30] sm:$0xff]   ;;  %v186_v8 = vld [vmem:[%s246_s1 + $0x38] sm:$0xff]   ;;  %v15_v9 = vld [vmem:[%s247_s0] sm:$0xf] }
   0x4   :  { %v139_v10 = vld [vmem:[%s248_s2] ss:$0 sm:$0xff] }
   0x6   :  { %160 = vmatpush3.bf16.msra.mxu0 %v180_v2 }
   0x7   :  { %161 = vmatprep.subr.bf16.mxu0 %v191_v0 }
   0xa   :  { %162 = vmatpush3.bf16.msra.mxu0 %v181_v3 }
   0xb   :  { %163 = vmatprep.subr.bf16.mxu0 %v191_v0 }
   0xe   :  { %164 = vmatpush3.bf16.msra.mxu0 %v182_v4 }
   0xf   :  { %165 = vmatprep.subr.bf16.mxu0 %v191_v0 }
  0x12   :  { %166 = vmatpush3.bf16.msra.mxu0 %v183_v5 }
  0x13   :  { %167 = vmatprep.subr.bf16.mxu0 %v191_v0 }
  0x16   :  { %168 = vmatpush3.bf16.msra.mxu0 %v184_v6 }
  0x17   :  { %169 = vmatprep.subr.bf16.mxu0 %v191_v0 }
  0x1a   :  { %170 = vmatpush3.bf16.msra.mxu0 %v185_v7 }
  0x1b   :  { %171 = vmatprep.subr.bf16.mxu0 %v191_v0 }
  0x1e   :  { %172 = vmatpush3.bf16.msra.mxu0 %v186_v8 }
  0x21   :  { %174 = vmatmul.mubr.bf16.vlgmr.msra.gmra.mrb[0].mxu0 %v15_v9 }
  0xf4   :  { %v121_v11 = vpop.f32.mrb[0].mxu0 }
  0xf5   :  { %v122_v12 = vadd.f32 %v139_v10, %v121_v11  ;;  %v175_v13 = vpop.f32.mrb[1].mxu0 }
  0xf6   :  { %v124_v14 = vpop.f32.mrb[2].mxu0 }
  0xf7   :  { %v127_v15 = vsub.f32 0.0, %v122_v12  ;;  %v176_v16 = vpop.f32.mrb[3].mxu0 }
  0xf9   :  { %v128_v17 = vmul.f32 1.442695, %v127_v15 }
  0xfb   :  { %187 = vpow2.f32 %v128_v17 }
 0x105   :  { %v188_v18 = vpop.eup %187 }
 0x106   :  { %v130_v19 = vadd.f32 1.0, %v188_v18 }
 0x108   :  { %189 = vrcp.f32 %v130_v19 }
 0x112   :  { %v190_v20 = vpop.eup %189 }
 0x113   :  { %v132_v21 = vmul.f32 %v190_v20, %v122_v12 }
 0x115   :  { %v133_v22 = vpack.c.bf16 %v132_v21, %v132_v21 }
 0x117   :  { %134 = vst [vmem:[%s249_s3] sm:$0xf] %v133_v22 }

// kernel: _lambda_.78
= control target key start
LH: loop header
LB: loop body
LE: loop exit
PB: predicated region body
PF: predicated region fallthrough
CT: control target
= control target key end

     0   :  { %v144_v0 = vmov 0.0   ;;  %vm145_vm0 = vmmov 0   ;;  %vm55_vm1 = vcmask 523264   ;;  %s187_s1 = inlined_call_operand.vmem [shape: bf16[64,128], index: 1, kind: input, shape index: {}]   ;;  %s188_s0 = inlined_call_operand.vmem [shape: bf16[8,64], index: 0, kind: input, shape index: {}]   ;;  %s189_s2 = inlined_call_operand.vmem [shape: f32[1,128], index: 2, kind: input, shape index: {}]   ;;  %s190_s3 = inlined_call_operand.vmem [shape: bf16[8,128], index: 3, kind: output, shape index: {}]  }
   0x1   :  { %122 = vmatprep.subr.bf16.mxu0 %v144_v0  ;;  %v136_v1 = vld [vmem:[%s187_s1] sm:$0xff]   ;;  %130 = vmatprep.mubr.msk.bf16.mxu0 %vm145_vm0, %v144_v0  ;;  %v137_v2 = vld [vmem:[%s187_s1 + $0x8] sm:$0xff]   ;;  %v138_v3 = vld [vmem:[%s187_s1 + $0x10] sm:$0xff]  }
   0x2   :  { %123 = vmatpush3.bf16.msra.mxu0 %v136_v1  ;;  %v139_v4 = vld [vmem:[%s187_s1 + $0x18] sm:$0xff]   ;;  %v15_v5 = vld [vmem:[%s188_s0] sm:$0xf] }
   0x3   :  { %124 = vmatprep.subr.bf16.mxu0 %v144_v0  ;;  %v111_v6 = vld [vmem:[%s189_s2] ss:$0 sm:$0xff] }
   0x6   :  { %125 = vmatpush3.bf16.msra.mxu0 %v137_v2 }
   0x7   :  { %126 = vmatprep.subr.bf16.mxu0 %v144_v0 }
   0xa   :  { %127 = vmatpush3.bf16.msra.mxu0 %v138_v3 }
   0xb   :  { %128 = vmatprep.subr.bf16.mxu0 %v144_v0 }
   0xe   :  { %129 = vmatpush3.bf16.msra.mxu0 %v139_v4 }
  0x11   :  { %131 = vmatmul.mubr.msk.bf16.vlgmr.msra.gmra.mrb[0].mxu0 %vm55_vm1, %v15_v5 }
  0xe4   :  { %v93_v7 = vpop.f32.mrb[0].mxu0 }
  0xe5   :  { %v94_v8 = vadd.f32 %v111_v6, %v93_v7  ;;  %v132_v9 = vpop.f32.mrb[1].mxu0 }
  0xe6   :  { %v96_v10 = vpop.f32.mrb[2].mxu0 }
  0xe7   :  { %v99_v11 = vsub.f32 0.0, %v94_v8  ;;  %v133_v12 = vpop.f32.mrb[3].mxu0 }
  0xe9   :  { %v100_v13 = vmul.f32 1.442695, %v99_v11 }
  0xeb   :  { %140 = vpow2.f32 %v100_v13 }
  0xf5   :  { %v141_v14 = vpop.eup %140 }
  0xf6   :  { %v102_v15 = vadd.f32 1.0, %v141_v14 }
  0xf8   :  { %142 = vrcp.f32 %v102_v15 }
 0x102   :  { %v143_v16 = vpop.eup %142 }
 0x103   :  { %v104_v17 = vmul.f32 %v143_v16, %v94_v8 }
 0x105   :  { %v105_v18 = vpack.c.bf16 %v104_v17, %v104_v17 }
 0x107   :  { %106 = vst [vmem:[%s190_s3] sm:$0xf] %v105_v18 }

// kernel: _lambda_.76
= control target key start
LH: loop header
LB: loop body
LE: loop exit
PB: predicated region body
PF: predicated region fallthrough
CT: control target
= control target key end

     0   :  { %v617_v35 = vmov 0.0   ;;  %vm618_vm0 = vmmov 0   ;;  %vm330_vm1 = vcmask 523264   ;;  %s762_s1 = inlined_call_operand.vmem [shape: bf16[576,128], index: 1, kind: input, shape index: {}]   ;;  %s763_s0 = inlined_call_operand.vmem [shape: bf16[8,576], index: 0, kind: input, shape index: {}]   ;;  %s764_s2 = inlined_call_operand.vmem [shape: f32[1,128], index: 2, kind: input, shape index: {}]   ;;  %s765_s3 = inlined_call_operand.vmem [shape: bf16[8,128], index: 3, kind: output, shape index: {}]  }
   0x1   :  { %v572_v0 = vld [vmem:[%s762_s1 + $0x40] sm:$0xff]   ;;  %v576_v4 = vld [vmem:[%s762_s1 + $0x48] sm:$0xff]   ;;  %v580_v8 = vld [vmem:[%s762_s1 + $0x50] sm:$0xff]  }
   0x2   :  { %v573_v1 = vld [vmem:[%s762_s1] sm:$0xff]   ;;  %509 = vmatprep.subr.bf16.mxu0 %v572_v0  ;;  %v577_v5 = vld [vmem:[%s762_s1 + $0x8] sm:$0xff]   ;;  %v581_v9 = vld [vmem:[%s762_s1 + $0x10] sm:$0xff]  }
   0x3   :  { %v574_v2 = vld [vmem:[%s762_s1 + $0xc0] sm:$0xff]   ;;  %510 = vmatpush3.bf16.msra.mxu0 %v573_v1  ;;  %v578_v6 = vld [vmem:[%s762_s1 + $0xc8] sm:$0xff]   ;;  %v582_v10 = vld [vmem:[%s762_s1 + $0xd0] sm:$0xff]  }
   0x4   :  { %v575_v3 = vld [vmem:[%s762_s1 + $0x80] sm:$0xff]   ;;  %531 = vmatprep.subr.bf16.mxu1 %v574_v2  ;;  %511 = vmatprep.subr.bf16.mxu0 %v576_v4  ;;  %v579_v7 = vld [vmem:[%s762_s1 + $0x88] sm:$0xff]   ;;  %v583_v11 = vld [vmem:[%s762_s1 + $0x90] sm:$0xff]  }
   0x5   :  { %532 = vmatpush3.bf16.msra.mxu1 %v575_v3  ;;  %v584_v12 = vld [vmem:[%s762_s1 + $0x58] sm:$0xff]   ;;  %v588_v16 = vld [vmem:[%s762_s1 + $0x60] sm:$0xff]   ;;  %v592_v20 = vld [vmem:[%s762_s1 + $0x68] sm:$0xff]  }
   0x6   :  { %533 = vmatprep.subr.bf16.mxu1 %v578_v6  ;;  %v585_v13 = vld [vmem:[%s762_s1 + $0x18] sm:$0xff]   ;;  %v589_v17 = vld [vmem:[%s762_s1 + $0x20] sm:$0xff]   ;;  %v593_v21 = vld [vmem:[%s762_s1 + $0x28] sm:$0xff]  }
   0x7   :  { %512 = vmatpush3.bf16.msra.mxu0 %v577_v5  ;;  %v586_v14 = vld [vmem:[%s762_s1 + $0xd8] sm:$0xff]   ;;  %v590_v18 = vld [vmem:[%s762_s1 + $0xe0] sm:$0xff]   ;;  %v594_v22 = vld [vmem:[%s762_s1 + $0xe8] sm:$0xff]  }
   0x8   :  { %513 = vmatprep.subr.bf16.mxu0 %v580_v8  ;;  %v587_v15 = vld [vmem:[%s762_s1 + $0x98] sm:$0xff]   ;;  %v591_v19 = vld [vmem:[%s762_s1 + $0xa0] sm:$0xff]   ;;  %v595_v23 = vld [vmem:[%s762_s1 + $0xa8] sm:$0xff]  }
   0x9   :  { %534 = vmatpush3.bf16.msra.mxu1 %v579_v7  ;;  %v596_v24 = vld [vmem:[%s762_s1 + $0x70] sm:$0xff]   ;;  %v600_v28 = vld [vmem:[%s762_s1 + $0x78] sm:$0xff]   ;;  %v15_v31 = vld [vmem:[%s763_s0] sm:$0xff] }
   0xa   :  { %535 = vmatprep.subr.bf16.mxu1 %v582_v10  ;;  %v597_v25 = vld [vmem:[%s762_s1 + $0x30] sm:$0xff]   ;;  %v601_v29 = vld [vmem:[%s762_s1 + $0x38] sm:$0xff]   ;;  %v467_v32 = vcombine.low %v15_v31, %v15_v31  ;;  %v468_v33 = vcombine.high %v15_v31, %v15_v31  ;;  %v16_v36 = vld [vmem:[%s763_s0 + $0x8] sm:$0xff] }
   0xb   :  { %514 = vmatpush3.bf16.msra.mxu0 %v581_v9  ;;  %v598_v26 = vld [vmem:[%s762_s1 + $0xf0] sm:$0xff]   ;;  %v602_v30 = vld [vmem:[%s762_s1 + $0xf8] sm:$0xff]   ;;  %v469_v37 = vcombine.low %v16_v36, %v16_v36  ;;  %v470_v38 = vcombine.high %v16_v36, %v16_v36  ;;  %v609_v39 = vld [vmem:[%s762_s1 + $0x100] sm:$0xff]  }
   0xc   :  { %515 = vmatprep.subr.bf16.mxu0 %v584_v12  ;;  %v599_v27 = vld [vmem:[%s762_s1 + $0xb0] sm:$0xff]   ;;  %v606_v34 = vld [vmem:[%s762_s1 + $0xb8] sm:$0xff]   ;;  %366 = vmatprep.mubr.bf16.mxu0 %v468_v33  ;;  %v610_v40 = vld [vmem:[%s762_s1 + $0x108] sm:$0xff]  }
   0xd   :  { %536 = vmatpush3.bf16.msra.mxu1 %v583_v11  ;;  %406 = vmatprep.mubr.bf16.mxu1 %v470_v38  ;;  %v611_v41 = vld [vmem:[%s762_s1 + $0x110] sm:$0xff]   ;;  %v612_v42 = vld [vmem:[%s762_s1 + $0x118] sm:$0xff]   ;;  %v466_v45 = vld [vmem:[%s764_s2] ss:$0 sm:$0xff] }
   0xe   :  { %537 = vmatprep.subr.bf16.mxu1 %v586_v14  ;;  %v605_v43 = vld [vmem:[%s763_s0 + $0x10] ss:$0 sps:$4 sm:$0xff]  }
   0xf   :  { %516 = vmatpush3.bf16.msra.mxu0 %v585_v13 }
  0x10   :  { %517 = vmatprep.subr.bf16.mxu0 %v588_v16 }
  0x11   :  { %538 = vmatpush3.bf16.msra.mxu1 %v587_v15 }
  0x12   :  { %539 = vmatprep.subr.bf16.mxu1 %v590_v18 }
  0x13   :  { %518 = vmatpush3.bf16.msra.mxu0 %v589_v17 }
  0x14   :  { %519 = vmatprep.subr.bf16.mxu0 %v592_v20 }
  0x15   :  { %540 = vmatpush3.bf16.msra.mxu1 %v591_v19 }
  0x16   :  { %541 = vmatprep.subr.bf16.mxu1 %v594_v22 }
  0x17   :  { %520 = vmatpush3.bf16.msra.mxu0 %v593_v21 }
  0x18   :  { %521 = vmatprep.subr.bf16.mxu0 %v596_v24 }
  0x19   :  { %542 = vmatpush3.bf16.msra.mxu1 %v595_v23 }
  0x1a   :  { %543 = vmatprep.subr.bf16.mxu1 %v598_v26 }
  0x1b   :  { %522 = vmatpush3.bf16.msra.mxu0 %v597_v25 }
  0x1c   :  { %523 = vmatprep.subr.bf16.mxu0 %v600_v28 }
  0x1d   :  { %544 = vmatpush3.bf16.msra.mxu1 %v599_v27 }
  0x1e   :  { %545 = vmatprep.subr.bf16.mxu1 %v602_v30 }
  0x1f   :  { %524 = vmatpush3.bf16.msra.mxu0 %v601_v29 }
  0x20   :  { %558 = vmatprep.subr.bf16.mxu0 %v617_v35 }
  0x21   :  { %546 = vmatpush3.bf16.msra.mxu1 %v606_v34 }
  0x22   :  { %367 = vmatmul.mubr.bf16.vlgmr.msra.gmra.mrb[0].mxu0 %v467_v32 }
  0x23   :  { %559 = vmatpush3.bf16.msra.mxu0 %v609_v39  ;;  %566 = vmatprep.mubr.msk.bf16.mxu0 %vm618_vm0, %v617_v35 }
  0x24   :  { %407 = vmatmul.mubr.bf16.vlgmr.msra.gmra.mrb[0].mxu1 %v469_v37  ;;  %560 = vmatprep.subr.bf16.mxu0 %v617_v35 }
  0x27   :  { %561 = vmatpush3.bf16.msra.mxu0 %v610_v40 }
  0x28   :  { %562 = vmatprep.subr.bf16.mxu0 %v617_v35 }
  0x2b   :  { %563 = vmatpush3.bf16.msra.mxu0 %v611_v41 }
  0x2c   :  { %564 = vmatprep.subr.bf16.mxu0 %v617_v35 }
  0x2f   :  { %565 = vmatpush3.bf16.msra.mxu0 %v612_v42 }
  0x32   :  { %567 = vmatmul.mubr.msk.bf16.vlgmr.msra.gmra.mrb[4].mxu0 %vm330_vm1, %v605_v43 }
  0xf5   :  { %v525_v44 = vpop.f32.mrb[0].mxu0 }
  0xf6   :  { %v526_v46 = vpop.f32.mrb[1].mxu0 }
  0xf7   :  { %v527_v47 = vadd.f32 %v526_v46, %v525_v44  ;;  %v528_v48 = vpop.f32.mrb[2].mxu0  ;;  %v547_v49 = vpop.f32.mrb[0].mxu1 }
  0xf8   :  { %v529_v50 = vpop.f32.mrb[3].mxu0  ;;  %v548_v51 = vpop.f32.mrb[1].mxu1 }
  0xf9   :  { %v369_v52 = vadd.f32 %v527_v47, %v466_v45  ;;  %v549_v53 = vadd.f32 %v548_v51, %v547_v49  ;;  %v550_v54 = vpop.f32.mrb[2].mxu1 }
  0xfa   :  { %v551_v55 = vpop.f32.mrb[3].mxu1 }
  0xfb   :  { %v409_v56 = vadd.f32 %v549_v53, %v369_v52 }
 0x105   :  { %v448_v57 = vpop.f32.mrb[4].mxu0 }
 0x106   :  { %v449_v58 = vadd.f32 %v448_v57, %v409_v56  ;;  %v568_v59 = vpop.f32.mrb[5].mxu0 }
 0x107   :  { %v451_v60 = vpop.f32.mrb[6].mxu0 }
 0x108   :  { %v454_v61 = vsub.f32 0.0, %v449_v58  ;;  %v569_v62 = vpop.f32.mrb[7].mxu0 }
 0x10a   :  { %v455_v63 = vmul.f32 1.442695, %v454_v61 }
 0x10c   :  { %613 = vpow2.f32 %v455_v63 }
 0x116   :  { %v614_v0 = vpop.eup %613 }
 0x117   :  { %v457_v1 = vadd.f32 1.0, %v614_v0 }
 0x119   :  { %615 = vrcp.f32 %v457_v1 }
 0x123   :  { %v616_v2 = vpop.eup %615 }
 0x124   :  { %v459_v3 = vmul.f32 %v616_v2, %v449_v58 }
 0x126   :  { %v460_v4 = vpack.c.bf16 %v459_v3, %v459_v3 }
 0x128   :  { %461 = vst [vmem:[%s765_s3] sm:$0xf] %v460_v4 }

// kernel: _lambda_.86
= control target key start
LH: loop header
LB: loop body
LE: loop exit
PB: predicated region body
PF: predicated region fallthrough
CT: control target
= control target key end

     0   :  { %s350_s1 = inlined_call_operand.vmem [shape: bf16[256,128], index: 1, kind: input, shape index: {}]   ;;  %s351_s0 = inlined_call_operand.vmem [shape: bf16[8,256], index: 0, kind: input, shape index: {}]   ;;  %s352_s2 = inlined_call_operand.vmem [shape: f32[1,128], index: 2, kind: input, shape index: {}]   ;;  %s353_s3 = inlined_call_operand.vmem [shape: bf16[8,128], index: 3, kind: output, shape index: {}]  }
   0x1   :  { %v251_v0 = vld [vmem:[%s350_s1 + $0x40] sm:$0xff]   ;;  %v253_v2 = vld [vmem:[%s350_s1 + $0x48] sm:$0xff]   ;;  %v255_v4 = vld [vmem:[%s350_s1 + $0x50] sm:$0xff]  }
   0x2   :  { %v252_v1 = vld [vmem:[%s350_s1] sm:$0xff]   ;;  %229 = vmatprep.subr.bf16.mxu0 %v251_v0  ;;  %v254_v3 = vld [vmem:[%s350_s1 + $0x8] sm:$0xff]   ;;  %v256_v5 = vld [vmem:[%s350_s1 + $0x10] sm:$0xff]  }
   0x3   :  { %230 = vmatpush3.bf16.msra.mxu0 %v252_v1  ;;  %v257_v6 = vld [vmem:[%s350_s1 + $0x58] sm:$0xff]   ;;  %v259_v8 = vld [vmem:[%s350_s1 + $0x60] sm:$0xff]   ;;  %v261_v10 = vld [vmem:[%s350_s1 + $0x68] sm:$0xff]  }
   0x4   :  { %231 = vmatprep.subr.bf16.mxu0 %v253_v2  ;;  %v258_v7 = vld [vmem:[%s350_s1 + $0x18] sm:$0xff]   ;;  %v260_v9 = vld [vmem:[%s350_s1 + $0x20] sm:$0xff]   ;;  %v262_v13 = vld [vmem:[%s350_s1 + $0x28] sm:$0xff]  }
   0x5   :  { %v15_v11 = vld [vmem:[%s351_s0] sm:$0xff]  ;;  %v263_v14 = vld [vmem:[%s350_s1 + $0x70] sm:$0xff]   ;;  %v265_v16 = vld [vmem:[%s350_s1 + $0x78] sm:$0xff]  }
   0x6   :  { %v212_v12 = vcombine.high %v15_v11, %v15_v11  ;;  %v264_v15 = vld [vmem:[%s350_s1 + $0x30] sm:$0xff]   ;;  %v266_v17 = vld [vmem:[%s350_s1 + $0x38] sm:$0xff]   ;;  %v211_v18 = vcombine.low %v15_v11, %v15_v11  ;;  %v210_v20 = vld [vmem:[%s352_s2] ss:$0 sm:$0xff] }
   0x7   :  { %232 = vmatpush3.bf16.msra.mxu0 %v254_v3 }
   0x8   :  { %233 = vmatprep.subr.bf16.mxu0 %v255_v4  ;;  %190 = vmatprep.mubr.bf16.mxu0 %v212_v12 }
   0xb   :  { %234 = vmatpush3.bf16.msra.mxu0 %v256_v5 }
   0xc   :  { %235 = vmatprep.subr.bf16.mxu0 %v257_v6 }
   0xf   :  { %236 = vmatpush3.bf16.msra.mxu0 %v258_v7 }
  0x10   :  { %237 = vmatprep.subr.bf16.mxu0 %v259_v8 }
  0x13   :  { %238 = vmatpush3.bf16.msra.mxu0 %v260_v9 }
  0x14   :  { %239 = vmatprep.subr.bf16.mxu0 %v261_v10 }
  0x17   :  { %240 = vmatpush3.bf16.msra.mxu0 %v262_v13 }
  0x18   :  { %241 = vmatprep.subr.bf16.mxu0 %v263_v14 }
  0x1b   :  { %242 = vmatpush3.bf16.msra.mxu0 %v264_v15 }
  0x1c   :  { %243 = vmatprep.subr.bf16.mxu0 %v265_v16 }
  0x1f   :  { %244 = vmatpush3.bf16.msra.mxu0 %v266_v17 }
  0x22   :  { %191 = vmatmul.mubr.bf16.vlgmr.msra.gmra.mrb[0].mxu0 %v211_v18 }
  0xf5   :  { %v245_v19 = vpop.f32.mrb[0].mxu0 }
  0xf6   :  { %v246_v21 = vpop.f32.mrb[1].mxu0 }
  0xf7   :  { %v247_v22 = vadd.f32 %v246_v21, %v245_v19  ;;  %v248_v23 = vpop.f32.mrb[2].mxu0 }
  0xf8   :  { %v249_v24 = vpop.f32.mrb[3].mxu0 }
  0xf9   :  { %v193_v25 = vadd.f32 %v247_v22, %v210_v20 }
  0xfb   :  { %v198_v26 = vsub.f32 0.0, %v193_v25 }
  0xfd   :  { %v199_v27 = vmul.f32 1.442695, %v198_v26 }
  0xff   :  { %269 = vpow2.f32 %v199_v27 }
 0x109   :  { %v270_v28 = vpop.eup %269 }
 0x10a   :  { %v201_v29 = vadd.f32 1.0, %v270_v28 }
 0x10c   :  { %271 = vrcp.f32 %v201_v29 }
 0x116   :  { %v272_v30 = vpop.eup %271 }
 0x117   :  { %v203_v31 = vmul.f32 %v272_v30, %v193_v25 }
 0x119   :  { %v204_v32 = vpack.c.bf16 %v203_v31, %v203_v31 }
 0x11b   :  { %205 = vst [vmem:[%s353_s3] sm:$0xf] %v204_v32 }

// kernel: _lambda_.85
= control target key start
LH: loop header
LB: loop body
LE: loop exit
PB: predicated region body
PF: predicated region fallthrough
CT: control target
= control target key end

     0   :  { %s2049_s1 = inlined_call_operand.vmem [shape: bf16[1152,256], index: 1, kind: input, shape index: {}]   ;;  %s2050_s0 = inlined_call_operand.vmem [shape: bf16[8,1152], index: 0, kind: input, shape index: {}]   ;;  %s2051_s2 = inlined_call_operand.vmem [shape: f32[1,256], index: 2, kind: input, shape index: {}]   ;;  %s2052_s3 = inlined_call_operand.vmem [shape: bf16[8,256], index: 3, kind: output, shape index: {}]  }
   0x1   :  { %v1330_v0 = vld [vmem:[%s2049_s1 + $0x4] ss:$8 sps:$4 sm:$0xff]   ;;  %v1334_v2 = vld [vmem:[%s2049_s1] ss:$8 sps:$4 sm:$0xff]   ;;  %v1336_v4 = vld [vmem:[%s2049_s1 + $0x14] ss:$8 sps:$4 sm:$0xff]  }
   0x2   :  { %v1332_v1 = vld [vmem:[%s2049_s1 + $0x204] ss:$8 sps:$4 sm:$0xff]   ;;  %928 = vmatprep.subr.bf16.mxu1 %v1330_v0  ;;  %v1335_v3 = vld [vmem:[%s2049_s1 + $0x200] ss:$8 sps:$4 sm:$0xff]   ;;  %v1338_v5 = vld [vmem:[%s2049_s1 + $0x214] ss:$8 sps:$4 sm:$0xff]  }
   0x3   :  { %1010 = vmatprep.subr.bf16.mxu0 %v1332_v1  ;;  %929 = vmatpush1.bf16.msra.mxu1 %v1334_v2  ;;  %v1340_v6 = vld [vmem:[%s2049_s1 + $0x10] ss:$8 sps:$4 sm:$0xff]   ;;  %v1342_v8 = vld [vmem:[%s2049_s1 + $0x24] ss:$8 sps:$4 sm:$0xff]   ;;  %v1346_v10 = vld [vmem:[%s2049_s1 + $0x20] ss:$8 sps:$4 sm:$0xff]  }
   0x4   :  { %1011 = vmatpush1.bf16.msra.mxu0 %v1335_v3  ;;  %930 = vmatprep.subr.bf16.mxu1 %v1336_v4  ;;  %v1341_v7 = vld [vmem:[%s2049_s1 + $0x210] ss:$8 sps:$4 sm:$0xff]   ;;  %v1344_v9 = vld [vmem:[%s2049_s1 + $0x224] ss:$8 sps:$4 sm:$0xff]   ;;  %v1347_v11 = vld [vmem:[%s2049_s1 + $0x220] ss:$8 sps:$4 sm:$0xff]  }
   0x5   :  { %1012 = vmatprep.subr.bf16.mxu0 %v1338_v5  ;;  %v1348_v12 = vld [vmem:[%s2049_s1 + $0x34] ss:$8 sps:$4 sm:$0xff]   ;;  %v1352_v14 = vld [vmem:[%s2049_s1 + $0x30] ss:$8 sps:$4 sm:$0xff]   ;;  %v1354_v16 = vld [vmem:[%s2049_s1 + $0x44] ss:$8 sps:$4 sm:$0xff]  }
   0x6   :  { %v1350_v13 = vld [vmem:[%s2049_s1 + $0x234] ss:$8 sps:$4 sm:$0xff]   ;;  %v1353_v15 = vld [vmem:[%s2049_s1 + $0x230] ss:$8 sps:$4 sm:$0xff]   ;;  %v1356_v17 = vld [vmem:[%s2049_s1 + $0x244] ss:$8 sps:$4 sm:$0xff]  }
   0x7   :  { %931 = vmatpush1.bf16.msra.mxu1 %v1340_v6  ;;  %v1358_v18 = vld [vmem:[%s2049_s1 + $0x40] ss:$8 sps:$4 sm:$0xff]   ;;  %v1360_v20 = vld [vmem:[%s2049_s1 + $0x54] ss:$8 sps:$4 sm:$0xff]   ;;  %v1364_v22 = vld [vmem:[%s2049_s1 + $0x50] ss:$8 sps:$4 sm:$0xff]  }
   0x8   :  { %1013 = vmatpush1.bf16.msra.mxu0 %v1341_v7  ;;  %932 = vmatprep.subr.bf16.mxu1 %v1342_v8  ;;  %v1359_v19 = vld [vmem:[%s2049_s1 + $0x240] ss:$8 sps:$4 sm:$0xff]   ;;  %v1362_v21 = vld [vmem:[%s2049_s1 + $0x254] ss:$8 sps:$4 sm:$0xff]   ;;  %v1365_v23 = vld [vmem:[%s2049_s1 + $0x250] ss:$8 sps:$4 sm:$0xff]  }
   0x9   :  { %1014 = vmatprep.subr.bf16.mxu0 %v1344_v9  ;;  %v1366_v24 = vld [vmem:[%s2049_s1 + $0x64] ss:$8 sps:$4 sm:$0xff]   ;;  %v1370_v26 = vld [vmem:[%s2049_s1 + $0x60] ss:$8 sps:$4 sm:$0xff]   ;;  %v1372_v28 = vld [vmem:[%s2049_s1 + $0x74] ss:$8 sps:$4 sm:$0xff]  }
   0xa   :  { %v1368_v25 = vld [vmem:[%s2049_s1 + $0x264] ss:$8 sps:$4 sm:$0xff]   ;;  %v1371_v27 = vld [vmem:[%s2049_s1 + $0x260] ss:$8 sps:$4 sm:$0xff]   ;;  %v1374_v29 = vld [vmem:[%s2049_s1 + $0x274] ss:$8 sps:$4 sm:$0xff]  }
   0xb   :  { %933 = vmatpush1.bf16.msra.mxu1 %v1346_v10  ;;  %v1376_v30 = vld [vmem:[%s2049_s1 + $0x70] ss:$8 sps:$4 sm:$0xff]   ;;  %v1378_v32 = vld [vmem:[%s2049_s1 + $0x84] ss:$8 sps:$4 sm:$0xff]   ;;  %v1382_v34 = vld [vmem:[%s2049_s1 + $0x80] ss:$8 sps:$4 sm:$0xff]  }
   0xc   :  { %1015 = vmatpush1.bf16.msra.mxu0 %v1347_v11  ;;  %934 = vmatprep.subr.bf16.mxu1 %v1348_v12  ;;  %v1377_v31 = vld [vmem:[%s2049_s1 + $0x270] ss:$8 sps:$4 sm:$0xff]   ;;  %v1380_v33 = vld [vmem:[%s2049_s1 + $0x284] ss:$8 sps:$4 sm:$0xff]   ;;  %v1383_v35 = vld [vmem:[%s2049_s1 + $0x280] ss:$8 sps:$4 sm:$0xff]  }
   0xd   :  { %1016 = vmatprep.subr.bf16.mxu0 %v1350_v13  ;;  %v1384_v36 = vld [vmem:[%s2049_s1 + $0x94] ss:$8 sps:$4 sm:$0xff]   ;;  %v1388_v38 = vld [vmem:[%s2049_s1 + $0x90] ss:$8 sps:$4 sm:$0xff]   ;;  %v1390_v40 = vld [vmem:[%s2049_s1 + $0xa4] ss:$8 sps:$4 sm:$0xff]  }
   0xe   :  { %v1386_v37 = vld [vmem:[%s2049_s1 + $0x294] ss:$8 sps:$4 sm:$0xff]   ;;  %v1389_v39 = vld [vmem:[%s2049_s1 + $0x290] ss:$8 sps:$4 sm:$0xff]   ;;  %v1392_v41 = vld [vmem:[%s2049_s1 + $0x2a4] ss:$8 sps:$4 sm:$0xff]  }
   0xf   :  { %935 = vmatpush1.bf16.msra.mxu1 %v1352_v14  ;;  %v1394_v42 = vld [vmem:[%s2049_s1 + $0xa0] ss:$8 sps:$4 sm:$0xff]   ;;  %v1396_v44 = vld [vmem:[%s2049_s1 + $0xb4] ss:$8 sps:$4 sm:$0xff]   ;;  %v1400_v47 = vld [vmem:[%s2049_s1 + $0xb0] ss:$8 sps:$4 sm:$0xff]  }
  0x10   :  { %1017 = vmatpush1.bf16.msra.mxu0 %v1353_v15  ;;  %936 = vmatprep.subr.bf16.mxu1 %v1354_v16  ;;  %v1395_v43 = vld [vmem:[%s2049_s1 + $0x2a0] ss:$8 sps:$4 sm:$0xff]   ;;  %v1398_v45 = vld [vmem:[%s2049_s1 + $0x2b4] ss:$8 sps:$4 sm:$0xff]   ;;  %v1401_v49 = vld [vmem:[%s2049_s1 + $0x2b0] ss:$8 sps:$4 sm:$0xff]  }
  0x11   :  { %1018 = vmatprep.subr.bf16.mxu0 %v1356_v17  ;;  %v15_v46 = vld [vmem:[%s2050_s0] sm:$0xff]  ;;  %v17_v50 = vld [vmem:[%s2050_s0 + $0x10] sm:$0xff] }
  0x12   :  { %v1159_v48 = vcombine.high %v15_v46, %v15_v46  ;;  %v1402_v51 = vld [vmem:[%s2049_s1 + $0xc4] ss:$8 sps:$4 sm:$0xff]   ;;  %v1163_v53 = vcombine.high %v17_v50, %v17_v50  ;;  %v1406_v54 = vld [vmem:[%s2049_s1 + $0xc0] ss:$8 sps:$4 sm:$0xff]   ;;  %v1408_v56 = vld [vmem:[%s2049_s1 + $0xd4] ss:$8 sps:$4 sm:$0xff]   ;;  %v1158_v6 = vcombine.low %v15_v46, %v15_v46  ;;  %v1162_v7 = vcombine.low %v17_v50, %v17_v50 }
  0x13   :  { %937 = vmatpush1.bf16.msra.mxu1 %v1358_v18  ;;  %v1404_v52 = vld [vmem:[%s2049_s1 + $0x2c4] ss:$8 sps:$4 sm:$0xff]   ;;  %v1407_v55 = vld [vmem:[%s2049_s1 + $0x2c0] ss:$8 sps:$4 sm:$0xff]   ;;  %v1410_v57 = vld [vmem:[%s2049_s1 + $0x2d4] ss:$8 sps:$4 sm:$0xff]  }
  0x14   :  { %1019 = vmatpush1.bf16.msra.mxu0 %v1359_v19  ;;  %938 = vmatprep.subr.bf16.mxu1 %v1360_v20  ;;  %v1412_v58 = vld [vmem:[%s2049_s1 + $0xd0] ss:$8 sps:$4 sm:$0xff]   ;;  %v1414_v60 = vld [vmem:[%s2049_s1 + $0xe4] ss:$8 sps:$4 sm:$0xff]   ;;  %v1418_v62 = vld [vmem:[%s2049_s1 + $0xe0] ss:$8 sps:$4 sm:$0xff]  }
  0x15   :  { %1020 = vmatprep.subr.bf16.mxu0 %v1362_v21  ;;  %960 = vmatprep.mubr.bf16.mxu1 %v1159_v48  ;;  %v1413_v59 = vld [vmem:[%s2049_s1 + $0x2d0] ss:$8 sps:$4 sm:$0xff]   ;;  %v1416_v61 = vld [vmem:[%s2049_s1 + $0x2e4] ss:$8 sps:$4 sm:$0xff]   ;;  %v1419_v63 = vld [vmem:[%s2049_s1 + $0x2e0] ss:$8 sps:$4 sm:$0xff]  }
  0x16   :  { %1042 = vmatprep.mubr.bf16.mxu0 %v1163_v53  ;;  %v1420_v0 = vld [vmem:[%s2049_s1 + $0xf4] ss:$8 sps:$4 sm:$0xff]   ;;  %v1424_v2 = vld [vmem:[%s2049_s1 + $0xf0] ss:$8 sps:$4 sm:$0xff]   ;;  %v1430_v4 = vld [vmem:[%s2049_s1 + $0x104] ss:$8 sps:$4 sm:$0xff]  }
  0x17   :  { %939 = vmatpush1.bf16.msra.mxu1 %v1364_v22  ;;  %v1422_v1 = vld [vmem:[%s2049_s1 + $0x2f4] ss:$8 sps:$4 sm:$0xff]   ;;  %v1425_v3 = vld [vmem:[%s2049_s1 + $0x2f0] ss:$8 sps:$4 sm:$0xff]   ;;  %v1435_v5 = vld [vmem:[%s2049_s1 + $0x304] ss:$8 sps:$4 sm:$0xff]  }
  0x18   :  { %1021 = vmatpush1.bf16.msra.mxu0 %v1365_v23  ;;  %940 = vmatprep.subr.bf16.mxu1 %v1366_v24  ;;  %v1428_v8 = vld [vmem:[%s2049_s1 + $0x100] ss:$8 sps:$4 sm:$0xff]   ;;  %v1438_v10 = vld [vmem:[%s2049_s1 + $0x114] ss:$8 sps:$4 sm:$0xff]   ;;  %v1436_v12 = vld [vmem:[%s2049_s1 + $0x110] ss:$8 sps:$4 sm:$0xff]  }
  0x19   :  { %1022 = vmatprep.subr.bf16.mxu0 %v1368_v25  ;;  %v1433_v9 = vld [vmem:[%s2049_s1 + $0x300] ss:$8 sps:$4 sm:$0xff]   ;;  %v1441_v11 = vld [vmem:[%s2049_s1 + $0x314] ss:$8 sps:$4 sm:$0xff]   ;;  %v1439_v13 = vld [vmem:[%s2049_s1 + $0x310] ss:$8 sps:$4 sm:$0xff]  }
  0x1a   :  { %v1444_v14 = vld [vmem:[%s2049_s1 + $0x124] ss:$8 sps:$4 sm:$0xff]   ;;  %v1442_v16 = vld [vmem:[%s2049_s1 + $0x120] ss:$8 sps:$4 sm:$0xff]   ;;  %v1450_v18 = vld [vmem:[%s2049_s1 + $0x134] ss:$8 sps:$4 sm:$0xff]  }
  0x1b   :  { %941 = vmatpush1.bf16.msra.mxu1 %v1370_v26  ;;  %v1447_v15 = vld [vmem:[%s2049_s1 + $0x324] ss:$8 sps:$4 sm:$0xff]   ;;  %v1445_v17 = vld [vmem:[%s2049_s1 + $0x320] ss:$8 sps:$4 sm:$0xff]   ;;  %v1453_v19 = vld [vmem:[%s2049_s1 + $0x334] ss:$8 sps:$4 sm:$0xff]  }
  0x1c   :  { %1023 = vmatpush1.bf16.msra.mxu0 %v1371_v27  ;;  %942 = vmatprep.subr.bf16.mxu1 %v1372_v28  ;;  %v1448_v20 = vld [vmem:[%s2049_s1 + $0x130] ss:$8 sps:$4 sm:$0xff]   ;;  %v1456_v22 = vld [vmem:[%s2049_s1 + $0x144] ss:$8 sps:$4 sm:$0xff]   ;;  %v1454_v24 = vld [vmem:[%s2049_s1 + $0x140] ss:$8 sps:$4 sm:$0xff]  }
  0x1d   :  { %1024 = vmatprep.subr.bf16.mxu0 %v1374_v29  ;;  %v1451_v21 = vld [vmem:[%s2049_s1 + $0x330] ss:$8 sps:$4 sm:$0xff]   ;;  %v1459_v23 = vld [vmem:[%s2049_s1 + $0x344] ss:$8 sps:$4 sm:$0xff]   ;;  %v1457_v25 = vld [vmem:[%s2049_s1 + $0x340] ss:$8 sps:$4 sm:$0xff]  }
  0x1e   :  { %v1462_v26 = vld [vmem:[%s2049_s1 + $0x154] ss:$8 sps:$4 sm:$0xff]   ;;  %v1460_v28 = vld [vmem:[%s2049_s1 + $0x150] ss:$8 sps:$4 sm:$0xff]   ;;  %v1492_v50 = vld [vmem:[%s2049_s1 + $0x1a4] ss:$8 sps:$4 sm:$0xff]  }
  0x1f   :  { %943 = vmatpush1.bf16.msra.mxu1 %v1376_v30  ;;  %v1465_v27 = vld [vmem:[%s2049_s1 + $0x354] ss:$8 sps:$4 sm:$0xff]   ;;  %v1463_v29 = vld [vmem:[%s2049_s1 + $0x350] ss:$8 sps:$4 sm:$0xff]   ;;  %v1468_v30 = vld [vmem:[%s2049_s1 + $0x164] ss:$8 sps:$4 sm:$0xff]  }
  0x20   :  { %1025 = vmatpush1.bf16.msra.mxu0 %v1377_v31  ;;  %944 = vmatprep.subr.bf16.mxu1 %v1378_v32  ;;  %v1471_v31 = vld [vmem:[%s2049_s1 + $0x364] ss:$8 sps:$4 sm:$0xff]   ;;  %v1486_v46 = vld [vmem:[%s2049_s1 + $0x194] ss:$8 sps:$4 sm:$0xff]   ;;  %v1484_v48 = vld [vmem:[%s2049_s1 + $0x190] ss:$8 sps:$4 sm:$0xff]  }
  0x21   :  { %1026 = vmatprep.subr.bf16.mxu0 %v1380_v33  ;;  %v1863_v32 = vld [vmem:[%s2050_s0 + $0x8] sm:$0xff]  ;;  %v1868_v33 = vld [vmem:[%s2050_s0 + $0x18] sm:$0xff] }
  0x22   :  { %v1493_v53 = vld [vmem:[%s2049_s1 + $0x3a0] ss:$8 sps:$4 sm:$0xff]  }
  0x23   :  { %945 = vmatpush1.bf16.msra.mxu1 %v1382_v34  ;;  %v1466_v34 = vld [vmem:[%s2049_s1 + $0x160] ss:$8 sps:$4 sm:$0xff]  }
  0x24   :  { %1027 = vmatpush1.bf16.msra.mxu0 %v1383_v35  ;;  %946 = vmatprep.subr.bf16.mxu1 %v1384_v36  ;;  %v1469_v35 = vld [vmem:[%s2049_s1 + $0x360] ss:$8 sps:$4 sm:$0xff]   ;;  %v1161_v36 = vcombine.high %v1863_v32, %v1863_v32 }
  0x25   :  { %1028 = vmatprep.subr.bf16.mxu0 %v1386_v37  ;;  %v1165_v37 = vcombine.high %v1868_v33, %v1868_v33 }
  0x27   :  { %947 = vmatpush1.bf16.msra.mxu1 %v1388_v38  ;;  %v1474_v38 = vld [vmem:[%s2049_s1 + $0x174] ss:$8 sps:$4 sm:$0xff]  }
  0x28   :  { %1029 = vmatpush1.bf16.msra.mxu0 %v1389_v39  ;;  %948 = vmatprep.subr.bf16.mxu1 %v1390_v40  ;;  %v1477_v39 = vld [vmem:[%s2049_s1 + $0x374] ss:$8 sps:$4 sm:$0xff]   ;;  %v1472_v40 = vld [vmem:[%s2049_s1 + $0x170] ss:$8 sps:$4 sm:$0xff]  }
  0x29   :  { %1030 = vmatprep.subr.bf16.mxu0 %v1392_v41  ;;  %v1475_v41 = vld [vmem:[%s2049_s1 + $0x370] ss:$8 sps:$4 sm:$0xff]  }
  0x2b   :  { %949 = vmatpush1.bf16.msra.mxu1 %v1394_v42  ;;  %v1480_v42 = vld [vmem:[%s2049_s1 + $0x184] ss:$8 sps:$4 sm:$0xff]  }
  0x2c   :  { %1031 = vmatpush1.bf16.msra.mxu0 %v1395_v43  ;;  %950 = vmatprep.subr.bf16.mxu1 %v1396_v44  ;;  %v1483_v43 = vld [vmem:[%s2049_s1 + $0x384] ss:$8 sps:$4 sm:$0xff]   ;;  %v1478_v44 = vld [vmem:[%s2049_s1 + $0x180] ss:$8 sps:$4 sm:$0xff]  }
  0x2d   :  { %1032 = vmatprep.subr.bf16.mxu0 %v1398_v45  ;;  %v1481_v45 = vld [vmem:[%s2049_s1 + $0x380] ss:$8 sps:$4 sm:$0xff]  }
  0x2f   :  { %951 = vmatpush1.bf16.msra.mxu1 %v1400_v47  ;;  %v1489_v47 = vld [vmem:[%s2049_s1 + $0x394] ss:$8 sps:$4 sm:$0xff]  }
  0x30   :  { %1033 = vmatpush1.bf16.msra.mxu0 %v1401_v49  ;;  %952 = vmatprep.subr.bf16.mxu1 %v1402_v51  ;;  %v1487_v49 = vld [vmem:[%s2049_s1 + $0x390] ss:$8 sps:$4 sm:$0xff]   ;;  %v1495_v51 = vld [vmem:[%s2049_s1 + $0x3a4] ss:$8 sps:$4 sm:$0xff]  }
  0x31   :  { %1034 = vmatprep.subr.bf16.mxu0 %v1404_v52  ;;  %v1490_v52 = vld [vmem:[%s2049_s1 + $0x1a0] ss:$8 sps:$4 sm:$0xff]  }
  0x33   :  { %953 = vmatpush1.bf16.msra.mxu1 %v1406_v54  ;;  %v1498_v54 = vld [vmem:[%s2049_s1 + $0x1b4] ss:$8 sps:$4 sm:$0xff]  }
  0x34   :  { %1035 = vmatpush1.bf16.msra.mxu0 %v1407_v55  ;;  %954 = vmatprep.subr.bf16.mxu1 %v1408_v56  ;;  %v1501_v55 = vld [vmem:[%s2049_s1 + $0x3b4] ss:$8 sps:$4 sm:$0xff]   ;;  %v1496_v56 = vld [vmem:[%s2049_s1 + $0x1b0] ss:$8 sps:$4 sm:$0xff]  }
  0x35   :  { %1036 = vmatprep.subr.bf16.mxu0 %v1410_v57  ;;  %v1499_v57 = vld [vmem:[%s2049_s1 + $0x3b0] ss:$8 sps:$4 sm:$0xff]  }
  0x37   :  { %955 = vmatpush1.bf16.msra.mxu1 %v1412_v58  ;;  %v1504_v58 = vld [vmem:[%s2049_s1 + $0x1c4] ss:$8 sps:$4 sm:$0xff]  }
  0x38   :  { %1037 = vmatpush1.bf16.msra.mxu0 %v1413_v59  ;;  %956 = vmatprep.subr.bf16.mxu1 %v1414_v60  ;;  %v1507_v59 = vld [vmem:[%s2049_s1 + $0x3c4] ss:$8 sps:$4 sm:$0xff]   ;;  %v1502_v60 = vld [vmem:[%s2049_s1 + $0x1c0] ss:$8 sps:$4 sm:$0xff]  }
  0x39   :  { %1038 = vmatprep.subr.bf16.mxu0 %v1416_v61  ;;  %v1505_v61 = vld [vmem:[%s2049_s1 + $0x3c0] ss:$8 sps:$4 sm:$0xff]  }
  0x3b   :  { %957 = vmatpush1.bf16.msra.mxu1 %v1418_v62  ;;  %v1510_v62 = vld [vmem:[%s2049_s1 + $0x1d4] ss:$8 sps:$4 sm:$0xff]  }
  0x3c   :  { %1039 = vmatpush1.bf16.msra.mxu0 %v1419_v63  ;;  %958 = vmatprep.subr.bf16.mxu1 %v1420_v0  ;;  %v1513_v63 = vld [vmem:[%s2049_s1 + $0x3d4] ss:$8 sps:$4 sm:$0xff]   ;;  %v1508_v0 = vld [vmem:[%s2049_s1 + $0x1d0] ss:$8 sps:$4 sm:$0xff]  }
  0x3d   :  { %1040 = vmatprep.subr.bf16.mxu0 %v1422_v1  ;;  %v1511_v1 = vld [vmem:[%s2049_s1 + $0x3d0] ss:$8 sps:$4 sm:$0xff]  }
  0x3f   :  { %959 = vmatpush1.bf16.msra.mxu1 %v1424_v2  ;;  %v1516_v2 = vld [vmem:[%s2049_s1 + $0x1e4] ss:$8 sps:$4 sm:$0xff]  }
  0x40   :  { %1041 = vmatpush1.bf16.msra.mxu0 %v1425_v3  ;;  %969 = vmatprep.subr.bf16.mxu1 %v1430_v4  ;;  %v1519_v3 = vld [vmem:[%s2049_s1 + $0x3e4] ss:$8 sps:$4 sm:$0xff]   ;;  %v1514_v4 = vld [vmem:[%s2049_s1 + $0x1e0] ss:$8 sps:$4 sm:$0xff]  }
  0x41   :  { %1051 = vmatprep.subr.bf16.mxu0 %v1435_v5  ;;  %v1517_v5 = vld [vmem:[%s2049_s1 + $0x3e0] ss:$8 sps:$4 sm:$0xff]  }
  0x42   :  { %961 = vmatmul.mubr.bf16.vlgmr.msra.gmra.mrb[0].mxu1 %v1158_v6  ;;  %v1522_v6 = vld [vmem:[%s2049_s1 + $0x1f4] ss:$8 sps:$4 sm:$0xff]  }
  0x43   :  { %1043 = vmatmul.mubr.bf16.vlgmr.msra.gmra.mrb[0].mxu0 %v1162_v7  ;;  %970 = vmatpush1.bf16.msra.mxu1 %v1428_v8  ;;  %v1525_v7 = vld [vmem:[%s2049_s1 + $0x3f4] ss:$8 sps:$4 sm:$0xff]   ;;  %v1520_v8 = vld [vmem:[%s2049_s1 + $0x1f0] ss:$8 sps:$4 sm:$0xff]  }
  0x44   :  { %1052 = vmatpush1.bf16.msra.mxu0 %v1433_v9  ;;  %971 = vmatprep.subr.bf16.mxu1 %v1438_v10  ;;  %v1523_v9 = vld [vmem:[%s2049_s1 + $0x3f0] ss:$8 sps:$4 sm:$0xff]   ;;  %v1532_v10 = vld [vmem:[%s2049_s1 + $0x404] ss:$8 sps:$4 sm:$0xff]  }
  0x45   :  { %1053 = vmatprep.subr.bf16.mxu0 %v1441_v11  ;;  %1001 = vmatprep.mubr.bf16.mxu1 %v1161_v36  ;;  %v1160_v11 = vcombine.low %v1863_v32, %v1863_v32 }
  0x46   :  { %1083 = vmatprep.mubr.bf16.mxu0 %v1165_v37  ;;  %v164_v37 = vld [vmem:[%s2051_s2] sm:$0x3] }
  0x47   :  { %972 = vmatpush1.bf16.msra.mxu1 %v1436_v12  ;;  %v1164_v12 = vcombine.low %v1868_v33, %v1868_v33 }
  0x48   :  { %1054 = vmatpush1.bf16.msra.mxu0 %v1439_v13  ;;  %973 = vmatprep.subr.bf16.mxu1 %v1444_v14  ;;  %v1530_v13 = vld [vmem:[%s2049_s1 + $0x400] ss:$8 sps:$4 sm:$0xff]   ;;  %v1535_v14 = vld [vmem:[%s2049_s1 + $0x414] ss:$8 sps:$4 sm:$0xff]  }
  0x49   :  { %1055 = vmatprep.subr.bf16.mxu0 %v1447_v15  ;;  %v1533_v15 = vld [vmem:[%s2049_s1 + $0x410] ss:$8 sps:$4 sm:$0xff]  }
  0x4b   :  { %974 = vmatpush1.bf16.msra.mxu1 %v1442_v16  ;;  %v1563_v16 = vmov 0  }
  0x4c   :  { %1056 = vmatpush1.bf16.msra.mxu0 %v1445_v17  ;;  %975 = vmatprep.subr.bf16.mxu1 %v1450_v18  ;;  %v1538_v17 = vld [vmem:[%s2049_s1 + $0x424] ss:$8 sps:$4 sm:$0xff]   ;;  %v1536_v18 = vld [vmem:[%s2049_s1 + $0x420] ss:$8 sps:$4 sm:$0xff]  }
  0x4d   :  { %1057 = vmatprep.subr.bf16.mxu0 %v1453_v19  ;;  %v1541_v19 = vld [vmem:[%s2049_s1 + $0x434] ss:$8 sps:$4 sm:$0xff]  }
  0x4f   :  { %976 = vmatpush1.bf16.msra.mxu1 %v1448_v20  ;;  %v1539_v20 = vld [vmem:[%s2049_s1 + $0x430] ss:$8 sps:$4 sm:$0xff]  }
  0x50   :  { %1058 = vmatpush1.bf16.msra.mxu0 %v1451_v21  ;;  %977 = vmatprep.subr.bf16.mxu1 %v1456_v22  ;;  %v1544_v21 = vld [vmem:[%s2049_s1 + $0x444] ss:$8 sps:$4 sm:$0xff]   ;;  %v1542_v22 = vld [vmem:[%s2049_s1 + $0x440] ss:$8 sps:$4 sm:$0xff]  }
  0x51   :  { %1059 = vmatprep.subr.bf16.mxu0 %v1459_v23  ;;  %v1547_v23 = vld [vmem:[%s2049_s1 + $0x454] ss:$8 sps:$4 sm:$0xff]  }
  0x53   :  { %978 = vmatpush1.bf16.msra.mxu1 %v1454_v24  ;;  %v1545_v24 = vld [vmem:[%s2049_s1 + $0x450] ss:$8 sps:$4 sm:$0xff]  }
  0x54   :  { %1060 = vmatpush1.bf16.msra.mxu0 %v1457_v25  ;;  %979 = vmatprep.subr.bf16.mxu1 %v1462_v26  ;;  %v1550_v25 = vld [vmem:[%s2049_s1 + $0x464] ss:$8 sps:$4 sm:$0xff]   ;;  %v1548_v26 = vld [vmem:[%s2049_s1 + $0x460] ss:$8 sps:$4 sm:$0xff]  }
  0x55   :  { %1061 = vmatprep.subr.bf16.mxu0 %v1465_v27  ;;  %v1553_v27 = vld [vmem:[%s2049_s1 + $0x474] ss:$8 sps:$4 sm:$0xff]  }
  0x57   :  { %980 = vmatpush1.bf16.msra.mxu1 %v1460_v28  ;;  %v1551_v28 = vld [vmem:[%s2049_s1 + $0x470] ss:$8 sps:$4 sm:$0xff]  }
  0x58   :  { %1062 = vmatpush1.bf16.msra.mxu0 %v1463_v29  ;;  %981 = vmatprep.subr.bf16.mxu1 %v1468_v30  ;;  %v1554_v29 = vld [vmem:[%s2050_s0 + $0x20] ss:$0 sps:$4 sm:$0xff]  }
  0x59   :  { %1063 = vmatprep.subr.bf16.mxu0 %v1471_v31 }
  0x5b   :  { %982 = vmatpush1.bf16.msra.mxu1 %v1466_v34  ;;  %v166_v34 = vlaneseq }
  0x5c   :  { %1064 = vmatpush1.bf16.msra.mxu0 %v1469_v35  ;;  %983 = vmatprep.subr.bf16.mxu1 %v1474_v38 }
  0x5d   :  { %1065 = vmatprep.subr.bf16.mxu0 %v1477_v39  ;;  %v167_v35 = vshrl.u32 %v166_v34, 7 }
  0x5f   :  { %984 = vmatpush1.bf16.msra.mxu1 %v1472_v40  ;;  %v168_v36 = vsub.s32 0, %v167_v35  ;;  %v172_v38 = vsub.s32 1, %v167_v35 }
  0x60   :  { %1066 = vmatpush1.bf16.msra.mxu0 %v1475_v41  ;;  %985 = vmatprep.subr.bf16.mxu1 %v1480_v42 }
  0x61   :  { %1067 = vmatprep.subr.bf16.mxu0 %v1483_v43  ;;  %v169_v39 = vrot.slane %v164_v37, %v168_v36  ;;  %v173_v40 = vrot.slane %v164_v37, %v172_v38 }
  0x63   :  { %986 = vmatpush1.bf16.msra.mxu1 %v1478_v44 }
  0x64   :  { %1068 = vmatpush1.bf16.msra.mxu0 %v1481_v45  ;;  %987 = vmatprep.subr.bf16.mxu1 %v1486_v46 }
  0x65   :  { %1069 = vmatprep.subr.bf16.mxu0 %v1489_v47 }
  0x67   :  { %988 = vmatpush1.bf16.msra.mxu1 %v1484_v48 }
  0x68   :  { %1070 = vmatpush1.bf16.msra.mxu0 %v1487_v49  ;;  %989 = vmatprep.subr.bf16.mxu1 %v1492_v50 }
  0x69   :  { %1071 = vmatprep.subr.bf16.mxu0 %v1495_v51 }
  0x6b   :  { %990 = vmatpush1.bf16.msra.mxu1 %v1490_v52 }
  0x6c   :  { %1072 = vmatpush1.bf16.msra.mxu0 %v1493_v53  ;;  %991 = vmatprep.subr.bf16.mxu1 %v1498_v54 }
  0x6d   :  { %1073 = vmatprep.subr.bf16.mxu0 %v1501_v55 }
  0x6f   :  { %992 = vmatpush1.bf16.msra.mxu1 %v1496_v56 }
  0x70   :  { %1074 = vmatpush1.bf16.msra.mxu0 %v1499_v57  ;;  %993 = vmatprep.subr.bf16.mxu1 %v1504_v58 }
  0x71   :  { %1075 = vmatprep.subr.bf16.mxu0 %v1507_v59 }
  0x73   :  { %994 = vmatpush1.bf16.msra.mxu1 %v1502_v60 }
  0x74   :  { %1076 = vmatpush1.bf16.msra.mxu0 %v1505_v61  ;;  %995 = vmatprep.subr.bf16.mxu1 %v1510_v62 }
  0x75   :  { %1077 = vmatprep.subr.bf16.mxu0 %v1513_v63 }
  0x77   :  { %996 = vmatpush1.bf16.msra.mxu1 %v1508_v0 }
  0x78   :  { %1078 = vmatpush1.bf16.msra.mxu0 %v1511_v1  ;;  %997 = vmatprep.subr.bf16.mxu1 %v1516_v2 }
  0x79   :  { %1079 = vmatprep.subr.bf16.mxu0 %v1519_v3 }
  0x7b   :  { %998 = vmatpush1.bf16.msra.mxu1 %v1514_v4 }
  0x7c   :  { %1080 = vmatpush1.bf16.msra.mxu0 %v1517_v5  ;;  %999 = vmatprep.subr.bf16.mxu1 %v1522_v6 }
  0x7d   :  { %1081 = vmatprep.subr.bf16.mxu0 %v1525_v7 }
  0x7f   :  { %1000 = vmatpush1.bf16.msra.mxu1 %v1520_v8 }
  0x80   :  { %1082 = vmatpush1.bf16.msra.mxu0 %v1523_v9 }
  0x81   :  { %1092 = vmatprep.subr.bf16.mxu0 %v1532_v10 }
  0x82   :  { %1002 = vmatmul.mubr.bf16.vlgmr.msra.gmra.mrb[0].mxu1 %v1160_v11 }
  0x83   :  { %1084 = vmatmul.mubr.bf16.vlgmr.msra.gmra.mrb[0].mxu0 %v1164_v12 }
  0x84   :  { %1093 = vmatpush1.bf16.msra.mxu0 %v1530_v13  ;;  %1124 = vmatprep.mubr.bf16.mxu0 %v1563_v16 }
  0x85   :  { %1094 = vmatprep.subr.bf16.mxu0 %v1535_v14 }
  0x88   :  { %1095 = vmatpush1.bf16.msra.mxu0 %v1533_v15 }
  0x89   :  { %1096 = vmatprep.subr.bf16.mxu0 %v1538_v17 }
  0x8c   :  { %1097 = vmatpush1.bf16.msra.mxu0 %v1536_v18 }
  0x8d   :  { %1098 = vmatprep.subr.bf16.mxu0 %v1541_v19 }
  0x90   :  { %1099 = vmatpush1.bf16.msra.mxu0 %v1539_v20 }
  0x91   :  { %1100 = vmatprep.subr.bf16.mxu0 %v1544_v21 }
  0x94   :  { %1101 = vmatpush1.bf16.msra.mxu0 %v1542_v22 }
  0x95   :  { %1102 = vmatprep.subr.bf16.mxu0 %v1547_v23 }
  0x98   :  { %1103 = vmatpush1.bf16.msra.mxu0 %v1545_v24 }
  0x99   :  { %1104 = vmatprep.subr.bf16.mxu0 %v1550_v25 }
  0x9c   :  { %1105 = vmatpush1.bf16.msra.mxu0 %v1548_v26 }
  0x9d   :  { %1106 = vmatprep.subr.bf16.mxu0 %v1553_v27 }
  0xa0   :  { %1107 = vmatpush1.bf16.msra.mxu0 %v1551_v28 }
  0xa3   :  { %1125 = vmatmul.mubr.bf16.vlgmr.msra.gmra.mrb[0].mxu0 %v1554_v29 }
 0x155   :  { %v1003_v30 = vpop.f32.mrb[0].mxu1 }
 0x156   :  { %v1005_v31 = vpop.f32.mrb[1].mxu1  ;;  %v1313_v41 = vadd.f32 %v1003_v30, %v169_v39 }
 0x157   :  { %v1007_v32 = vpop.f32.mrb[2].mxu1  ;;  %v1315_v42 = vadd.f32 %v1005_v31, %v173_v40 }
 0x158   :  { %v1008_v33 = vpop.f32.mrb[3].mxu1 }
 0x176   :  { %v1126_v43 = vpop.f32.mrb[0].mxu0 }
 0x177   :  { %v1314_v44 = vadd.f32 %v1313_v41, %v1126_v43  ;;  %v1128_v45 = vpop.f32.mrb[1].mxu0 }
 0x178   :  { %v1316_v46 = vadd.f32 %v1315_v42, %v1128_v45  ;;  %v1130_v47 = vpop.f32.mrb[2].mxu0 }
 0x179   :  { %v1133_v48 = vsub.f32 0.0, %v1314_v44  ;;  %v1131_v49 = vpop.f32.mrb[3].mxu0 }
 0x17a   :  { %v1134_v50 = vsub.f32 0.0, %v1316_v46 }
 0x17b   :  { %v1135_v51 = vmul.f32 1.442695, %v1133_v48 }
 0x17c   :  { %v1137_v52 = vmul.f32 1.442695, %v1134_v50 }
 0x17d   :  { %1555 = vpow2.f32 %v1135_v51 }
 0x17e   :  { %1557 = vpow2.f32 %v1137_v52 }
 0x187   :  { %v1556_v53 = vpop.eup %1555 }
 0x188   :  { %v1558_v54 = vpop.eup %1557  ;;  %v1139_v55 = vadd.f32 1.0, %v1556_v53 }
 0x189   :  { %v1140_v56 = vadd.f32 1.0, %v1558_v54 }
 0x18a   :  { %1559 = vrcp.f32 %v1139_v55 }
 0x18b   :  { %1561 = vrcp.f32 %v1140_v56 }
 0x194   :  { %v1560_v57 = vpop.eup %1559 }
 0x195   :  { %v1562_v58 = vpop.eup %1561  ;;  %v1143_v59 = vmul.f32 %v1560_v57, %v1314_v44 }
 0x196   :  { %v1144_v60 = vmul.f32 %v1562_v58, %v1316_v46 }
 0x198   :  { %v1312_v61 = vpack.c.bf16 %v1144_v60, %v1143_v59 }
 0x19a   :  { %1153 = vst [vmem:[%s2052_s3] sm:$0xff] %v1312_v61 }

// kernel: _lambda_.87
= control target key start
LH: loop header
LB: loop body
LE: loop exit
PB: predicated region body
PF: predicated region fallthrough
CT: control target
= control target key end

     0   :  { %s939_s1 = inlined_call_operand.vmem [shape: bf16[512,256], index: 1, kind: input, shape index: {}]   ;;  %s940_s0 = inlined_call_operand.vmem [shape: bf16[8,512], index: 0, kind: input, shape index: {}]   ;;  %s941_s2 = inlined_call_operand.vmem [shape: f32[1,256], index: 2, kind: input, shape index: {}]   ;;  %s942_s3 = inlined_call_operand.vmem [shape: bf16[8,256], index: 3, kind: output, shape index: {}]  }
   0x1   :  { %v607_v0 = vld [vmem:[%s939_s1 + $0x4] ss:$8 sps:$4 sm:$0xff]   ;;  %v611_v2 = vld [vmem:[%s939_s1] ss:$8 sps:$4 sm:$0xff]   ;;  %v613_v4 = vld [vmem:[%s939_s1 + $0x14] ss:$8 sps:$4 sm:$0xff]  }
   0x2   :  { %v609_v1 = vld [vmem:[%s939_s1 + $0x104] ss:$8 sps:$4 sm:$0xff]   ;;  %426 = vmatprep.subr.bf16.mxu1 %v607_v0  ;;  %v612_v3 = vld [vmem:[%s939_s1 + $0x100] ss:$8 sps:$4 sm:$0xff]   ;;  %v615_v5 = vld [vmem:[%s939_s1 + $0x114] ss:$8 sps:$4 sm:$0xff]  }
   0x3   :  { %467 = vmatprep.subr.bf16.mxu0 %v609_v1  ;;  %427 = vmatpush1.bf16.msra.mxu1 %v611_v2  ;;  %v617_v6 = vld [vmem:[%s939_s1 + $0x10] ss:$8 sps:$4 sm:$0xff]   ;;  %v619_v8 = vld [vmem:[%s939_s1 + $0x24] ss:$8 sps:$4 sm:$0xff]   ;;  %v623_v10 = vld [vmem:[%s939_s1 + $0x20] ss:$8 sps:$4 sm:$0xff]  }
   0x4   :  { %468 = vmatpush1.bf16.msra.mxu0 %v612_v3  ;;  %428 = vmatprep.subr.bf16.mxu1 %v613_v4  ;;  %v618_v7 = vld [vmem:[%s939_s1 + $0x110] ss:$8 sps:$4 sm:$0xff]   ;;  %v621_v9 = vld [vmem:[%s939_s1 + $0x124] ss:$8 sps:$4 sm:$0xff]   ;;  %v624_v11 = vld [vmem:[%s939_s1 + $0x120] ss:$8 sps:$4 sm:$0xff]  }
   0x5   :  { %469 = vmatprep.subr.bf16.mxu0 %v615_v5  ;;  %v625_v12 = vld [vmem:[%s939_s1 + $0x34] ss:$8 sps:$4 sm:$0xff]   ;;  %v629_v14 = vld [vmem:[%s939_s1 + $0x30] ss:$8 sps:$4 sm:$0xff]   ;;  %v631_v16 = vld [vmem:[%s939_s1 + $0x44] ss:$8 sps:$4 sm:$0xff]  }
   0x6   :  { %v627_v13 = vld [vmem:[%s939_s1 + $0x134] ss:$8 sps:$4 sm:$0xff]   ;;  %v630_v15 = vld [vmem:[%s939_s1 + $0x130] ss:$8 sps:$4 sm:$0xff]   ;;  %v633_v17 = vld [vmem:[%s939_s1 + $0x144] ss:$8 sps:$4 sm:$0xff]  }
   0x7   :  { %429 = vmatpush1.bf16.msra.mxu1 %v617_v6  ;;  %v635_v18 = vld [vmem:[%s939_s1 + $0x40] ss:$8 sps:$4 sm:$0xff]   ;;  %v637_v20 = vld [vmem:[%s939_s1 + $0x54] ss:$8 sps:$4 sm:$0xff]   ;;  %v641_v22 = vld [vmem:[%s939_s1 + $0x50] ss:$8 sps:$4 sm:$0xff]   ;;  %v82_v6 = vlaneseq }
   0x8   :  { %470 = vmatpush1.bf16.msra.mxu0 %v618_v7  ;;  %430 = vmatprep.subr.bf16.mxu1 %v619_v8  ;;  %v636_v19 = vld [vmem:[%s939_s1 + $0x140] ss:$8 sps:$4 sm:$0xff]   ;;  %v639_v21 = vld [vmem:[%s939_s1 + $0x154] ss:$8 sps:$4 sm:$0xff]   ;;  %v642_v23 = vld [vmem:[%s939_s1 + $0x150] ss:$8 sps:$4 sm:$0xff]  }
   0x9   :  { %471 = vmatprep.subr.bf16.mxu0 %v621_v9  ;;  %v643_v24 = vld [vmem:[%s939_s1 + $0x64] ss:$8 sps:$4 sm:$0xff]   ;;  %v647_v26 = vld [vmem:[%s939_s1 + $0x60] ss:$8 sps:$4 sm:$0xff]   ;;  %v649_v28 = vld [vmem:[%s939_s1 + $0x74] ss:$8 sps:$4 sm:$0xff]  }
   0xa   :  { %v645_v25 = vld [vmem:[%s939_s1 + $0x164] ss:$8 sps:$4 sm:$0xff]   ;;  %v648_v27 = vld [vmem:[%s939_s1 + $0x160] ss:$8 sps:$4 sm:$0xff]   ;;  %v651_v29 = vld [vmem:[%s939_s1 + $0x174] ss:$8 sps:$4 sm:$0xff]  }
   0xb   :  { %431 = vmatpush1.bf16.msra.mxu1 %v623_v10  ;;  %v653_v30 = vld [vmem:[%s939_s1 + $0x70] ss:$8 sps:$4 sm:$0xff]   ;;  %v655_v32 = vld [vmem:[%s939_s1 + $0x84] ss:$8 sps:$4 sm:$0xff]   ;;  %v659_v34 = vld [vmem:[%s939_s1 + $0x80] ss:$8 sps:$4 sm:$0xff]  }
   0xc   :  { %472 = vmatpush1.bf16.msra.mxu0 %v624_v11  ;;  %432 = vmatprep.subr.bf16.mxu1 %v625_v12  ;;  %v654_v31 = vld [vmem:[%s939_s1 + $0x170] ss:$8 sps:$4 sm:$0xff]   ;;  %v657_v33 = vld [vmem:[%s939_s1 + $0x184] ss:$8 sps:$4 sm:$0xff]   ;;  %v660_v35 = vld [vmem:[%s939_s1 + $0x180] ss:$8 sps:$4 sm:$0xff]  }
   0xd   :  { %473 = vmatprep.subr.bf16.mxu0 %v627_v13  ;;  %v661_v36 = vld [vmem:[%s939_s1 + $0x94] ss:$8 sps:$4 sm:$0xff]   ;;  %v665_v38 = vld [vmem:[%s939_s1 + $0x90] ss:$8 sps:$4 sm:$0xff]   ;;  %v667_v40 = vld [vmem:[%s939_s1 + $0xa4] ss:$8 sps:$4 sm:$0xff]  }
   0xe   :  { %v663_v37 = vld [vmem:[%s939_s1 + $0x194] ss:$8 sps:$4 sm:$0xff]   ;;  %v666_v39 = vld [vmem:[%s939_s1 + $0x190] ss:$8 sps:$4 sm:$0xff]   ;;  %v669_v41 = vld [vmem:[%s939_s1 + $0x1a4] ss:$8 sps:$4 sm:$0xff]  }
   0xf   :  { %433 = vmatpush1.bf16.msra.mxu1 %v629_v14  ;;  %v671_v42 = vld [vmem:[%s939_s1 + $0xa0] ss:$8 sps:$4 sm:$0xff]   ;;  %v673_v44 = vld [vmem:[%s939_s1 + $0xb4] ss:$8 sps:$4 sm:$0xff]   ;;  %v677_v49 = vld [vmem:[%s939_s1 + $0xb0] ss:$8 sps:$4 sm:$0xff]  }
  0x10   :  { %474 = vmatpush1.bf16.msra.mxu0 %v630_v15  ;;  %434 = vmatprep.subr.bf16.mxu1 %v631_v16  ;;  %v672_v43 = vld [vmem:[%s939_s1 + $0x1a0] ss:$8 sps:$4 sm:$0xff]   ;;  %v675_v45 = vld [vmem:[%s939_s1 + $0x1b4] ss:$8 sps:$4 sm:$0xff]   ;;  %v678_v50 = vld [vmem:[%s939_s1 + $0x1b0] ss:$8 sps:$4 sm:$0xff]  }
  0x11   :  { %475 = vmatprep.subr.bf16.mxu0 %v633_v17  ;;  %v14_v46 = vld [vmem:[%s940_s0] sm:$0xff]  ;;  %v15_v48 = vld [vmem:[%s940_s0 + $0x8] sm:$0xff]  ;;  %v685_v56 = vld [vmem:[%s939_s1 + $0xd4] ss:$8 sps:$4 sm:$0xff]   ;;  %v83_v7 = vshrl.u32 %v82_v6, 7 }
  0x12   :  { %v534_v47 = vcombine.high %v14_v46, %v14_v46  ;;  %v536_v51 = vcombine.high %v15_v48, %v15_v48  ;;  %v679_v52 = vld [vmem:[%s939_s1 + $0xc4] ss:$8 sps:$4 sm:$0xff]   ;;  %v683_v54 = vld [vmem:[%s939_s1 + $0xc0] ss:$8 sps:$4 sm:$0xff]   ;;  %v687_v57 = vld [vmem:[%s939_s1 + $0x1d4] ss:$8 sps:$4 sm:$0xff]   ;;  %v533_v4 = vcombine.low %v14_v46, %v14_v46  ;;  %v535_v5 = vcombine.low %v15_v48, %v15_v48 }
  0x13   :  { %435 = vmatpush1.bf16.msra.mxu1 %v635_v18  ;;  %v681_v53 = vld [vmem:[%s939_s1 + $0x1c4] ss:$8 sps:$4 sm:$0xff]   ;;  %v684_v55 = vld [vmem:[%s939_s1 + $0x1c0] ss:$8 sps:$4 sm:$0xff]   ;;  %v689_v58 = vld [vmem:[%s939_s1 + $0xd0] ss:$8 sps:$4 sm:$0xff]  }
  0x14   :  { %476 = vmatpush1.bf16.msra.mxu0 %v636_v19  ;;  %436 = vmatprep.subr.bf16.mxu1 %v637_v20  ;;  %v690_v59 = vld [vmem:[%s939_s1 + $0x1d0] ss:$8 sps:$4 sm:$0xff]   ;;  %v691_v60 = vld [vmem:[%s939_s1 + $0xe4] ss:$8 sps:$4 sm:$0xff]   ;;  %v695_v62 = vld [vmem:[%s939_s1 + $0xe0] ss:$8 sps:$4 sm:$0xff]  }
  0x15   :  { %477 = vmatprep.subr.bf16.mxu0 %v639_v21  ;;  %458 = vmatprep.mubr.bf16.mxu1 %v534_v47  ;;  %v693_v61 = vld [vmem:[%s939_s1 + $0x1e4] ss:$8 sps:$4 sm:$0xff]   ;;  %v696_v63 = vld [vmem:[%s939_s1 + $0x1e0] ss:$8 sps:$4 sm:$0xff]   ;;  %v697_v0 = vld [vmem:[%s939_s1 + $0xf4] ss:$8 sps:$4 sm:$0xff]  }
  0x16   :  { %499 = vmatprep.mubr.bf16.mxu0 %v536_v51  ;;  %v699_v1 = vld [vmem:[%s939_s1 + $0x1f4] ss:$8 sps:$4 sm:$0xff]   ;;  %v701_v2 = vld [vmem:[%s939_s1 + $0xf0] ss:$8 sps:$4 sm:$0xff]   ;;  %v84_v8 = vsub.s32 0, %v83_v7  ;;  %v88_v10 = vsub.s32 1, %v83_v7 }
  0x17   :  { %437 = vmatpush1.bf16.msra.mxu1 %v641_v22  ;;  %v702_v3 = vld [vmem:[%s939_s1 + $0x1f0] ss:$8 sps:$4 sm:$0xff]   ;;  %v80_v9 = vld [vmem:[%s941_s2] sm:$0x3] }
  0x18   :  { %478 = vmatpush1.bf16.msra.mxu0 %v642_v23  ;;  %438 = vmatprep.subr.bf16.mxu1 %v643_v24  ;;  %v85_v11 = vrot.slane %v80_v9, %v84_v8  ;;  %v89_v12 = vrot.slane %v80_v9, %v88_v10 }
  0x19   :  { %479 = vmatprep.subr.bf16.mxu0 %v645_v25 }
  0x1b   :  { %439 = vmatpush1.bf16.msra.mxu1 %v647_v26 }
  0x1c   :  { %480 = vmatpush1.bf16.msra.mxu0 %v648_v27  ;;  %440 = vmatprep.subr.bf16.mxu1 %v649_v28 }
  0x1d   :  { %481 = vmatprep.subr.bf16.mxu0 %v651_v29 }
  0x1f   :  { %441 = vmatpush1.bf16.msra.mxu1 %v653_v30 }
  0x20   :  { %482 = vmatpush1.bf16.msra.mxu0 %v654_v31  ;;  %442 = vmatprep.subr.bf16.mxu1 %v655_v32 }
  0x21   :  { %483 = vmatprep.subr.bf16.mxu0 %v657_v33 }
  0x23   :  { %443 = vmatpush1.bf16.msra.mxu1 %v659_v34 }
  0x24   :  { %484 = vmatpush1.bf16.msra.mxu0 %v660_v35  ;;  %444 = vmatprep.subr.bf16.mxu1 %v661_v36 }
  0x25   :  { %485 = vmatprep.subr.bf16.mxu0 %v663_v37 }
  0x27   :  { %445 = vmatpush1.bf16.msra.mxu1 %v665_v38 }
  0x28   :  { %486 = vmatpush1.bf16.msra.mxu0 %v666_v39  ;;  %446 = vmatprep.subr.bf16.mxu1 %v667_v40 }
  0x29   :  { %487 = vmatprep.subr.bf16.mxu0 %v669_v41 }
  0x2b   :  { %447 = vmatpush1.bf16.msra.mxu1 %v671_v42 }
  0x2c   :  { %488 = vmatpush1.bf16.msra.mxu0 %v672_v43  ;;  %448 = vmatprep.subr.bf16.mxu1 %v673_v44 }
  0x2d   :  { %489 = vmatprep.subr.bf16.mxu0 %v675_v45 }
  0x2f   :  { %449 = vmatpush1.bf16.msra.mxu1 %v677_v49 }
  0x30   :  { %490 = vmatpush1.bf16.msra.mxu0 %v678_v50  ;;  %450 = vmatprep.subr.bf16.mxu1 %v679_v52 }
  0x31   :  { %491 = vmatprep.subr.bf16.mxu0 %v681_v53 }
  0x33   :  { %451 = vmatpush1.bf16.msra.mxu1 %v683_v54 }
  0x34   :  { %492 = vmatpush1.bf16.msra.mxu0 %v684_v55  ;;  %452 = vmatprep.subr.bf16.mxu1 %v685_v56 }
  0x35   :  { %493 = vmatprep.subr.bf16.mxu0 %v687_v57 }
  0x37   :  { %453 = vmatpush1.bf16.msra.mxu1 %v689_v58 }
  0x38   :  { %494 = vmatpush1.bf16.msra.mxu0 %v690_v59  ;;  %454 = vmatprep.subr.bf16.mxu1 %v691_v60 }
  0x39   :  { %495 = vmatprep.subr.bf16.mxu0 %v693_v61 }
  0x3b   :  { %455 = vmatpush1.bf16.msra.mxu1 %v695_v62 }
  0x3c   :  { %496 = vmatpush1.bf16.msra.mxu0 %v696_v63  ;;  %456 = vmatprep.subr.bf16.mxu1 %v697_v0 }
  0x3d   :  { %497 = vmatprep.subr.bf16.mxu0 %v699_v1 }
  0x3f   :  { %457 = vmatpush1.bf16.msra.mxu1 %v701_v2 }
  0x40   :  { %498 = vmatpush1.bf16.msra.mxu0 %v702_v3 }
  0x42   :  { %459 = vmatmul.mubr.bf16.vlgmr.msra.gmra.mrb[0].mxu1 %v533_v4 }
  0x43   :  { %500 = vmatmul.mubr.bf16.vlgmr.msra.gmra.mrb[0].mxu0 %v535_v5 }
 0x115   :  { %v460_v13 = vpop.f32.mrb[0].mxu1 }
 0x116   :  { %v501_v14 = vpop.f32.mrb[0].mxu0  ;;  %v461_v15 = vadd.f32 %v460_v13, %v85_v11  ;;  %v462_v16 = vpop.f32.mrb[1].mxu1 }
 0x117   :  { %v503_v17 = vpop.f32.mrb[1].mxu0  ;;  %v463_v18 = vadd.f32 %v462_v16, %v89_v12  ;;  %v464_v19 = vpop.f32.mrb[2].mxu1 }
 0x118   :  { %v505_v20 = vpop.f32.mrb[2].mxu0  ;;  %v502_v21 = vadd.f32 %v501_v14, %v461_v15  ;;  %v465_v22 = vpop.f32.mrb[3].mxu1 }
 0x119   :  { %v506_v23 = vpop.f32.mrb[3].mxu0  ;;  %v504_v24 = vadd.f32 %v503_v17, %v463_v18 }
 0x11a   :  { %v508_v25 = vsub.f32 0.0, %v502_v21 }
 0x11b   :  { %v509_v26 = vsub.f32 0.0, %v504_v24 }
 0x11c   :  { %v510_v27 = vmul.f32 1.442695, %v508_v25 }
 0x11d   :  { %v512_v28 = vmul.f32 1.442695, %v509_v26 }
 0x11e   :  { %707 = vpow2.f32 %v510_v27 }
 0x11f   :  { %709 = vpow2.f32 %v512_v28 }
 0x128   :  { %v708_v29 = vpop.eup %707 }
 0x129   :  { %v710_v30 = vpop.eup %709  ;;  %v514_v31 = vadd.f32 1.0, %v708_v29 }
 0x12a   :  { %v515_v32 = vadd.f32 1.0, %v710_v30 }
 0x12b   :  { %711 = vrcp.f32 %v514_v31 }
 0x12c   :  { %713 = vrcp.f32 %v515_v32 }
 0x135   :  { %v712_v33 = vpop.eup %711 }
 0x136   :  { %v714_v34 = vpop.eup %713  ;;  %v518_v35 = vmul.f32 %v712_v33, %v502_v21 }
 0x137   :  { %v519_v36 = vmul.f32 %v714_v34, %v504_v24 }
 0x139   :  { %v602_v37 = vpack.c.bf16 %v519_v36, %v518_v35 }
 0x13b   :  { %528 = vst [vmem:[%s942_s3] sm:$0xff] %v602_v37 }

// kernel: _lambda_.88
= control target key start
LH: loop header
LB: loop body
LE: loop exit
PB: predicated region body
PF: predicated region fallthrough
CT: control target
= control target key end

     0   :  { %v49_v35 = vlaneseq  ;;  %s511_s1 = inlined_call_operand.vmem [shape: bf16[256,256], index: 1, kind: input, shape index: {}]   ;;  %s512_s0 = inlined_call_operand.vmem [shape: bf16[8,256], index: 0, kind: input, shape index: {}]   ;;  %s513_s2 = inlined_call_operand.vmem [shape: f32[1,256], index: 2, kind: input, shape index: {}]   ;;  %s514_s3 = inlined_call_operand.vmem [shape: bf16[8,256], index: 3, kind: output, shape index: {}]  }
   0x1   :  { %v328_v0 = vld [vmem:[%s511_s1 + $0x4] ss:$8 sps:$4 sm:$0xff]   ;;  %v330_v1 = vld [vmem:[%s511_s1] ss:$8 sps:$4 sm:$0xff]   ;;  %v331_v2 = vld [vmem:[%s511_s1 + $0x14] ss:$8 sps:$4 sm:$0xff]  }
   0x2   :  { %226 = vmatprep.subr.bf16.mxu0 %v328_v0  ;;  %v333_v3 = vld [vmem:[%s511_s1 + $0x10] ss:$8 sps:$4 sm:$0xff]   ;;  %v334_v4 = vld [vmem:[%s511_s1 + $0x24] ss:$8 sps:$4 sm:$0xff]   ;;  %v336_v5 = vld [vmem:[%s511_s1 + $0x20] ss:$8 sps:$4 sm:$0xff]  }
   0x3   :  { %227 = vmatpush1.bf16.msra.mxu0 %v330_v1  ;;  %v337_v6 = vld [vmem:[%s511_s1 + $0x34] ss:$8 sps:$4 sm:$0xff]   ;;  %v339_v7 = vld [vmem:[%s511_s1 + $0x30] ss:$8 sps:$4 sm:$0xff]   ;;  %v340_v8 = vld [vmem:[%s511_s1 + $0x44] ss:$8 sps:$4 sm:$0xff]  }
   0x4   :  { %228 = vmatprep.subr.bf16.mxu0 %v331_v2  ;;  %v342_v9 = vld [vmem:[%s511_s1 + $0x40] ss:$8 sps:$4 sm:$0xff]   ;;  %v343_v10 = vld [vmem:[%s511_s1 + $0x54] ss:$8 sps:$4 sm:$0xff]   ;;  %v345_v11 = vld [vmem:[%s511_s1 + $0x50] ss:$8 sps:$4 sm:$0xff]  }
   0x5   :  { %v346_v12 = vld [vmem:[%s511_s1 + $0x64] ss:$8 sps:$4 sm:$0xff]   ;;  %v348_v15 = vld [vmem:[%s511_s1 + $0x60] ss:$8 sps:$4 sm:$0xff]   ;;  %v349_v16 = vld [vmem:[%s511_s1 + $0x74] ss:$8 sps:$4 sm:$0xff]  }
   0x6   :  { %v14_v13 = vld [vmem:[%s512_s0] sm:$0xff]  ;;  %v351_v17 = vld [vmem:[%s511_s1 + $0x70] ss:$8 sps:$4 sm:$0xff]   ;;  %v355_v20 = vld [vmem:[%s511_s1 + $0x94] ss:$8 sps:$4 sm:$0xff]   ;;  %v50_v36 = vshrl.u32 %v49_v35, 7 }
   0x7   :  { %229 = vmatpush1.bf16.msra.mxu0 %v333_v3  ;;  %v293_v14 = vcombine.high %v14_v13, %v14_v13  ;;  %v352_v18 = vld [vmem:[%s511_s1 + $0x84] ss:$8 sps:$4 sm:$0xff]   ;;  %v354_v19 = vld [vmem:[%s511_s1 + $0x80] ss:$8 sps:$4 sm:$0xff]   ;;  %v357_v21 = vld [vmem:[%s511_s1 + $0x90] ss:$8 sps:$4 sm:$0xff]   ;;  %v292_v34 = vcombine.low %v14_v13, %v14_v13 }
   0x8   :  { %230 = vmatprep.subr.bf16.mxu0 %v334_v4  ;;  %v358_v22 = vld [vmem:[%s511_s1 + $0xa4] ss:$8 sps:$4 sm:$0xff]   ;;  %v360_v23 = vld [vmem:[%s511_s1 + $0xa0] ss:$8 sps:$4 sm:$0xff]   ;;  %v361_v24 = vld [vmem:[%s511_s1 + $0xb4] ss:$8 sps:$4 sm:$0xff]  }
   0x9   :  { %258 = vmatprep.mubr.bf16.mxu0 %v293_v14  ;;  %v363_v25 = vld [vmem:[%s511_s1 + $0xb0] ss:$8 sps:$4 sm:$0xff]   ;;  %v364_v26 = vld [vmem:[%s511_s1 + $0xc4] ss:$8 sps:$4 sm:$0xff]   ;;  %v366_v27 = vld [vmem:[%s511_s1 + $0xc0] ss:$8 sps:$4 sm:$0xff]  }
   0xa   :  { %v367_v28 = vld [vmem:[%s511_s1 + $0xd4] ss:$8 sps:$4 sm:$0xff]   ;;  %v369_v29 = vld [vmem:[%s511_s1 + $0xd0] ss:$8 sps:$4 sm:$0xff]   ;;  %v370_v30 = vld [vmem:[%s511_s1 + $0xe4] ss:$8 sps:$4 sm:$0xff]  }
   0xb   :  { %231 = vmatpush1.bf16.msra.mxu0 %v336_v5  ;;  %v372_v31 = vld [vmem:[%s511_s1 + $0xe0] ss:$8 sps:$4 sm:$0xff]   ;;  %v373_v32 = vld [vmem:[%s511_s1 + $0xf4] ss:$8 sps:$4 sm:$0xff]   ;;  %v375_v33 = vld [vmem:[%s511_s1 + $0xf0] ss:$8 sps:$4 sm:$0xff]  }
   0xc   :  { %232 = vmatprep.subr.bf16.mxu0 %v337_v6  ;;  %v51_v37 = vsub.s32 0, %v50_v36  ;;  %v47_v38 = vld [vmem:[%s513_s2] sm:$0x3]  ;;  %v55_v39 = vsub.s32 1, %v50_v36 }
   0xe   :  { %v52_v40 = vrot.slane %v47_v38, %v51_v37  ;;  %v56_v41 = vrot.slane %v47_v38, %v55_v39 }
   0xf   :  { %233 = vmatpush1.bf16.msra.mxu0 %v339_v7 }
  0x10   :  { %234 = vmatprep.subr.bf16.mxu0 %v340_v8 }
  0x13   :  { %235 = vmatpush1.bf16.msra.mxu0 %v342_v9 }
  0x14   :  { %236 = vmatprep.subr.bf16.mxu0 %v343_v10 }
  0x17   :  { %237 = vmatpush1.bf16.msra.mxu0 %v345_v11 }
  0x18   :  { %238 = vmatprep.subr.bf16.mxu0 %v346_v12 }
  0x1b   :  { %239 = vmatpush1.bf16.msra.mxu0 %v348_v15 }
  0x1c   :  { %240 = vmatprep.subr.bf16.mxu0 %v349_v16 }
  0x1f   :  { %241 = vmatpush1.bf16.msra.mxu0 %v351_v17 }
  0x20   :  { %242 = vmatprep.subr.bf16.mxu0 %v352_v18 }
  0x23   :  { %243 = vmatpush1.bf16.msra.mxu0 %v354_v19 }
  0x24   :  { %244 = vmatprep.subr.bf16.mxu0 %v355_v20 }
  0x27   :  { %245 = vmatpush1.bf16.msra.mxu0 %v357_v21 }
  0x28   :  { %246 = vmatprep.subr.bf16.mxu0 %v358_v22 }
  0x2b   :  { %247 = vmatpush1.bf16.msra.mxu0 %v360_v23 }
  0x2c   :  { %248 = vmatprep.subr.bf16.mxu0 %v361_v24 }
  0x2f   :  { %249 = vmatpush1.bf16.msra.mxu0 %v363_v25 }
  0x30   :  { %250 = vmatprep.subr.bf16.mxu0 %v364_v26 }
  0x33   :  { %251 = vmatpush1.bf16.msra.mxu0 %v366_v27 }
  0x34   :  { %252 = vmatprep.subr.bf16.mxu0 %v367_v28 }
  0x37   :  { %253 = vmatpush1.bf16.msra.mxu0 %v369_v29 }
  0x38   :  { %254 = vmatprep.subr.bf16.mxu0 %v370_v30 }
  0x3b   :  { %255 = vmatpush1.bf16.msra.mxu0 %v372_v31 }
  0x3c   :  { %256 = vmatprep.subr.bf16.mxu0 %v373_v32 }
  0x3f   :  { %257 = vmatpush1.bf16.msra.mxu0 %v375_v33 }
  0x42   :  { %259 = vmatmul.mubr.bf16.vlgmr.msra.gmra.mrb[0].mxu0 %v292_v34 }
 0x115   :  { %v260_v42 = vpop.f32.mrb[0].mxu0 }
 0x116   :  { %v261_v43 = vadd.f32 %v260_v42, %v52_v40  ;;  %v262_v44 = vpop.f32.mrb[1].mxu0 }
 0x117   :  { %v263_v45 = vadd.f32 %v262_v44, %v56_v41  ;;  %v264_v46 = vpop.f32.mrb[2].mxu0 }
 0x118   :  { %v267_v47 = vsub.f32 0.0, %v261_v43  ;;  %v265_v48 = vpop.f32.mrb[3].mxu0 }
 0x119   :  { %v268_v49 = vsub.f32 0.0, %v263_v45 }
 0x11a   :  { %v269_v50 = vmul.f32 1.442695, %v267_v47 }
 0x11b   :  { %v271_v51 = vmul.f32 1.442695, %v268_v49 }
 0x11c   :  { %378 = vpow2.f32 %v269_v50 }
 0x11d   :  { %380 = vpow2.f32 %v271_v51 }
 0x126   :  { %v379_v52 = vpop.eup %378 }
 0x127   :  { %v381_v53 = vpop.eup %380  ;;  %v273_v54 = vadd.f32 1.0, %v379_v52 }
 0x128   :  { %v274_v55 = vadd.f32 1.0, %v381_v53 }
 0x129   :  { %382 = vrcp.f32 %v273_v54 }
 0x12a   :  { %384 = vrcp.f32 %v274_v55 }
 0x133   :  { %v383_v56 = vpop.eup %382 }
 0x134   :  { %v385_v57 = vpop.eup %384  ;;  %v277_v58 = vmul.f32 %v383_v56, %v261_v43 }
 0x135   :  { %v278_v59 = vmul.f32 %v385_v57, %v263_v45 }
 0x137   :  { %v327_v60 = vpack.c.bf16 %v278_v59, %v277_v58 }
 0x139   :  { %287 = vst [vmem:[%s514_s3] sm:$0xff] %v327_v60 }

// kernel: _lambda_.90
= control target key start
LH: loop header
LB: loop body
LE: loop exit
PB: predicated region body
PF: predicated region fallthrough
CT: control target
= control target key end

     0   :  { %vm1134_vm0 = vmmov 0   ;;  %s1392_s1 = inlined_call_operand.vmem [shape: bf16[1152,128], index: 1, kind: input, shape index: {}]   ;;  %s1393_s0 = inlined_call_operand.vmem [shape: bf16[8,1152], index: 0, kind: input, shape index: {}]   ;;  %s1394_s2 = inlined_call_operand.vmem [shape: f32[1,128], index: 2, kind: input, shape index: {}]   ;;  %s1395_s3 = inlined_call_operand.vmem [shape: bf16[8,128], index: 3, kind: output, shape index: {}]  }
   0x1   :  { %v1048_v0 = vld [vmem:[%s1392_s1 + $0x40] sm:$0xff]   ;;  %v1052_v4 = vld [vmem:[%s1392_s1 + $0x48] sm:$0xff]   ;;  %v1056_v8 = vld [vmem:[%s1392_s1 + $0x50] sm:$0xff]  }
   0x2   :  { %v1049_v1 = vld [vmem:[%s1392_s1] sm:$0xff]   ;;  %929 = vmatprep.subr.bf16.mxu0 %v1048_v0  ;;  %v1053_v5 = vld [vmem:[%s1392_s1 + $0x8] sm:$0xff]   ;;  %v1057_v9 = vld [vmem:[%s1392_s1 + $0x10] sm:$0xff]  }
   0x3   :  { %v1050_v2 = vld [vmem:[%s1392_s1 + $0xc0] sm:$0xff]   ;;  %930 = vmatpush3.bf16.msra.mxu0 %v1049_v1  ;;  %v1054_v6 = vld [vmem:[%s1392_s1 + $0xc8] sm:$0xff]   ;;  %v1058_v10 = vld [vmem:[%s1392_s1 + $0xd0] sm:$0xff]  }
   0x4   :  { %v1051_v3 = vld [vmem:[%s1392_s1 + $0x80] sm:$0xff]   ;;  %951 = vmatprep.subr.bf16.mxu1 %v1050_v2  ;;  %931 = vmatprep.subr.bf16.mxu0 %v1052_v4  ;;  %v1055_v7 = vld [vmem:[%s1392_s1 + $0x88] sm:$0xff]   ;;  %v1059_v11 = vld [vmem:[%s1392_s1 + $0x90] sm:$0xff]  }
   0x5   :  { %952 = vmatpush3.bf16.msra.mxu1 %v1051_v3  ;;  %v1060_v12 = vld [vmem:[%s1392_s1 + $0x58] sm:$0xff]   ;;  %v1064_v16 = vld [vmem:[%s1392_s1 + $0x60] sm:$0xff]   ;;  %v1068_v20 = vld [vmem:[%s1392_s1 + $0x68] sm:$0xff]  }
   0x6   :  { %953 = vmatprep.subr.bf16.mxu1 %v1054_v6  ;;  %v1061_v13 = vld [vmem:[%s1392_s1 + $0x18] sm:$0xff]   ;;  %v1065_v17 = vld [vmem:[%s1392_s1 + $0x20] sm:$0xff]   ;;  %v1069_v21 = vld [vmem:[%s1392_s1 + $0x28] sm:$0xff]  }
   0x7   :  { %932 = vmatpush3.bf16.msra.mxu0 %v1053_v5  ;;  %v1062_v14 = vld [vmem:[%s1392_s1 + $0xd8] sm:$0xff]   ;;  %v1066_v18 = vld [vmem:[%s1392_s1 + $0xe0] sm:$0xff]   ;;  %v1070_v22 = vld [vmem:[%s1392_s1 + $0xe8] sm:$0xff]  }
   0x8   :  { %933 = vmatprep.subr.bf16.mxu0 %v1056_v8  ;;  %v1063_v15 = vld [vmem:[%s1392_s1 + $0x98] sm:$0xff]   ;;  %v1067_v19 = vld [vmem:[%s1392_s1 + $0xa0] sm:$0xff]   ;;  %v1071_v23 = vld [vmem:[%s1392_s1 + $0xa8] sm:$0xff]  }
   0x9   :  { %954 = vmatpush3.bf16.msra.mxu1 %v1055_v7  ;;  %v1072_v24 = vld [vmem:[%s1392_s1 + $0x70] sm:$0xff]   ;;  %v1076_v28 = vld [vmem:[%s1392_s1 + $0x78] sm:$0xff]   ;;  %v15_v31 = vld [vmem:[%s1393_s0] sm:$0xff] }
   0xa   :  { %955 = vmatprep.subr.bf16.mxu1 %v1058_v10  ;;  %v1073_v25 = vld [vmem:[%s1392_s1 + $0x30] sm:$0xff]   ;;  %v1077_v29 = vld [vmem:[%s1392_s1 + $0x38] sm:$0xff]   ;;  %v848_v32 = vcombine.low %v15_v31, %v15_v31  ;;  %v849_v33 = vcombine.high %v15_v31, %v15_v31  ;;  %v1082_v35 = vld [vmem:[%s1392_s1 + $0x140] sm:$0xff]  }
   0xb   :  { %934 = vmatpush3.bf16.msra.mxu0 %v1057_v9  ;;  %v1074_v26 = vld [vmem:[%s1392_s1 + $0xf0] sm:$0xff]   ;;  %v1078_v30 = vld [vmem:[%s1392_s1 + $0xf8] sm:$0xff]   ;;  %v16_v36 = vld [vmem:[%s1393_s0 + $0x8] sm:$0xff]  ;;  %v1133_v9 = vmov 0.0  }
   0xc   :  { %935 = vmatprep.subr.bf16.mxu0 %v1060_v12  ;;  %v1075_v27 = vld [vmem:[%s1392_s1 + $0xb0] sm:$0xff]   ;;  %v1081_v34 = vld [vmem:[%s1392_s1 + $0xb8] sm:$0xff]   ;;  %667 = vmatprep.mubr.bf16.mxu0 %v849_v33  ;;  %v850_v37 = vcombine.low %v16_v36, %v16_v36  ;;  %v851_v38 = vcombine.high %v16_v36, %v16_v36  ;;  %v1085_v39 = vld [vmem:[%s1392_s1 + $0x100] sm:$0xff]  }
   0xd   :  { %956 = vmatpush3.bf16.msra.mxu1 %v1059_v11  ;;  %v1086_v40 = vld [vmem:[%s1392_s1 + $0x1c0] sm:$0xff]   ;;  %v1088_v42 = vld [vmem:[%s1392_s1 + $0x148] sm:$0xff]   ;;  %v1092_v46 = vld [vmem:[%s1392_s1 + $0x150] sm:$0xff]  }
   0xe   :  { %957 = vmatprep.subr.bf16.mxu1 %v1062_v14  ;;  %707 = vmatprep.mubr.bf16.mxu1 %v851_v38  ;;  %v1087_v41 = vld [vmem:[%s1392_s1 + $0x180] sm:$0xff]   ;;  %v1089_v43 = vld [vmem:[%s1392_s1 + $0x108] sm:$0xff]   ;;  %v1093_v47 = vld [vmem:[%s1392_s1 + $0x110] sm:$0xff]  }
   0xf   :  { %936 = vmatpush3.bf16.msra.mxu0 %v1061_v13  ;;  %v1090_v44 = vld [vmem:[%s1392_s1 + $0x1c8] sm:$0xff]   ;;  %v1094_v48 = vld [vmem:[%s1392_s1 + $0x1d0] sm:$0xff]   ;;  %v1096_v50 = vld [vmem:[%s1392_s1 + $0x158] sm:$0xff]  }
  0x10   :  { %937 = vmatprep.subr.bf16.mxu0 %v1064_v16  ;;  %v1091_v45 = vld [vmem:[%s1392_s1 + $0x188] sm:$0xff]   ;;  %v1095_v49 = vld [vmem:[%s1392_s1 + $0x190] sm:$0xff]   ;;  %v1097_v51 = vld [vmem:[%s1392_s1 + $0x118] sm:$0xff]  }
  0x11   :  { %958 = vmatpush3.bf16.msra.mxu1 %v1063_v15  ;;  %v1098_v52 = vld [vmem:[%s1392_s1 + $0x1d8] sm:$0xff]   ;;  %v1100_v54 = vld [vmem:[%s1392_s1 + $0x160] sm:$0xff]   ;;  %v1104_v58 = vld [vmem:[%s1392_s1 + $0x168] sm:$0xff]  }
  0x12   :  { %959 = vmatprep.subr.bf16.mxu1 %v1066_v18  ;;  %v1099_v53 = vld [vmem:[%s1392_s1 + $0x198] sm:$0xff]   ;;  %v1101_v55 = vld [vmem:[%s1392_s1 + $0x120] sm:$0xff]   ;;  %v1105_v59 = vld [vmem:[%s1392_s1 + $0x128] sm:$0xff]  }
  0x13   :  { %938 = vmatpush3.bf16.msra.mxu0 %v1065_v17  ;;  %v1102_v56 = vld [vmem:[%s1392_s1 + $0x1e0] sm:$0xff]   ;;  %v1106_v60 = vld [vmem:[%s1392_s1 + $0x1e8] sm:$0xff]   ;;  %v1108_v62 = vld [vmem:[%s1392_s1 + $0x170] sm:$0xff]  }
  0x14   :  { %939 = vmatprep.subr.bf16.mxu0 %v1068_v20  ;;  %v1103_v57 = vld [vmem:[%s1392_s1 + $0x1a0] sm:$0xff]   ;;  %v1107_v61 = vld [vmem:[%s1392_s1 + $0x1a8] sm:$0xff]   ;;  %v1109_v63 = vld [vmem:[%s1392_s1 + $0x130] sm:$0xff]  }
  0x15   :  { %960 = vmatpush3.bf16.msra.mxu1 %v1067_v19  ;;  %v1110_v0 = vld [vmem:[%s1392_s1 + $0x1f0] sm:$0xff]   ;;  %v1112_v2 = vld [vmem:[%s1392_s1 + $0x178] sm:$0xff]   ;;  %v1120_v13 = vld [vmem:[%s1392_s1 + $0x200] sm:$0xff]  }
  0x16   :  { %961 = vmatprep.subr.bf16.mxu1 %v1070_v22  ;;  %v1111_v1 = vld [vmem:[%s1392_s1 + $0x1b0] sm:$0xff]   ;;  %v1113_v3 = vld [vmem:[%s1392_s1 + $0x138] sm:$0xff]   ;;  %v1121_v14 = vld [vmem:[%s1392_s1 + $0x208] sm:$0xff]  }
  0x17   :  { %940 = vmatpush3.bf16.msra.mxu0 %v1069_v21  ;;  %v1114_v4 = vld [vmem:[%s1392_s1 + $0x1f8] sm:$0xff]   ;;  %v17_v5 = vld [vmem:[%s1393_s0 + $0x10] sm:$0xff]  ;;  %v1124_v17 = vld [vmem:[%s1392_s1 + $0x220] sm:$0xff]  }
  0x18   :  { %941 = vmatprep.subr.bf16.mxu0 %v1072_v24  ;;  %v852_v6 = vcombine.low %v17_v5, %v17_v5  ;;  %v853_v7 = vcombine.high %v17_v5, %v17_v5  ;;  %v1117_v8 = vld [vmem:[%s1392_s1 + $0x1b8] sm:$0xff]   ;;  %v1122_v15 = vld [vmem:[%s1392_s1 + $0x210] sm:$0xff]   ;;  %v1125_v18 = vld [vmem:[%s1392_s1 + $0x228] sm:$0xff]  }
  0x19   :  { %962 = vmatpush3.bf16.msra.mxu1 %v1071_v23  ;;  %v18_v10 = vld [vmem:[%s1393_s0 + $0x18] sm:$0xff]  ;;  %v1126_v19 = vld [vmem:[%s1392_s1 + $0x230] sm:$0xff]   ;;  %v1128_v21 = vld [vmem:[%s1393_s0 + $0x20] ss:$0 sps:$4 sm:$0xff]  }
  0x1a   :  { %963 = vmatprep.subr.bf16.mxu1 %v1074_v26  ;;  %v854_v11 = vcombine.low %v18_v10, %v18_v10  ;;  %v855_v12 = vcombine.high %v18_v10, %v18_v10  ;;  %v1123_v16 = vld [vmem:[%s1392_s1 + $0x218] sm:$0xff]   ;;  %v847_v23 = vld [vmem:[%s1394_s2] ss:$0 sm:$0xff] }
  0x1b   :  { %942 = vmatpush3.bf16.msra.mxu0 %v1073_v25  ;;  %v1127_v20 = vld [vmem:[%s1392_s1 + $0x238] sm:$0xff]  }
  0x1c   :  { %943 = vmatprep.subr.bf16.mxu0 %v1076_v28 }
  0x1d   :  { %964 = vmatpush3.bf16.msra.mxu1 %v1075_v27 }
  0x1e   :  { %965 = vmatprep.subr.bf16.mxu1 %v1078_v30 }
  0x1f   :  { %944 = vmatpush3.bf16.msra.mxu0 %v1077_v29 }
  0x20   :  { %973 = vmatprep.subr.bf16.mxu0 %v1082_v35 }
  0x21   :  { %966 = vmatpush3.bf16.msra.mxu1 %v1081_v34 }
  0x22   :  { %668 = vmatmul.mubr.bf16.vlgmr.msra.gmra.mrb[0].mxu0 %v848_v32  ;;  %995 = vmatprep.subr.bf16.mxu1 %v1086_v40 }
  0x23   :  { %974 = vmatpush3.bf16.msra.mxu0 %v1085_v39  ;;  %747 = vmatprep.mubr.bf16.mxu0 %v853_v7 }
  0x24   :  { %708 = vmatmul.mubr.bf16.vlgmr.msra.gmra.mrb[0].mxu1 %v850_v37  ;;  %975 = vmatprep.subr.bf16.mxu0 %v1088_v42 }
  0x25   :  { %996 = vmatpush3.bf16.msra.mxu1 %v1087_v41  ;;  %787 = vmatprep.mubr.bf16.mxu1 %v855_v12 }
  0x26   :  { %997 = vmatprep.subr.bf16.mxu1 %v1090_v44 }
  0x27   :  { %976 = vmatpush3.bf16.msra.mxu0 %v1089_v43 }
  0x28   :  { %977 = vmatprep.subr.bf16.mxu0 %v1092_v46 }
  0x29   :  { %998 = vmatpush3.bf16.msra.mxu1 %v1091_v45 }
  0x2a   :  { %999 = vmatprep.subr.bf16.mxu1 %v1094_v48 }
  0x2b   :  { %978 = vmatpush3.bf16.msra.mxu0 %v1093_v47 }
  0x2c   :  { %979 = vmatprep.subr.bf16.mxu0 %v1096_v50 }
  0x2d   :  { %1000 = vmatpush3.bf16.msra.mxu1 %v1095_v49 }
  0x2e   :  { %1001 = vmatprep.subr.bf16.mxu1 %v1098_v52 }
  0x2f   :  { %980 = vmatpush3.bf16.msra.mxu0 %v1097_v51 }
  0x30   :  { %981 = vmatprep.subr.bf16.mxu0 %v1100_v54 }
  0x31   :  { %1002 = vmatpush3.bf16.msra.mxu1 %v1099_v53 }
  0x32   :  { %1003 = vmatprep.subr.bf16.mxu1 %v1102_v56 }
  0x33   :  { %982 = vmatpush3.bf16.msra.mxu0 %v1101_v55 }
  0x34   :  { %983 = vmatprep.subr.bf16.mxu0 %v1104_v58 }
  0x35   :  { %1004 = vmatpush3.bf16.msra.mxu1 %v1103_v57 }
  0x36   :  { %1005 = vmatprep.subr.bf16.mxu1 %v1106_v60 }
  0x37   :  { %984 = vmatpush3.bf16.msra.mxu0 %v1105_v59 }
  0x38   :  { %985 = vmatprep.subr.bf16.mxu0 %v1108_v62 }
  0x39   :  { %1006 = vmatpush3.bf16.msra.mxu1 %v1107_v61 }
  0x3a   :  { %1007 = vmatprep.subr.bf16.mxu1 %v1110_v0 }
  0x3b   :  { %986 = vmatpush3.bf16.msra.mxu0 %v1109_v63 }
  0x3c   :  { %987 = vmatprep.subr.bf16.mxu0 %v1112_v2 }
  0x3d   :  { %1008 = vmatpush3.bf16.msra.mxu1 %v1111_v1 }
  0x3e   :  { %1009 = vmatprep.subr.bf16.mxu1 %v1114_v4 }
  0x3f   :  { %988 = vmatpush3.bf16.msra.mxu0 %v1113_v3 }
  0x40   :  { %1026 = vmatprep.subr.bf16.mxu0 %v1133_v9 }
  0x41   :  { %1010 = vmatpush3.bf16.msra.mxu1 %v1117_v8 }
  0x42   :  { %748 = vmatmul.mubr.bf16.vlgmr.msra.gmra.mrb[4].mxu0 %v852_v6 }
  0x43   :  { %1027 = vmatpush3.bf16.msra.mxu0 %v1120_v13  ;;  %1042 = vmatprep.mubr.msk.bf16.mxu0 %vm1134_vm0, %v1133_v9 }
  0x44   :  { %788 = vmatmul.mubr.bf16.vlgmr.msra.gmra.mrb[4].mxu1 %v854_v11  ;;  %1028 = vmatprep.subr.bf16.mxu0 %v1133_v9 }
  0x47   :  { %1029 = vmatpush3.bf16.msra.mxu0 %v1121_v14 }
  0x48   :  { %1030 = vmatprep.subr.bf16.mxu0 %v1133_v9 }
  0x4b   :  { %1031 = vmatpush3.bf16.msra.mxu0 %v1122_v15 }
  0x4c   :  { %1032 = vmatprep.subr.bf16.mxu0 %v1133_v9 }
  0x4f   :  { %1033 = vmatpush3.bf16.msra.mxu0 %v1123_v16 }
  0x50   :  { %1034 = vmatprep.subr.bf16.mxu0 %v1133_v9 }
  0x53   :  { %1035 = vmatpush3.bf16.msra.mxu0 %v1124_v17 }
  0x54   :  { %1036 = vmatprep.subr.bf16.mxu0 %v1133_v9 }
  0x57   :  { %1037 = vmatpush3.bf16.msra.mxu0 %v1125_v18 }
  0x58   :  { %1038 = vmatprep.subr.bf16.mxu0 %v1133_v9 }
  0x5b   :  { %1039 = vmatpush3.bf16.msra.mxu0 %v1126_v19 }
  0x5c   :  { %1040 = vmatprep.subr.bf16.mxu0 %v1133_v9 }
  0x5f   :  { %1041 = vmatpush3.bf16.msra.mxu0 %v1127_v20 }
  0x62   :  { %1043 = vmatmul.mubr.bf16.vlgmr.msra.gmra.mrb[8].mxu0 %v1128_v21 }
  0xf5   :  { %v945_v22 = vpop.f32.mrb[0].mxu0 }
  0xf6   :  { %v946_v24 = vpop.f32.mrb[1].mxu0 }
  0xf7   :  { %v947_v25 = vadd.f32 %v946_v24, %v945_v22  ;;  %v948_v26 = vpop.f32.mrb[2].mxu0  ;;  %v967_v27 = vpop.f32.mrb[0].mxu1 }
  0xf8   :  { %v949_v28 = vpop.f32.mrb[3].mxu0  ;;  %v968_v29 = vpop.f32.mrb[1].mxu1 }
  0xf9   :  { %v670_v30 = vadd.f32 %v947_v25, %v847_v23  ;;  %v969_v31 = vadd.f32 %v968_v29, %v967_v27  ;;  %v970_v32 = vpop.f32.mrb[2].mxu1 }
  0xfa   :  { %v971_v33 = vpop.f32.mrb[3].mxu1 }
  0xfb   :  { %v710_v34 = vadd.f32 %v969_v31, %v670_v30 }
 0x115   :  { %v989_v35 = vpop.f32.mrb[4].mxu0 }
 0x116   :  { %v990_v36 = vpop.f32.mrb[5].mxu0 }
 0x117   :  { %v991_v37 = vadd.f32 %v990_v36, %v989_v35  ;;  %v992_v38 = vpop.f32.mrb[6].mxu0  ;;  %v1011_v39 = vpop.f32.mrb[4].mxu1 }
 0x118   :  { %v993_v40 = vpop.f32.mrb[7].mxu0  ;;  %v1012_v41 = vpop.f32.mrb[5].mxu1 }
 0x119   :  { %v750_v42 = vadd.f32 %v991_v37, %v710_v34  ;;  %v1013_v43 = vadd.f32 %v1012_v41, %v1011_v39  ;;  %v1014_v44 = vpop.f32.mrb[6].mxu1 }
 0x11a   :  { %v1015_v45 = vpop.f32.mrb[7].mxu1 }
 0x11b   :  { %v790_v46 = vadd.f32 %v1013_v43, %v750_v42 }
 0x135   :  { %v829_v47 = vpop.f32.mrb[8].mxu0 }
 0x136   :  { %v830_v48 = vadd.f32 %v829_v47, %v790_v46  ;;  %v1044_v49 = vpop.f32.mrb[9].mxu0 }
 0x137   :  { %v832_v50 = vpop.f32.mrb[10].mxu0 }
 0x138   :  { %v835_v51 = vsub.f32 0.0, %v830_v48  ;;  %v1045_v52 = vpop.f32.mrb[11].mxu0 }
 0x13a   :  { %v836_v53 = vmul.f32 1.442695, %v835_v51 }
 0x13c   :  { %1129 = vpow2.f32 %v836_v53 }
 0x146   :  { %v1130_v54 = vpop.eup %1129 }
 0x147   :  { %v838_v55 = vadd.f32 1.0, %v1130_v54 }
 0x149   :  { %1131 = vrcp.f32 %v838_v55 }
 0x153   :  { %v1132_v56 = vpop.eup %1131 }
 0x154   :  { %v840_v57 = vmul.f32 %v1132_v56, %v830_v48 }
 0x156   :  { %v841_v58 = vpack.c.bf16 %v840_v57, %v840_v57 }
 0x158   :  { %842 = vst [vmem:[%s1395_s3] sm:$0xf] %v841_v58 }

</bundles_post_ra>
